<compile_context>
chip_gen: v7x
topology: tpu7x:2x2x1
jax: 0.10.0
libtpu: 0.0.40
codegen_flags: <defaults>
</compile_context>

<pallas_src>
import math
import functools

import jax
import jax.numpy as jnp
from jax.experimental import pallas as pl
from jax.experimental.pallas import tpu as pltpu

_MIB = 1024 * 1024

# MXU operand dtype for projection / FFN matmuls (accumulation stays f32 via
# preferred_element_type). bf16 is the right choice on v5e/v6e/v7x (~2-3x MXU
# throughput + halved weight DMA). Set to None for bit-exact f32 parity.
MXU_DTYPE = jnp.bfloat16
# Attention QK^T / PV operand dtype. Kept f32 so the returned attention-weight
# tensors match an f32 reference; set to jnp.bfloat16 if looser tolerance is OK.
ATTN_MXU_DTYPE = None


def _mxu(x):
    return x if MXU_DTYPE is None else x.astype(MXU_DTYPE)


def _amxu(x):
    return x if ATTN_MXU_DTYPE is None else x.astype(ATTN_MXU_DTYPE)


def _pick_tile(n, cands):
    if n <= cands[0]:
        return n
    for t in cands:
        if n % t == 0:
            return t
    return n  # fallback: single block


def _row_tile(m):
    return _pick_tile(m, (512, 256, 128, 64, 32, 16, 8))


def _k_tile(k):
    return _pick_tile(k, (1024, 512, 256, 128))


def _n_tile(n):
    return _pick_tile(n, (1024, 512, 256, 128))


def _vmem_params(est_bytes, *dims):
    # Explicit scoped-VMEM limit (default is only 16/32 MiB); cap at 64 MiB so it
    # is valid on v7x as well as v5e/v6e.
    limit = int(min(64 * _MIB, max(32 * _MIB, int(est_bytes * 1.5))))
    return pltpu.CompilerParams(dimension_semantics=dims, vmem_limit_bytes=limit)


# ----------------------------------------------------------------------------
# fused projection: (q,k,v) = act(x @ W_r + b_r) for r in 0..n_out-1
# Grid (M/tm, d_out/tn, K/tk); f32 VMEM accumulator per output (P3 pattern).
# ----------------------------------------------------------------------------
def _fused_linear_kernel(x_ref, w_ref, b_ref, *refs, n_out, activation):
    out_refs = refs[:n_out]
    acc_ref = refs[n_out]
    k = pl.program_id(2)

    @pl.when(k == 0)
    def _():
        acc_ref[...] = jnp.zeros_like(acc_ref)

    x = _mxu(x_ref[...])
    for r in range(n_out):  # static unroll over fused outputs
        acc_ref[r] += jnp.dot(x, w_ref[r], preferred_element_type=jnp.float32)

    @pl.when(k == pl.num_programs(2) - 1)
    def _():
        b = b_ref[...].astype(jnp.float32)
        for r in range(n_out):
            y = acc_ref[r] + b[r:r + 1, :]
            if activation == "relu":
                y = jnp.maximum(y, 0.0)
            out_refs[r][...] = y.astype(out_refs[r].dtype)


def fused_linear(x2d, w_stk, b_stk, activation=None):
    """x2d: (M, K); w_stk: (n_out, K, d_out); b_stk: (n_out, d_out).
    Returns a tuple of n_out (M, d_out) arrays: act(x @ W_r + b_r)."""
    M, K = x2d.shape
    n_out, _, d_out = w_stk.shape
    tm, tk, tn = _row_tile(M), _k_tile(K), _n_tile(d_out)

    if MXU_DTYPE is not None:
        # Cast weights outside the kernel so the per-tile weight DMA is halved.
        # (In production the params would be stored pre-cast.)
        w_stk = w_stk.astype(MXU_DTYPE)

    est = 2 * (tm * tk * x2d.dtype.itemsize
               + n_out * tk * tn * w_stk.dtype.itemsize
               + n_out * tn * 4
               + n_out * tm * tn * x2d.dtype.itemsize) \
        + n_out * tm * tn * 4  # accumulator scratch

    return pl.pallas_call(
        functools.partial(_fused_linear_kernel, n_out=n_out, activation=activation),
        out_shape=tuple(jax.ShapeDtypeStruct((M, d_out), x2d.dtype)
                        for _ in range(n_out)),
        grid_spec=pltpu.PrefetchScalarGridSpec(
            num_scalar_prefetch=0,
            grid=(M // tm, d_out // tn, K // tk),
            in_specs=[
                pl.BlockSpec((tm, tk), lambda i, j, k: (i, k)),
                pl.BlockSpec((n_out, tk, tn), lambda i, j, k: (0, k, j)),
                pl.BlockSpec((n_out, tn), lambda i, j, k: (0, j)),
            ],
            out_specs=tuple(pl.BlockSpec((tm, tn), lambda i, j, k: (i, j))
                            for _ in range(n_out)),
            scratch_shapes=[pltpu.VMEM((n_out, tm, tn), jnp.float32)],
        ),
        compiler_params=_vmem_params(est, "parallel", "parallel", "arbitrary"),
    )(x2d, w_stk, b_stk)


# ----------------------------------------------------------------------------
# fused: LayerNorm((x @ W + b) + residual), K-tiled reduction.
# (No N tiling: LayerNorm needs the full d_model row for mean/var.)
# ----------------------------------------------------------------------------
def _linear_res_ln_kernel(x_ref, w_ref, b_ref, r_ref, g_ref, beta_ref, o_ref,
                          acc_ref, *, eps):
    k = pl.program_id(1)

    @pl.when(k == 0)
    def _():
        acc_ref[...] = jnp.zeros_like(acc_ref)

    acc_ref[...] += jnp.dot(_mxu(x_ref[...]), w_ref[...],
                            preferred_element_type=jnp.float32)

    @pl.when(k == pl.num_programs(1) - 1)
    def _():
        y = acc_ref[...] + b_ref[...].astype(jnp.float32) \
            + r_ref[...].astype(jnp.float32)
        mean = jnp.mean(y, axis=-1, keepdims=True)
        yc = y - mean
        var = jnp.mean(yc * yc, axis=-1, keepdims=True)  # biased (PyTorch LN)
        inv = jax.lax.rsqrt(var + eps)                   # EUP rsqrt
        o_ref[...] = (yc * inv * g_ref[...] + beta_ref[...]).astype(o_ref.dtype)


def linear_residual_layernorm(x2d, w, b, residual2d, gamma, beta, eps=1e-6):
    M, K = x2d.shape
    D = w.shape[1]
    tm, tk = _row_tile(M), _k_tile(K)

    if MXU_DTYPE is not None:
        w = w.astype(MXU_DTYPE)

    est = 2 * (tm * tk * x2d.dtype.itemsize
               + tk * D * w.dtype.itemsize
               + tm * D * residual2d.dtype.itemsize
               + 3 * D * 4
               + tm * D * x2d.dtype.itemsize) \
        + tm * D * 4

    return pl.pallas_call(
        functools.partial(_linear_res_ln_kernel, eps=eps),
        out_shape=jax.ShapeDtypeStruct((M, D), x2d.dtype),
        grid_spec=pltpu.PrefetchScalarGridSpec(
            num_scalar_prefetch=0,
            grid=(M // tm, K // tk),
            in_specs=[
                pl.BlockSpec((tm, tk), lambda i, k: (i, k)),
                pl.BlockSpec((tk, D), lambda i, k: (k, 0)),
                pl.BlockSpec((1, D), lambda i, k: (0, 0)),
                pl.BlockSpec((tm, D), lambda i, k: (i, 0)),
                pl.BlockSpec((1, D), lambda i, k: (0, 0)),
                pl.BlockSpec((1, D), lambda i, k: (0, 0)),
            ],
            out_specs=pl.BlockSpec((tm, D), lambda i, k: (i, 0)),
            scratch_shapes=[pltpu.VMEM((tm, D), jnp.float32)],
        ),
        compiler_params=_vmem_params(est, "parallel", "arbitrary"),
    )(x2d, w, b.reshape(1, D), residual2d, gamma.reshape(1, D), beta.reshape(1, D))


# ----------------------------------------------------------------------------
# multi-head attention core (all heads in one kernel, heads as lane slices)
# ----------------------------------------------------------------------------
def _mha_attn_kernel(q_ref, k_ref, v_ref, m_ref, o_ref, w_ref, acc_ref,
                     *, num_heads, scale, mask_mode):
    D = q_ref.shape[-1]
    dh = D // num_heads

    # Additive mask term built once per tile on the VPU (no HBM broadcast).
    if mask_mode == "shared2d":        # (tq, Sk): shared across batch & heads
        neg = m_ref[...].astype(jnp.float32) * (-1e9)
    elif mask_mode == "key":           # (1, 1, Sk): per-batch key padding mask
        neg = m_ref[0].astype(jnp.float32) * (-1e9)   # (1, Sk) -> bcast over rows
    else:                              # "per_batch": (1, tq, Sk)
        neg = m_ref[0].astype(jnp.float32) * (-1e9)

    q = q_ref[0].astype(jnp.float32) * scale   # fold 1/sqrt(dh) into q: O(S*dh)
    k = k_ref[0].astype(jnp.float32)
    v = v_ref[0].astype(jnp.float32)

    for h in range(num_heads):                  # static unroll over heads
        lo = h * dh
        qh = _amxu(q[:, lo:lo + dh])            # (tq, dh) lane slice
        kh = _amxu(k[:, lo:lo + dh])            # (Sk, dh)
        vh = _amxu(v[:, lo:lo + dh])
        # Contract on the dh axis of both operands: no explicit kh.T (no XLU
        # transpose, no transient VMEM copy).
        s = jax.lax.dot_general(qh, kh, (((1,), (1,)), ((), ())),
                                preferred_element_type=jnp.float32) + neg
        mx = jnp.max(s, axis=-1, keepdims=True)
        e = jnp.exp(s - mx)
        den = jnp.sum(e, axis=-1, keepdims=True)
        # approx=True would use the otherwise idle EUP vrcp slot; kept exact for
        # parity with the PyTorch softmax.
        wh = e * pl.reciprocal(den, approx=False)
        # Write this head's context straight into its scratch slice so the
        # per-head score/exp/weight temporaries die here (no o_parts/concat).
        acc_ref[:, lo:lo + dh] = jnp.dot(_amxu(wh), vh,
                                         preferred_element_type=jnp.float32)
        w_ref[0, h] = wh.astype(w_ref.dtype)

    o_ref[0] = acc_ref[...].astype(o_ref.dtype)   # single lane-dense store


def _attn_q_tile(Sq, Sk, D, num_heads, w_itemsize):
    # Cap the q-tile so double-buffered q/k/v/mask/weights blocks plus the live
    # (tq, Sk) score matrices fit comfortably inside v7x's 64 MiB VMEM.
    budget = 20 * _MIB
    cands = [Sq] + [t for t in (512, 256, 128, 64, 32, 16, 8)
                    if t < Sq and Sq % t == 0]
    for t in cands:
        per_tile = 4 * (t * D + 2 * Sk * D + 2 * t * Sk) \
            + w_itemsize * num_heads * t * Sk
        if 2 * per_tile <= budget:
            return t
    return cands[-1]


def multihead_attention_core(q, k, v, mask, num_heads, weights_dtype=jnp.float32):
    # q: (B, Sq, D), k/v: (B, Sk, D); mask broadcastable to (B, 1, Sq, Sk), 1 = masked
    # TODO(synk): gate the attention-weights output behind a flag (skip w_ref and
    # switch to online-softmax Sk streaming) for callers that discard the weights;
    # here they are part of the module's return signature so they are kept.
    B, Sq, D = q.shape
    Sk = k.shape[1]
    dh = D // num_heads
    scale = 1.0 / math.sqrt(dh)

    w_itemsize = jnp.dtype(weights_dtype).itemsize
    tq = _attn_q_tile(Sq, Sk, D, num_heads, w_itemsize)

    # ---- mask handling without materializing a (B, Sq, Sk) broadcast in HBM ----
    m = mask.astype(jnp.float32)
    if m.ndim == 2:
        m = m[None, None]
    elif m.ndim == 3:
        m = m[:, None]

    if m.shape[0] == 1 and m.shape[1] == 1:
        # batch/head-shared mask (e.g. causal look-ahead): keep it 2-D
        m_arr = m.reshape(m.shape[2], m.shape[3])
        if m_arr.shape[0] == 1:
            m_arr = jnp.broadcast_to(m_arr, (Sq, Sk))
        mask_mode = "shared2d"
        m_spec = pl.BlockSpec((tq, Sk), lambda b, qi: (qi, 0))
        m_block_bytes = tq * Sk * 4
    elif m.shape[1] == 1 and m.shape[2] == 1:
        # per-batch key padding mask: broadcast over Sq on the VPU in-kernel
        m_arr = m.reshape(m.shape[0], 1, Sk)
        mask_mode = "key"
        if m_arr.shape[0] == B:
            m_spec = pl.BlockSpec((1, 1, Sk), lambda b, qi: (b, 0, 0))
        else:
            m_spec = pl.BlockSpec((1, 1, Sk), lambda b, qi: (0, 0, 0))
        m_block_bytes = Sk * 4
    else:
        # general fallback: per-batch full mask (still no head broadcast)
        m_arr = jnp.broadcast_to(m, (B, 1, Sq, Sk)).reshape(B, Sq, Sk)
        mask_mode = "per_batch"
        m_spec = pl.BlockSpec((1, tq, Sk), lambda b, qi: (b, qi, 0))
        m_block_bytes = tq * Sk * 4

    est = 2 * (tq * D * 4 + 2 * Sk * D * 4 + m_block_bytes
               + tq * D * 4 + num_heads * tq * Sk * w_itemsize) \
        + tq * D * 4 + 4 * tq * Sk * 4

    return pl.pallas_call(
        functools.partial(_mha_attn_kernel, num_heads=num_heads, scale=scale,
                          mask_mode=mask_mode),
        out_shape=(
            jax.ShapeDtypeStruct((B, Sq, D), q.dtype),
            jax.ShapeDtypeStruct((B, num_heads, Sq, Sk), weights_dtype),
        ),
        grid_spec=pltpu.PrefetchScalarGridSpec(
            num_scalar_prefetch=0,
            grid=(B, Sq // tq),
            in_specs=[
                pl.BlockSpec((1, tq, D), lambda b, qi: (b, qi, 0)),
                pl.BlockSpec((1, Sk, D), lambda b, qi: (b, 0, 0)),
                pl.BlockSpec((1, Sk, D), lambda b, qi: (b, 0, 0)),
                m_spec,
            ],
            out_specs=(
                pl.BlockSpec((1, tq, D), lambda b, qi: (b, qi, 0)),
                pl.BlockSpec((1, num_heads, tq, Sk), lambda b, qi: (b, 0, qi, 0)),
            ),
            scratch_shapes=[pltpu.VMEM((tq, D), jnp.float32)],
        ),
        compiler_params=_vmem_params(est, "parallel", "parallel"),
    )(q, k, v, m_arr)


# ----------------------------------------------------------------------------
# multi-head attention (projections + core)
# ----------------------------------------------------------------------------
def mha_forward(p, q_in, kv_in, mask, num_heads, self_attn):
    B, Sq, D = q_in.shape
    Sk = kv_in.shape[1]

    if self_attn:
        # fused QKV: one x pass, one kernel, three outputs (no HBM slicing)
        w = jnp.stack([p["wq"], p["wk"], p["wv"]], axis=0)
        b = jnp.stack([p["bq"], p["bk"], p["bv"]], axis=0)
        q2d, k2d, v2d = fused_linear(q_in.reshape(-1, D), w, b)
    else:
        (q2d,) = fused_linear(q_in.reshape(-1, D), p["wq"][None], p["bq"][None])
        wkv = jnp.stack([p["wk"], p["wv"]], axis=0)
        bkv = jnp.stack([p["bk"], p["bv"]], axis=0)
        k2d, v2d = fused_linear(kv_in.reshape(-1, D), wkv, bkv)

    ctx, attn_w = multihead_attention_core(
        q2d.reshape(B, Sq, D), k2d.reshape(B, Sk, D), v2d.reshape(B, Sk, D),
        mask, num_heads)
    # output projection is fused with residual+LayerNorm by the caller
    return ctx, attn_w


# ----------------------------------------------------------------------------
# DecoderLayer forward
# ----------------------------------------------------------------------------
def decoder_layer(params, x, enc_output, look_ahead_mask, padding_mask, num_heads):
    B, S, D = x.shape
    x2d = x.reshape(-1, D)

    # --- block 1: masked self-attention ---
    ctx1, attn_w1 = mha_forward(params["mha1"], x, x, look_ahead_mask,
                                num_heads, self_attn=True)
    # dropout1: identity (inference). Output projection + residual + LN1 fused.
    out1_2d = linear_residual_layernorm(
        ctx1.reshape(-1, D), params["mha1"]["wo"], params["mha1"]["bo"],
        x2d, params["ln1_g"], params["ln1_b"])
    out1 = out1_2d.reshape(B, S, D)

    # --- block 2: cross-attention over encoder output ---
    ctx2, attn_w2 = mha_forward(params["mha2"], out1, enc_output, padding_mask,
                                num_heads, self_attn=False)
    # dropout2: identity. Output projection + residual + LN2 fused.
    out2_2d = linear_residual_layernorm(
        ctx2.reshape(-1, D), params["mha2"]["wo"], params["mha2"]["bo"],
        out1_2d, params["ln2_g"], params["ln2_b"])

    # --- block 3: position-wise FFN ---
    (h,) = fused_linear(out2_2d, params["ffn_w1"][None], params["ffn_b1"][None],
                        activation="relu")
    # dropout3: identity. FFN second matmul + residual + LN3 fused.
    out3_2d = linear_residual_layernorm(
        h, params["ffn_w2"], params["ffn_b2"],
        out2_2d, params["ln3_g"], params["ln3_b"])

    return out3_2d.reshape(B, S, D), attn_w1, attn_w2


# ----------------------------------------------------------------------------
# parameter init
# ----------------------------------------------------------------------------
def init_params(key, d_model, dff):
    ks = list(jax.random.split(key, 4))

    def lin(k, fan_in, fan_out):
        kw, kb = jax.random.split(k)
        w = jax.random.normal(kw, (fan_in, fan_out), jnp.float32) * 0.05
        b = jax.random.normal(kb, (fan_out,), jnp.float32) * 0.01
        return w, b

    def mha_params(k):
        k1, k2, k3, k4 = jax.random.split(k, 4)
        wq, bq = lin(k1, d_model, d_model)
        wk, bk = lin(k2, d_model, d_model)
        wv, bv = lin(k3, d_model, d_model)
        wo, bo = lin(k4, d_model, d_model)
        return dict(wq=wq, bq=bq, wk=wk, bk=bk, wv=wv, bv=bv, wo=wo, bo=bo)

    w1, b1 = lin(ks[2], d_model, dff)
    w2, b2 = lin(ks[3], dff, d_model)

    return dict(
        mha1=mha_params(ks[0]),
        mha2=mha_params(ks[1]),
        ffn_w1=w1, ffn_b1=b1, ffn_w2=w2, ffn_b2=b2,
        ln1_g=jnp.ones((d_model,), jnp.float32), ln1_b=jnp.zeros((d_model,), jnp.float32),
        ln2_g=jnp.ones((d_model,), jnp.float32), ln2_b=jnp.zeros((d_model,), jnp.float32),
        ln3_g=jnp.ones((d_model,), jnp.float32), ln3_b=jnp.zeros((d_model,), jnp.float32),
    )


if __name__ == "__main__":
    B, S_DEC, S_ENC = 2, 8, 8
    D_MODEL, NUM_HEADS, DFF = 32, 4, 64

    key = jax.random.PRNGKey(0)
    k_x, k_enc, k_p = jax.random.split(key, 3)

    x = jax.random.normal(k_x, (B, S_DEC, D_MODEL), jnp.float32)
    enc_output = jax.random.normal(k_enc, (B, S_ENC, D_MODEL), jnp.float32)

    # look-ahead mask: 1.0 where attention is NOT allowed (future positions)
    look_ahead_mask = jnp.triu(jnp.ones((S_DEC, S_DEC), jnp.float32), k=1)[None, None]
    # padding mask: 1.0 where encoder position is padded (none here)
    padding_mask = jnp.zeros((B, 1, 1, S_ENC), jnp.float32)

    params = init_params(k_p, D_MODEL, DFF)

    fwd = jax.jit(functools.partial(decoder_layer, num_heads=NUM_HEADS))
    out3, w1, w2 = fwd(params, x, enc_output, look_ahead_mask, padding_mask)
    jax.block_until_ready((out3, w1, w2))

    assert out3.shape == (B, S_DEC, D_MODEL)
    assert w1.shape == (B, NUM_HEADS, S_DEC, S_DEC)
    assert w2.shape == (B, NUM_HEADS, S_DEC, S_ENC)
    assert bool(jnp.all(jnp.isfinite(out3)))
    assert bool(jnp.all(jnp.isfinite(w1))) and bool(jnp.all(jnp.isfinite(w2)))
    print("KERNEL_OK")
</pallas_src>

<mosaic_0001>
module attributes {stable_mosaic.version = 11 : i64} {
  func.func @_fused_linear_kernel(%arg0: i32, %arg1: i32, %arg2: i32, %arg3: memref<16x32xf32, #tpu.memory_space<vmem>>, %arg4: memref<3x32x32xbf16, #tpu.memory_space<vmem>>, %arg5: memref<3x32xf32, #tpu.memory_space<vmem>>, %arg6: memref<16x32xf32, #tpu.memory_space<vmem>>, %arg7: memref<16x32xf32, #tpu.memory_space<vmem>>, %arg8: memref<16x32xf32, #tpu.memory_space<vmem>>, %arg9: memref<3x16x32xf32, #tpu.memory_space<vmem>>) attributes {dimension_semantics = [#tpu.dimension_semantics<parallel>, #tpu.dimension_semantics<parallel>, #tpu.dimension_semantics<arbitrary>], iteration_bounds = array<i64: 1, 1, 1>, scalar_prefetch = 0 : i64, scratch_operands = 1 : i64, tpu.core_type = #tpu.core_type<tc>, window_params = [{transform_indices = @transform_0, window_bounds = array<i64: 16, 32>}, {transform_indices = @transform_1, window_bounds = array<i64: 3, 32, 32>}, {transform_indices = @transform_2, window_bounds = array<i64: 3, 32>}, {transform_indices = @transform_3, window_bounds = array<i64: 16, 32>}, {transform_indices = @transform_4, window_bounds = array<i64: 16, 32>}, {transform_indices = @transform_5, window_bounds = array<i64: 16, 32>}]} {
    %c0_i32 = arith.constant 0 : i32
    %0 = arith.cmpi eq, %arg2, %c0_i32 : i32
    %1 = arith.extui %0 : i1 to i32
    %c0_i32_0 = arith.constant 0 : i32
    %2 = arith.cmpi ne, %1, %c0_i32_0 : i32
    scf.if %2 {
      %cst_31 = arith.constant 0.000000e+00 : f32
      %35 = vector.broadcast %cst_31 : f32 to vector<3x16x32xf32>
      %c0_32 = arith.constant 0 : index
      %c0_33 = arith.constant 0 : index
      %c0_34 = arith.constant 0 : index
      %36 = vector.load %arg9[%c0_32, %c0_33, %c0_34] : memref<3x16x32xf32, #tpu.memory_space<vmem>>, vector<3x16x32xf32>
      tpu.vector_store %arg9[%c0_32, %c0_33, %c0_34], %35 {strides = array<i32>} : memref<3x16x32xf32, #tpu.memory_space<vmem>>, vector<3x16x32xf32>,
    } else {
    }
    %c0 = arith.constant 0 : index
    %c0_1 = arith.constant 0 : index
    %3 = vector.load %arg3[%c0, %c0_1] : memref<16x32xf32, #tpu.memory_space<vmem>>, vector<16x32xf32>
    %4 = arith.truncf %3 : vector<16x32xf32> to vector<16x32xbf16>
    %c0_2 = arith.constant 0 : index
    %c0_3 = arith.constant 0 : index
    %c0_4 = arith.constant 0 : index
    %5 = vector.load %arg9[%c0_2, %c0_3, %c0_4] : memref<3x16x32xf32, #tpu.memory_space<vmem>>, vector<1x16x32xf32>
    %6 = vector.shape_cast %5 : vector<1x16x32xf32> to vector<16x32xf32>
    %c0_5 = arith.constant 0 : index
    %c0_6 = arith.constant 0 : index
    %c0_7 = arith.constant 0 : index
    %7 = vector.load %arg4[%c0_5, %c0_6, %c0_7] : memref<3x32x32xbf16, #tpu.memory_space<vmem>>, vector<1x32x32xbf16>
    %8 = vector.shape_cast %7 : vector<1x32x32xbf16> to vector<32x32xbf16>
    %cst = arith.constant dense<0.000000e+00> : vector<16x32xf32>
    %9 = tpu.matmul %4, %8, %cst {dimension_numbers = #tpu.dot_dimension_numbers<[1], [0], [0], [1], [0, 0, 1, 1], [], []>} : vector<16x32xbf16>, vector<32x32xbf16>, vector<16x32xf32> -> vector<16x32xf32>
    %10 = arith.addf %6, %9 : vector<16x32xf32>
    %c0_8 = arith.constant 0 : index
    %c0_9 = arith.constant 0 : index
    %c0_10 = arith.constant 0 : index
    %11 = vector.load %arg9[%c0_8, %c0_9, %c0_10] : memref<3x16x32xf32, #tpu.memory_space<vmem>>, vector<1x16x32xf32>
    %12 = vector.shape_cast %11 : vector<1x16x32xf32> to vector<16x32xf32>
    %13 = vector.shape_cast %10 : vector<16x32xf32> to vector<1x16x32xf32>
    tpu.vector_store %arg9[%c0_8, %c0_9, %c0_10], %13 {strides = array<i32>} : memref<3x16x32xf32, #tpu.memory_space<vmem>>, vector<1x16x32xf32>,
    %c1 = arith.constant 1 : index
    %c0_11 = arith.constant 0 : index
    %c0_12 = arith.constant 0 : index
    %14 = vector.load %arg9[%c1, %c0_11, %c0_12] : memref<3x16x32xf32, #tpu.memory_space<vmem>>, vector<1x16x32xf32>
    %15 = vector.shape_cast %14 : vector<1x16x32xf32> to vector<16x32xf32>
    %c1_13 = arith.constant 1 : index
    %c0_14 = arith.constant 0 : index
    %c0_15 = arith.constant 0 : index
    %16 = vector.load %arg4[%c1_13, %c0_14, %c0_15] : memref<3x32x32xbf16, #tpu.memory_space<vmem>>, vector<1x32x32xbf16>
    %17 = vector.shape_cast %16 : vector<1x32x32xbf16> to vector<32x32xbf16>
    %cst_16 = arith.constant dense<0.000000e+00> : vector<16x32xf32>
    %18 = tpu.matmul %4, %17, %cst_16 {dimension_numbers = #tpu.dot_dimension_numbers<[1], [0], [0], [1], [0, 0, 1, 1], [], []>} : vector<16x32xbf16>, vector<32x32xbf16>, vector<16x32xf32> -> vector<16x32xf32>
    %19 = arith.addf %15, %18 : vector<16x32xf32>
    %c1_17 = arith.constant 1 : index
    %c0_18 = arith.constant 0 : index
    %c0_19 = arith.constant 0 : index
    %20 = vector.load %arg9[%c1_17, %c0_18, %c0_19] : memref<3x16x32xf32, #tpu.memory_space<vmem>>, vector<1x16x32xf32>
    %21 = vector.shape_cast %20 : vector<1x16x32xf32> to vector<16x32xf32>
    %22 = vector.shape_cast %19 : vector<16x32xf32> to vector<1x16x32xf32>
    tpu.vector_store %arg9[%c1_17, %c0_18, %c0_19], %22 {strides = array<i32>} : memref<3x16x32xf32, #tpu.memory_space<vmem>>, vector<1x16x32xf32>,
    %c2 = arith.constant 2 : index
    %c0_20 = arith.constant 0 : index
    %c0_21 = arith.constant 0 : index
    %23 = vector.load %arg9[%c2, %c0_20, %c0_21] : memref<3x16x32xf32, #tpu.memory_space<vmem>>, vector<1x16x32xf32>
    %24 = vector.shape_cast %23 : vector<1x16x32xf32> to vector<16x32xf32>
    %c2_22 = arith.constant 2 : index
    %c0_23 = arith.constant 0 : index
    %c0_24 = arith.constant 0 : index
    %25 = vector.load %arg4[%c2_22, %c0_23, %c0_24] : memref<3x32x32xbf16, #tpu.memory_space<vmem>>, vector<1x32x32xbf16>
    %26 = vector.shape_cast %25 : vector<1x32x32xbf16> to vector<32x32xbf16>
    %cst_25 = arith.constant dense<0.000000e+00> : vector<16x32xf32>
    %27 = tpu.matmul %4, %26, %cst_25 {dimension_numbers = #tpu.dot_dimension_numbers<[1], [0], [0], [1], [0, 0, 1, 1], [], []>} : vector<16x32xbf16>, vector<32x32xbf16>, vector<16x32xf32> -> vector<16x32xf32>
    %28 = arith.addf %24, %27 : vector<16x32xf32>
    %c2_26 = arith.constant 2 : index
    %c0_27 = arith.constant 0 : index
    %c0_28 = arith.constant 0 : index
    %29 = vector.load %arg9[%c2_26, %c0_27, %c0_28] : memref<3x16x32xf32, #tpu.memory_space<vmem>>, vector<1x16x32xf32>
    %30 = vector.shape_cast %29 : vector<1x16x32xf32> to vector<16x32xf32>
    %31 = vector.shape_cast %28 : vector<16x32xf32> to vector<1x16x32xf32>
    tpu.vector_store %arg9[%c2_26, %c0_27, %c0_28], %31 {strides = array<i32>} : memref<3x16x32xf32, #tpu.memory_space<vmem>>, vector<1x16x32xf32>,
    %c0_i32_29 = arith.constant 0 : i32
    %32 = arith.cmpi eq, %arg2, %c0_i32_29 : i32
    %33 = arith.extui %32 : i1 to i32
    %c0_i32_30 = arith.constant 0 : i32
    %34 = arith.cmpi ne, %33, %c0_i32_30 : i32
    scf.if %34 {
      %c0_31 = arith.constant 0 : index
      %c0_32 = arith.constant 0 : index
      %35 = vector.load %arg5[%c0_31, %c0_32] : memref<3x32xf32, #tpu.memory_space<vmem>>, vector<3x32xf32>
      %c0_33 = arith.constant 0 : index
      %c0_34 = arith.constant 0 : index
      %c0_35 = arith.constant 0 : index
      %36 = vector.load %arg9[%c0_33, %c0_34, %c0_35] : memref<3x16x32xf32, #tpu.memory_space<vmem>>, vector<1x16x32xf32>
      %37 = vector.shape_cast %36 : vector<1x16x32xf32> to vector<16x32xf32>
      %38 = vector.extract_strided_slice %35 {offsets = [0, 0], sizes = [1, 32], strides = [1, 1]} : vector<3x32xf32> to vector<1x32xf32>
      %39 = vector.broadcast %38 : vector<1x32xf32> to vector<16x32xf32>
      %40 = arith.addf %37, %39 : vector<16x32xf32>
      %c0_36 = arith.constant 0 : index
      %c0_37 = arith.constant 0 : index
      %41 = vector.load %arg6[%c0_36, %c0_37] : memref<16x32xf32, #tpu.memory_space<vmem>>, vector<16x32xf32>
      tpu.vector_store %arg6[%c0_36, %c0_37], %40 {strides = array<i32>} : memref<16x32xf32, #tpu.memory_space<vmem>>, vector<16x32xf32>,
      %c1_38 = arith.constant 1 : index
      %c0_39 = arith.constant 0 : index
      %c0_40 = arith.constant 0 : index
      %42 = vector.load %arg9[%c1_38, %c0_39, %c0_40] : memref<3x16x32xf32, #tpu.memory_space<vmem>>, vector<1x16x32xf32>
      %43 = vector.shape_cast %42 : vector<1x16x32xf32> to vector<16x32xf32>
      %44 = vector.extract_strided_slice %35 {offsets = [1, 0], sizes = [1, 32], strides = [1, 1]} : vector<3x32xf32> to vector<1x32xf32>
      %45 = vector.broadcast %44 : vector<1x32xf32> to vector<16x32xf32>
      %46 = arith.addf %43, %45 : vector<16x32xf32>
      %c0_41 = arith.constant 0 : index
      %c0_42 = arith.constant 0 : index
      %47 = vector.load %arg7[%c0_41, %c0_42] : memref<16x32xf32, #tpu.memory_space<vmem>>, vector<16x32xf32>
      tpu.vector_store %arg7[%c0_41, %c0_42], %46 {strides = array<i32>} : memref<16x32xf32, #tpu.memory_space<vmem>>, vector<16x32xf32>,
      %c2_43 = arith.constant 2 : index
      %c0_44 = arith.constant 0 : index
      %c0_45 = arith.constant 0 : index
      %48 = vector.load %arg9[%c2_43, %c0_44, %c0_45] : memref<3x16x32xf32, #tpu.memory_space<vmem>>, vector<1x16x32xf32>
      %49 = vector.shape_cast %48 : vector<1x16x32xf32> to vector<16x32xf32>
      %50 = vector.extract_strided_slice %35 {offsets = [2, 0], sizes = [1, 32], strides = [1, 1]} : vector<3x32xf32> to vector<1x32xf32>
      %51 = vector.broadcast %50 : vector<1x32xf32> to vector<16x32xf32>
      %52 = arith.addf %49, %51 : vector<16x32xf32>
      %c0_46 = arith.constant 0 : index
      %c0_47 = arith.constant 0 : index
      %53 = vector.load %arg8[%c0_46, %c0_47] : memref<16x32xf32, #tpu.memory_space<vmem>>, vector<16x32xf32>
      tpu.vector_store %arg8[%c0_46, %c0_47], %52 {strides = array<i32>} : memref<16x32xf32, #tpu.memory_space<vmem>>, vector<16x32xf32>,
    } else {
    }
    return
  }
  func.func @transform_0(%arg0: i32, %arg1: i32, %arg2: i32) -> (i32, i32) {
    %c0_i32 = arith.constant 0 : i32
    return %arg0, %arg2 : i32, i32
  }
  func.func @transform_1(%arg0: i32, %arg1: i32, %arg2: i32) -> (i32, i32, i32) {
    %c0_i32 = arith.constant 0 : i32
    %c0_i32_0 = arith.constant 0 : i32
    return %c0_i32, %arg2, %arg1 : i32, i32, i32
  }
  func.func @transform_2(%arg0: i32, %arg1: i32, %arg2: i32) -> (i32, i32) {
    %c0_i32 = arith.constant 0 : i32
    %c0_i32_0 = arith.constant 0 : i32
    return %c0_i32, %arg1 : i32, i32
  }
  func.func @transform_3(%arg0: i32, %arg1: i32, %arg2: i32) -> (i32, i32) {
    %c0_i32 = arith.constant 0 : i32
    return %arg0, %arg1 : i32, i32
  }
  func.func @transform_4(%arg0: i32, %arg1: i32, %arg2: i32) -> (i32, i32) {
    %c0_i32 = arith.constant 0 : i32
    return %arg0, %arg1 : i32, i32
  }
  func.func @transform_5(%arg0: i32, %arg1: i32, %arg2: i32) -> (i32, i32) {
    %c0_i32 = arith.constant 0 : i32
    return %arg0, %arg1 : i32, i32
  }
}

module attributes {stable_mosaic.version = 11 : i64} {
  func.func @_linear_res_ln_kernel(%arg0: i32, %arg1: i32, %arg2: memref<16x32xf32, #tpu.memory_space<vmem>>, %arg3: memref<32x32xbf16, #tpu.memory_space<vmem>>, %arg4: memref<1x32xf32, #tpu.memory_space<vmem>>, %arg5: memref<16x32xf32, #tpu.memory_space<vmem>>, %arg6: memref<1x32xf32, #tpu.memory_space<vmem>>, %arg7: memref<1x32xf32, #tpu.memory_space<vmem>>, %arg8: memref<16x32xf32, #tpu.memory_space<vmem>>, %arg9: memref<16x32xf32, #tpu.memory_space<vmem>>) attributes {dimension_semantics = [#tpu.dimension_semantics<parallel>, #tpu.dimension_semantics<arbitrary>], iteration_bounds = array<i64: 1, 1>, scalar_prefetch = 0 : i64, scratch_operands = 1 : i64, tpu.core_type = #tpu.core_type<tc>, window_params = [{transform_indices = @transform_0, window_bounds = array<i64: 16, 32>}, {transform_indices = @transform_1, window_bounds = array<i64: 32, 32>}, {pipeline_mode = #tpu.pipeline_mode<synchronous>, transform_indices = @transform_2, window_bounds = array<i64: 1, 32>}, {transform_indices = @transform_3, window_bounds = array<i64: 16, 32>}, {pipeline_mode = #tpu.pipeline_mode<synchronous>, transform_indices = @transform_4, window_bounds = array<i64: 1, 32>}, {pipeline_mode = #tpu.pipeline_mode<synchronous>, transform_indices = @transform_5, window_bounds = array<i64: 1, 32>}, {transform_indices = @transform_6, window_bounds = array<i64: 16, 32>}]} {
    %c0_i32 = arith.constant 0 : i32
    %0 = arith.cmpi eq, %arg1, %c0_i32 : i32
    %1 = arith.extui %0 : i1 to i32
    %c0_i32_0 = arith.constant 0 : i32
    %2 = arith.cmpi ne, %1, %c0_i32_0 : i32
    scf.if %2 {
      %cst_10 = arith.constant 0.000000e+00 : f32
      %13 = vector.broadcast %cst_10 : f32 to vector<16x32xf32>
      %c0_11 = arith.constant 0 : index
      %c0_12 = arith.constant 0 : index
      %14 = vector.load %arg9[%c0_11, %c0_12] : memref<16x32xf32, #tpu.memory_space<vmem>>, vector<16x32xf32>
      tpu.vector_store %arg9[%c0_11, %c0_12], %13 {strides = array<i32>} : memref<16x32xf32, #tpu.memory_space<vmem>>, vector<16x32xf32>,
    } else {
    }
    %c0 = arith.constant 0 : index
    %c0_1 = arith.constant 0 : index
    %3 = vector.load %arg9[%c0, %c0_1] : memref<16x32xf32, #tpu.memory_space<vmem>>, vector<16x32xf32>
    %c0_2 = arith.constant 0 : index
    %c0_3 = arith.constant 0 : index
    %4 = vector.load %arg2[%c0_2, %c0_3] : memref<16x32xf32, #tpu.memory_space<vmem>>, vector<16x32xf32>
    %5 = arith.truncf %4 : vector<16x32xf32> to vector<16x32xbf16>
    %c0_4 = arith.constant 0 : index
    %c0_5 = arith.constant 0 : index
    %6 = vector.load %arg3[%c0_4, %c0_5] : memref<32x32xbf16, #tpu.memory_space<vmem>>, vector<32x32xbf16>
    %cst = arith.constant dense<0.000000e+00> : vector<16x32xf32>
    %7 = tpu.matmul %5, %6, %cst {dimension_numbers = #tpu.dot_dimension_numbers<[1], [0], [0], [1], [0, 0, 1, 1], [], []>} : vector<16x32xbf16>, vector<32x32xbf16>, vector<16x32xf32> -> vector<16x32xf32>
    %8 = arith.addf %3, %7 : vector<16x32xf32>
    %c0_6 = arith.constant 0 : index
    %c0_7 = arith.constant 0 : index
    %9 = vector.load %arg9[%c0_6, %c0_7] : memref<16x32xf32, #tpu.memory_space<vmem>>, vector<16x32xf32>
    tpu.vector_store %arg9[%c0_6, %c0_7], %8 {strides = array<i32>} : memref<16x32xf32, #tpu.memory_space<vmem>>, vector<16x32xf32>,
    %c0_i32_8 = arith.constant 0 : i32
    %10 = arith.cmpi eq, %arg1, %c0_i32_8 : i32
    %11 = arith.extui %10 : i1 to i32
    %c0_i32_9 = arith.constant 0 : i32
    %12 = arith.cmpi ne, %11, %c0_i32_9 : i32
    scf.if %12 {
      %c0_10 = arith.constant 0 : index
      %c0_11 = arith.constant 0 : index
      %13 = vector.load %arg9[%c0_10, %c0_11] : memref<16x32xf32, #tpu.memory_space<vmem>>, vector<16x32xf32>
      %c0_12 = arith.constant 0 : index
      %c0_13 = arith.constant 0 : index
      %14 = vector.load %arg4[%c0_12, %c0_13] : memref<1x32xf32, #tpu.memory_space<vmem>>, vector<1x32xf32>
      %15 = vector.broadcast %14 : vector<1x32xf32> to vector<16x32xf32>
      %16 = arith.addf %13, %15 : vector<16x32xf32>
      %c0_14 = arith.constant 0 : index
      %c0_15 = arith.constant 0 : index
      %17 = vector.load %arg5[%c0_14, %c0_15] : memref<16x32xf32, #tpu.memory_space<vmem>>, vector<16x32xf32>
      %18 = arith.addf %16, %17 : vector<16x32xf32>
      %cst_16 = arith.constant dense<0.000000e+00> : vector<16xf32>
      %19 = vector.multi_reduction <add>, %18, %cst_16 [1] : vector<16x32xf32> to vector<16xf32>
      %20 = vector.shape_cast %19 : vector<16xf32> to vector<16x1xf32>
      %cst_17 = arith.constant 3.200000e+01 : f32
      %21 = vector.broadcast %cst_17 : f32 to vector<16x1xf32>
      %22 = arith.divf %20, %21 : vector<16x1xf32>
      %23 = vector.broadcast %22 : vector<16x1xf32> to vector<16x32xf32>
      %24 = arith.subf %18, %23 : vector<16x32xf32>
      %25 = arith.mulf %24, %24 : vector<16x32xf32>
      %cst_18 = arith.constant dense<0.000000e+00> : vector<16xf32>
      %26 = vector.multi_reduction <add>, %25, %cst_18 [1] : vector<16x32xf32> to vector<16xf32>
      %27 = vector.shape_cast %26 : vector<16xf32> to vector<16x1xf32>
      %cst_19 = arith.constant 3.200000e+01 : f32
      %28 = vector.broadcast %cst_19 : f32 to vector<16x1xf32>
      %29 = arith.divf %27, %28 : vector<16x1xf32>
      %cst_20 = arith.constant 9.99999997E-7 : f32
      %30 = vector.broadcast %cst_20 : f32 to vector<16x1xf32>
      %31 = arith.addf %29, %30 : vector<16x1xf32>
      %32 = math.rsqrt %31 : vector<16x1xf32>
      %33 = vector.broadcast %32 : vector<16x1xf32> to vector<16x32xf32>
      %34 = arith.mulf %24, %33 : vector<16x32xf32>
      %c0_21 = arith.constant 0 : index
      %c0_22 = arith.constant 0 : index
      %35 = vector.load %arg6[%c0_21, %c0_22] : memref<1x32xf32, #tpu.memory_space<vmem>>, vector<1x32xf32>
      %36 = vector.broadcast %35 : vector<1x32xf32> to vector<16x32xf32>
      %37 = arith.mulf %34, %36 : vector<16x32xf32>
      %c0_23 = arith.constant 0 : index
      %c0_24 = arith.constant 0 : index
      %38 = vector.load %arg7[%c0_23, %c0_24] : memref<1x32xf32, #tpu.memory_space<vmem>>, vector<1x32xf32>
      %39 = vector.broadcast %38 : vector<1x32xf32> to vector<16x32xf32>
      %40 = arith.addf %37, %39 : vector<16x32xf32>
      %c0_25 = arith.constant 0 : index
      %c0_26 = arith.constant 0 : index
      %41 = vector.load %arg8[%c0_25, %c0_26] : memref<16x32xf32, #tpu.memory_space<vmem>>, vector<16x32xf32>
      tpu.vector_store %arg8[%c0_25, %c0_26], %40 {strides = array<i32>} : memref<16x32xf32, #tpu.memory_space<vmem>>, vector<16x32xf32>,
    } else {
    }
    return
  }
  func.func @transform_0(%arg0: i32, %arg1: i32) -> (i32, i32) {
    %c0_i32 = arith.constant 0 : i32
    return %arg0, %arg1 : i32, i32
  }
  func.func @transform_1(%arg0: i32, %arg1: i32) -> (i32, i32) {
    %c0_i32 = arith.constant 0 : i32
    %c0_i32_0 = arith.constant 0 : i32
    return %arg1, %c0_i32 : i32, i32
  }
  func.func @transform_2(%arg0: i32, %arg1: i32) -> (i32, i32) {
    %c0_i32 = arith.constant 0 : i32
    %c0_i32_0 = arith.constant 0 : i32
    %c0_i32_1 = arith.constant 0 : i32
    return %c0_i32, %c0_i32_0 : i32, i32
  }
  func.func @transform_3(%arg0: i32, %arg1: i32) -> (i32, i32) {
    %c0_i32 = arith.constant 0 : i32
    %c0_i32_0 = arith.constant 0 : i32
    return %arg0, %c0_i32 : i32, i32
  }
  func.func @transform_4(%arg0: i32, %arg1: i32) -> (i32, i32) {
    %c0_i32 = arith.constant 0 : i32
    %c0_i32_0 = arith.constant 0 : i32
    %c0_i32_1 = arith.constant 0 : i32
    return %c0_i32, %c0_i32_0 : i32, i32
  }
  func.func @transform_5(%arg0: i32, %arg1: i32) -> (i32, i32) {
    %c0_i32 = arith.constant 0 : i32
    %c0_i32_0 = arith.constant 0 : i32
    %c0_i32_1 = arith.constant 0 : i32
    return %c0_i32, %c0_i32_0 : i32, i32
  }
  func.func @transform_6(%arg0: i32, %arg1: i32) -> (i32, i32) {
    %c0_i32 = arith.constant 0 : i32
    %c0_i32_0 = arith.constant 0 : i32
    return %arg0, %c0_i32 : i32, i32
  }
}

module attributes {stable_mosaic.version = 11 : i64} {
  func.func @_fused_linear_kernel(%arg0: i32, %arg1: i32, %arg2: i32, %arg3: memref<16x32xf32, #tpu.memory_space<vmem>>, %arg4: memref<1x32x32xbf16, #tpu.memory_space<vmem>>, %arg5: memref<1x32xf32, #tpu.memory_space<vmem>>, %arg6: memref<16x32xf32, #tpu.memory_space<vmem>>, %arg7: memref<1x16x32xf32, #tpu.memory_space<vmem>>) attributes {dimension_semantics = [#tpu.dimension_semantics<parallel>, #tpu.dimension_semantics<parallel>, #tpu.dimension_semantics<arbitrary>], iteration_bounds = array<i64: 1, 1, 1>, scalar_prefetch = 0 : i64, scratch_operands = 1 : i64, tpu.core_type = #tpu.core_type<tc>, window_params = [{transform_indices = @transform_0, window_bounds = array<i64: 16, 32>}, {transform_indices = @transform_1, window_bounds = array<i64: 1, 32, 32>}, {transform_indices = @transform_2, window_bounds = array<i64: 1, 32>}, {transform_indices = @transform_3, window_bounds = array<i64: 16, 32>}]} {
    %c0_i32 = arith.constant 0 : i32
    %0 = arith.cmpi eq, %arg2, %c0_i32 : i32
    %1 = arith.extui %0 : i1 to i32
    %c0_i32_0 = arith.constant 0 : i32
    %2 = arith.cmpi ne, %1, %c0_i32_0 : i32
    scf.if %2 {
      %cst_13 = arith.constant 0.000000e+00 : f32
      %17 = vector.broadcast %cst_13 : f32 to vector<1x16x32xf32>
      %c0_14 = arith.constant 0 : index
      %c0_15 = arith.constant 0 : index
      %c0_16 = arith.constant 0 : index
      %18 = vector.load %arg7[%c0_14, %c0_15, %c0_16] : memref<1x16x32xf32, #tpu.memory_space<vmem>>, vector<1x16x32xf32>
      tpu.vector_store %arg7[%c0_14, %c0_15, %c0_16], %17 {strides = array<i32>} : memref<1x16x32xf32, #tpu.memory_space<vmem>>, vector<1x16x32xf32>,
    } else {
    }
    %c0 = arith.constant 0 : index
    %c0_1 = arith.constant 0 : index
    %3 = vector.load %arg3[%c0, %c0_1] : memref<16x32xf32, #tpu.memory_space<vmem>>, vector<16x32xf32>
    %4 = arith.truncf %3 : vector<16x32xf32> to vector<16x32xbf16>
    %c0_2 = arith.constant 0 : index
    %c0_3 = arith.constant 0 : index
    %c0_4 = arith.constant 0 : index
    %5 = vector.load %arg7[%c0_2, %c0_3, %c0_4] : memref<1x16x32xf32, #tpu.memory_space<vmem>>, vector<1x16x32xf32>
    %6 = vector.shape_cast %5 : vector<1x16x32xf32> to vector<16x32xf32>
    %c0_5 = arith.constant 0 : index
    %c0_6 = arith.constant 0 : index
    %c0_7 = arith.constant 0 : index
    %7 = vector.load %arg4[%c0_5, %c0_6, %c0_7] : memref<1x32x32xbf16, #tpu.memory_space<vmem>>, vector<1x32x32xbf16>
    %8 = vector.shape_cast %7 : vector<1x32x32xbf16> to vector<32x32xbf16>
    %cst = arith.constant dense<0.000000e+00> : vector<16x32xf32>
    %9 = tpu.matmul %4, %8, %cst {dimension_numbers = #tpu.dot_dimension_numbers<[1], [0], [0], [1], [0, 0, 1, 1], [], []>} : vector<16x32xbf16>, vector<32x32xbf16>, vector<16x32xf32> -> vector<16x32xf32>
    %10 = arith.addf %6, %9 : vector<16x32xf32>
    %c0_8 = arith.constant 0 : index
    %c0_9 = arith.constant 0 : index
    %c0_10 = arith.constant 0 : index
    %11 = vector.load %arg7[%c0_8, %c0_9, %c0_10] : memref<1x16x32xf32, #tpu.memory_space<vmem>>, vector<1x16x32xf32>
    %12 = vector.shape_cast %11 : vector<1x16x32xf32> to vector<16x32xf32>
    %13 = vector.shape_cast %10 : vector<16x32xf32> to vector<1x16x32xf32>
    tpu.vector_store %arg7[%c0_8, %c0_9, %c0_10], %13 {strides = array<i32>} : memref<1x16x32xf32, #tpu.memory_space<vmem>>, vector<1x16x32xf32>,
    %c0_i32_11 = arith.constant 0 : i32
    %14 = arith.cmpi eq, %arg2, %c0_i32_11 : i32
    %15 = arith.extui %14 : i1 to i32
    %c0_i32_12 = arith.constant 0 : i32
    %16 = arith.cmpi ne, %15, %c0_i32_12 : i32
    scf.if %16 {
      %c0_13 = arith.constant 0 : index
      %c0_14 = arith.constant 0 : index
      %17 = vector.load %arg5[%c0_13, %c0_14] : memref<1x32xf32, #tpu.memory_space<vmem>>, vector<1x32xf32>
      %c0_15 = arith.constant 0 : index
      %c0_16 = arith.constant 0 : index
      %c0_17 = arith.constant 0 : index
      %18 = vector.load %arg7[%c0_15, %c0_16, %c0_17] : memref<1x16x32xf32, #tpu.memory_space<vmem>>, vector<1x16x32xf32>
      %19 = vector.shape_cast %18 : vector<1x16x32xf32> to vector<16x32xf32>
      %20 = vector.broadcast %17 : vector<1x32xf32> to vector<16x32xf32>
      %21 = arith.addf %19, %20 : vector<16x32xf32>
      %c0_18 = arith.constant 0 : index
      %c0_19 = arith.constant 0 : index
      %22 = vector.load %arg6[%c0_18, %c0_19] : memref<16x32xf32, #tpu.memory_space<vmem>>, vector<16x32xf32>
      tpu.vector_store %arg6[%c0_18, %c0_19], %21 {strides = array<i32>} : memref<16x32xf32, #tpu.memory_space<vmem>>, vector<16x32xf32>,
    } else {
    }
    return
  }
  func.func @transform_0(%arg0: i32, %arg1: i32, %arg2: i32) -> (i32, i32) {
    %c0_i32 = arith.constant 0 : i32
    return %arg0, %arg2 : i32, i32
  }
  func.func @transform_1(%arg0: i32, %arg1: i32, %arg2: i32) -> (i32, i32, i32) {
    %c0_i32 = arith.constant 0 : i32
    %c0_i32_0 = arith.constant 0 : i32
    return %c0_i32, %arg2, %arg1 : i32, i32, i32
  }
  func.func @transform_2(%arg0: i32, %arg1: i32, %arg2: i32) -> (i32, i32) {
    %c0_i32 = arith.constant 0 : i32
    %c0_i32_0 = arith.constant 0 : i32
    return %c0_i32, %arg1 : i32, i32
  }
  func.func @transform_3(%arg0: i32, %arg1: i32, %arg2: i32) -> (i32, i32) {
    %c0_i32 = arith.constant 0 : i32
    return %arg0, %arg1 : i32, i32
  }
}

module attributes {stable_mosaic.version = 11 : i64} {
  func.func @_mha_attn_kernel(%arg0: i32, %arg1: i32, %arg2: memref<1x8x32xf32, #tpu.memory_space<vmem>>, %arg3: memref<1x8x32xf32, #tpu.memory_space<vmem>>, %arg4: memref<1x8x32xf32, #tpu.memory_space<vmem>>, %arg5: memref<8x8xf32, #tpu.memory_space<vmem>>, %arg6: memref<1x8x32xf32, #tpu.memory_space<vmem>>, %arg7: memref<1x4x8x8xf32, #tpu.memory_space<vmem>>, %arg8: memref<8x32xf32, #tpu.memory_space<vmem>>) attributes {dimension_semantics = [#tpu.dimension_semantics<parallel>, #tpu.dimension_semantics<parallel>], iteration_bounds = array<i64: 2, 1>, scalar_prefetch = 0 : i64, scratch_operands = 1 : i64, tpu.core_type = #tpu.core_type<tc>, window_params = [{transform_indices = @transform_0, window_bounds = array<i64: 1, 8, 32>}, {transform_indices = @transform_1, window_bounds = array<i64: 1, 8, 32>}, {transform_indices = @transform_2, window_bounds = array<i64: 1, 8, 32>}, {transform_indices = @transform_3, window_bounds = array<i64: 8, 8>}, {transform_indices = @transform_4, window_bounds = array<i64: 1, 8, 32>}, {transform_indices = @transform_5, window_bounds = array<i64: 1, 4, 8, 8>}]} {
    %c0 = arith.constant 0 : index
    %c0_0 = arith.constant 0 : index
    %0 = vector.load %arg5[%c0, %c0_0] : memref<8x8xf32, #tpu.memory_space<vmem>>, vector<8x8xf32>
    %cst = arith.constant -1.000000e+09 : f32
    %1 = vector.broadcast %cst : f32 to vector<8x8xf32>
    %2 = arith.mulf %0, %1 : vector<8x8xf32>
    %c0_1 = arith.constant 0 : index
    %c0_2 = arith.constant 0 : index
    %c0_3 = arith.constant 0 : index
    %3 = vector.load %arg2[%c0_1, %c0_2, %c0_3] : memref<1x8x32xf32, #tpu.memory_space<vmem>>, vector<1x8x32xf32>
    %4 = vector.shape_cast %3 : vector<1x8x32xf32> to vector<8x32xf32>
    %cst_4 = arith.constant 0.353553385 : f32
    %5 = vector.broadcast %cst_4 : f32 to vector<8x32xf32>
    %6 = arith.mulf %4, %5 : vector<8x32xf32>
    %c0_5 = arith.constant 0 : index
    %c0_6 = arith.constant 0 : index
    %c0_7 = arith.constant 0 : index
    %7 = vector.load %arg3[%c0_5, %c0_6, %c0_7] : memref<1x8x32xf32, #tpu.memory_space<vmem>>, vector<1x8x32xf32>
    %8 = vector.shape_cast %7 : vector<1x8x32xf32> to vector<8x32xf32>
    %c0_8 = arith.constant 0 : index
    %c0_9 = arith.constant 0 : index
    %c0_10 = arith.constant 0 : index
    %9 = vector.load %arg4[%c0_8, %c0_9, %c0_10] : memref<1x8x32xf32, #tpu.memory_space<vmem>>, vector<1x8x32xf32>
    %10 = vector.shape_cast %9 : vector<1x8x32xf32> to vector<8x32xf32>
    %11 = vector.extract_strided_slice %6 {offsets = [0, 0], sizes = [8, 8], strides = [1, 1]} : vector<8x32xf32> to vector<8x8xf32>
    %12 = vector.extract_strided_slice %8 {offsets = [0, 0], sizes = [8, 8], strides = [1, 1]} : vector<8x32xf32> to vector<8x8xf32>
    %13 = vector.extract_strided_slice %10 {offsets = [0, 0], sizes = [8, 8], strides = [1, 1]} : vector<8x32xf32> to vector<8x8xf32>
    %cst_11 = arith.constant dense<0.000000e+00> : vector<8x8xf32>
    %14 = tpu.matmul %11, %12, %cst_11 {dimension_numbers = #tpu.dot_dimension_numbers<[1], [1], [0], [0], [0, 0, 1, 0], [], []>} : vector<8x8xf32>, vector<8x8xf32>, vector<8x8xf32> -> vector<8x8xf32>
    %15 = arith.addf %14, %2 : vector<8x8xf32>
    %cst_12 = arith.constant dense<0xFF800000> : vector<8xf32>
    %16 = vector.multi_reduction <maximumf>, %15, %cst_12 [1] : vector<8x8xf32> to vector<8xf32>
    %17 = vector.shape_cast %16 : vector<8xf32> to vector<8x1xf32>
    %18 = vector.broadcast %17 : vector<8x1xf32> to vector<8x8xf32>
    %19 = arith.subf %15, %18 : vector<8x8xf32>
    %20 = math.exp %19 : vector<8x8xf32>
    %cst_13 = arith.constant dense<0.000000e+00> : vector<8xf32>
    %21 = vector.multi_reduction <add>, %20, %cst_13 [1] : vector<8x8xf32> to vector<8xf32>
    %22 = vector.shape_cast %21 : vector<8xf32> to vector<8x1xf32>
    %23 = tpu.reciprocal %22 : vector<8x1xf32> -> vector<8x1xf32>
    %24 = vector.broadcast %23 : vector<8x1xf32> to vector<8x8xf32>
    %25 = arith.mulf %20, %24 : vector<8x8xf32>
    %cst_14 = arith.constant dense<0.000000e+00> : vector<8x8xf32>
    %26 = tpu.matmul %25, %13, %cst_14 {dimension_numbers = #tpu.dot_dimension_numbers<[1], [0], [0], [1], [0, 0, 1, 1], [], []>} : vector<8x8xf32>, vector<8x8xf32>, vector<8x8xf32> -> vector<8x8xf32>
    %c0_15 = arith.constant 0 : index
    %c0_16 = arith.constant 0 : index
    %27 = vector.load %arg8[%c0_15, %c0_16] : memref<8x32xf32, #tpu.memory_space<vmem>>, vector<8x8xf32>
    tpu.vector_store %arg8[%c0_15, %c0_16], %26 {strides = array<i32>} : memref<8x32xf32, #tpu.memory_space<vmem>>, vector<8x8xf32>,
    %c0_17 = arith.constant 0 : index
    %c0_18 = arith.constant 0 : index
    %c0_19 = arith.constant 0 : index
    %c0_20 = arith.constant 0 : index
    %28 = vector.load %arg7[%c0_17, %c0_18, %c0_19, %c0_20] : memref<1x4x8x8xf32, #tpu.memory_space<vmem>>, vector<1x1x8x8xf32>
    %29 = vector.shape_cast %28 : vector<1x1x8x8xf32> to vector<8x8xf32>
    %30 = vector.shape_cast %25 : vector<8x8xf32> to vector<1x1x8x8xf32>
    tpu.vector_store %arg7[%c0_17, %c0_18, %c0_19, %c0_20], %30 {strides = array<i32>} : memref<1x4x8x8xf32, #tpu.memory_space<vmem>>, vector<1x1x8x8xf32>,
    %31 = vector.extract_strided_slice %6 {offsets = [0, 8], sizes = [8, 8], strides = [1, 1]} : vector<8x32xf32> to vector<8x8xf32>
    %32 = vector.extract_strided_slice %8 {offsets = [0, 8], sizes = [8, 8], strides = [1, 1]} : vector<8x32xf32> to vector<8x8xf32>
    %33 = vector.extract_strided_slice %10 {offsets = [0, 8], sizes = [8, 8], strides = [1, 1]} : vector<8x32xf32> to vector<8x8xf32>
    %cst_21 = arith.constant dense<0.000000e+00> : vector<8x8xf32>
    %34 = tpu.matmul %31, %32, %cst_21 {dimension_numbers = #tpu.dot_dimension_numbers<[1], [1], [0], [0], [0, 0, 1, 0], [], []>} : vector<8x8xf32>, vector<8x8xf32>, vector<8x8xf32> -> vector<8x8xf32>
    %35 = arith.addf %34, %2 : vector<8x8xf32>
    %cst_22 = arith.constant dense<0xFF800000> : vector<8xf32>
    %36 = vector.multi_reduction <maximumf>, %35, %cst_22 [1] : vector<8x8xf32> to vector<8xf32>
    %37 = vector.shape_cast %36 : vector<8xf32> to vector<8x1xf32>
    %38 = vector.broadcast %37 : vector<8x1xf32> to vector<8x8xf32>
    %39 = arith.subf %35, %38 : vector<8x8xf32>
    %40 = math.exp %39 : vector<8x8xf32>
    %cst_23 = arith.constant dense<0.000000e+00> : vector<8xf32>
    %41 = vector.multi_reduction <add>, %40, %cst_23 [1] : vector<8x8xf32> to vector<8xf32>
    %42 = vector.shape_cast %41 : vector<8xf32> to vector<8x1xf32>
    %43 = tpu.reciprocal %42 : vector<8x1xf32> -> vector<8x1xf32>
    %44 = vector.broadcast %43 : vector<8x1xf32> to vector<8x8xf32>
    %45 = arith.mulf %40, %44 : vector<8x8xf32>
    %cst_24 = arith.constant dense<0.000000e+00> : vector<8x8xf32>
    %46 = tpu.matmul %45, %33, %cst_24 {dimension_numbers = #tpu.dot_dimension_numbers<[1], [0], [0], [1], [0, 0, 1, 1], [], []>} : vector<8x8xf32>, vector<8x8xf32>, vector<8x8xf32> -> vector<8x8xf32>
    %c0_25 = arith.constant 0 : index
    %c8 = arith.constant 8 : index
    %47 = vector.load %arg8[%c0_25, %c8] : memref<8x32xf32, #tpu.memory_space<vmem>>, vector<8x8xf32>
    tpu.vector_store %arg8[%c0_25, %c8], %46 {strides = array<i32>} : memref<8x32xf32, #tpu.memory_space<vmem>>, vector<8x8xf32>,
    %c0_26 = arith.constant 0 : index
    %c1 = arith.constant 1 : index
    %c0_27 = arith.constant 0 : index
    %c0_28 = arith.constant 0 : index
    %48 = vector.load %arg7[%c0_26, %c1, %c0_27, %c0_28] : memref<1x4x8x8xf32, #tpu.memory_space<vmem>>, vector<1x1x8x8xf32>
    %49 = vector.shape_cast %48 : vector<1x1x8x8xf32> to vector<8x8xf32>
    %50 = vector.shape_cast %45 : vector<8x8xf32> to vector<1x1x8x8xf32>
    tpu.vector_store %arg7[%c0_26, %c1, %c0_27, %c0_28], %50 {strides = array<i32>} : memref<1x4x8x8xf32, #tpu.memory_space<vmem>>, vector<1x1x8x8xf32>,
    %51 = vector.extract_strided_slice %6 {offsets = [0, 16], sizes = [8, 8], strides = [1, 1]} : vector<8x32xf32> to vector<8x8xf32>
    %52 = vector.extract_strided_slice %8 {offsets = [0, 16], sizes = [8, 8], strides = [1, 1]} : vector<8x32xf32> to vector<8x8xf32>
    %53 = vector.extract_strided_slice %10 {offsets = [0, 16], sizes = [8, 8], strides = [1, 1]} : vector<8x32xf32> to vector<8x8xf32>
    %cst_29 = arith.constant dense<0.000000e+00> : vector<8x8xf32>
    %54 = tpu.matmul %51, %52, %cst_29 {dimension_numbers = #tpu.dot_dimension_numbers<[1], [1], [0], [0], [0, 0, 1, 0], [], []>} : vector<8x8xf32>, vector<8x8xf32>, vector<8x8xf32> -> vector<8x8xf32>
    %55 = arith.addf %54, %2 : vector<8x8xf32>
    %cst_30 = arith.constant dense<0xFF800000> : vector<8xf32>
    %56 = vector.multi_reduction <maximumf>, %55, %cst_30 [1] : vector<8x8xf32> to vector<8xf32>
    %57 = vector.shape_cast %56 : vector<8xf32> to vector<8x1xf32>
    %58 = vector.broadcast %57 : vector<8x1xf32> to vector<8x8xf32>
    %59 = arith.subf %55, %58 : vector<8x8xf32>
    %60 = math.exp %59 : vector<8x8xf32>
    %cst_31 = arith.constant dense<0.000000e+00> : vector<8xf32>
    %61 = vector.multi_reduction <add>, %60, %cst_31 [1] : vector<8x8xf32> to vector<8xf32>
    %62 = vector.shape_cast %61 : vector<8xf32> to vector<8x1xf32>
    %63 = tpu.reciprocal %62 : vector<8x1xf32> -> vector<8x1xf32>
    %64 = vector.broadcast %63 : vector<8x1xf32> to vector<8x8xf32>
    %65 = arith.mulf %60, %64 : vector<8x8xf32>
    %cst_32 = arith.constant dense<0.000000e+00> : vector<8x8xf32>
    %66 = tpu.matmul %65, %53, %cst_32 {dimension_numbers = #tpu.dot_dimension_numbers<[1], [0], [0], [1], [0, 0, 1, 1], [], []>} : vector<8x8xf32>, vector<8x8xf32>, vector<8x8xf32> -> vector<8x8xf32>
    %c0_33 = arith.constant 0 : index
    %c16 = arith.constant 16 : index
    %67 = vector.load %arg8[%c0_33, %c16] : memref<8x32xf32, #tpu.memory_space<vmem>>, vector<8x8xf32>
    tpu.vector_store %arg8[%c0_33, %c16], %66 {strides = array<i32>} : memref<8x32xf32, #tpu.memory_space<vmem>>, vector<8x8xf32>,
    %c0_34 = arith.constant 0 : index
    %c2 = arith.constant 2 : index
    %c0_35 = arith.constant 0 : index
    %c0_36 = arith.constant 0 : index
    %68 = vector.load %arg7[%c0_34, %c2, %c0_35, %c0_36] : memref<1x4x8x8xf32, #tpu.memory_space<vmem>>, vector<1x1x8x8xf32>
    %69 = vector.shape_cast %68 : vector<1x1x8x8xf32> to vector<8x8xf32>
    %70 = vector.shape_cast %65 : vector<8x8xf32> to vector<1x1x8x8xf32>
    tpu.vector_store %arg7[%c0_34, %c2, %c0_35, %c0_36], %70 {strides = array<i32>} : memref<1x4x8x8xf32, #tpu.memory_space<vmem>>, vector<1x1x8x8xf32>,
    %71 = vector.extract_strided_slice %6 {offsets = [0, 24], sizes = [8, 8], strides = [1, 1]} : vector<8x32xf32> to vector<8x8xf32>
    %72 = vector.extract_strided_slice %8 {offsets = [0, 24], sizes = [8, 8], strides = [1, 1]} : vector<8x32xf32> to vector<8x8xf32>
    %73 = vector.extract_strided_slice %10 {offsets = [0, 24], sizes = [8, 8], strides = [1, 1]} : vector<8x32xf32> to vector<8x8xf32>
    %cst_37 = arith.constant dense<0.000000e+00> : vector<8x8xf32>
    %74 = tpu.matmul %71, %72, %cst_37 {dimension_numbers = #tpu.dot_dimension_numbers<[1], [1], [0], [0], [0, 0, 1, 0], [], []>} : vector<8x8xf32>, vector<8x8xf32>, vector<8x8xf32> -> vector<8x8xf32>
    %75 = arith.addf %74, %2 : vector<8x8xf32>
    %cst_38 = arith.constant dense<0xFF800000> : vector<8xf32>
    %76 = vector.multi_reduction <maximumf>, %75, %cst_38 [1] : vector<8x8xf32> to vector<8xf32>
    %77 = vector.shape_cast %76 : vector<8xf32> to vector<8x1xf32>
    %78 = vector.broadcast %77 : vector<8x1xf32> to vector<8x8xf32>
    %79 = arith.subf %75, %78 : vector<8x8xf32>
    %80 = math.exp %79 : vector<8x8xf32>
    %cst_39 = arith.constant dense<0.000000e+00> : vector<8xf32>
    %81 = vector.multi_reduction <add>, %80, %cst_39 [1] : vector<8x8xf32> to vector<8xf32>
    %82 = vector.shape_cast %81 : vector<8xf32> to vector<8x1xf32>
    %83 = tpu.reciprocal %82 : vector<8x1xf32> -> vector<8x1xf32>
    %84 = vector.broadcast %83 : vector<8x1xf32> to vector<8x8xf32>
    %85 = arith.mulf %80, %84 : vector<8x8xf32>
    %cst_40 = arith.constant dense<0.000000e+00> : vector<8x8xf32>
    %86 = tpu.matmul %85, %73, %cst_40 {dimension_numbers = #tpu.dot_dimension_numbers<[1], [0], [0], [1], [0, 0, 1, 1], [], []>} : vector<8x8xf32>, vector<8x8xf32>, vector<8x8xf32> -> vector<8x8xf32>
    %c0_41 = arith.constant 0 : index
    %c24 = arith.constant 24 : index
    %87 = vector.load %arg8[%c0_41, %c24] : memref<8x32xf32, #tpu.memory_space<vmem>>, vector<8x8xf32>
    tpu.vector_store %arg8[%c0_41, %c24], %86 {strides = array<i32>} : memref<8x32xf32, #tpu.memory_space<vmem>>, vector<8x8xf32>,
    %c0_42 = arith.constant 0 : index
    %c3 = arith.constant 3 : index
    %c0_43 = arith.constant 0 : index
    %c0_44 = arith.constant 0 : index
    %88 = vector.load %arg7[%c0_42, %c3, %c0_43, %c0_44] : memref<1x4x8x8xf32, #tpu.memory_space<vmem>>, vector<1x1x8x8xf32>
    %89 = vector.shape_cast %88 : vector<1x1x8x8xf32> to vector<8x8xf32>
    %90 = vector.shape_cast %85 : vector<8x8xf32> to vector<1x1x8x8xf32>
    tpu.vector_store %arg7[%c0_42, %c3, %c0_43, %c0_44], %90 {strides = array<i32>} : memref<1x4x8x8xf32, #tpu.memory_space<vmem>>, vector<1x1x8x8xf32>,
    %c0_45 = arith.constant 0 : index
    %c0_46 = arith.constant 0 : index
    %91 = vector.load %arg8[%c0_45, %c0_46] : memref<8x32xf32, #tpu.memory_space<vmem>>, vector<8x32xf32>
    %c0_47 = arith.constant 0 : index
    %c0_48 = arith.constant 0 : index
    %c0_49 = arith.constant 0 : index
    %92 = vector.load %arg6[%c0_47, %c0_48, %c0_49] : memref<1x8x32xf32, #tpu.memory_space<vmem>>, vector<1x8x32xf32>
    %93 = vector.shape_cast %92 : vector<1x8x32xf32> to vector<8x32xf32>
    %94 = vector.shape_cast %91 : vector<8x32xf32> to vector<1x8x32xf32>
    tpu.vector_store %arg6[%c0_47, %c0_48, %c0_49], %94 {strides = array<i32>} : memref<1x8x32xf32, #tpu.memory_space<vmem>>, vector<1x8x32xf32>,
    return
  }
  func.func @transform_0(%arg0: i32, %arg1: i32) -> (i32, i32, i32) {
    %c0_i32 = arith.constant 0 : i32
    %c0_i32_0 = arith.constant 0 : i32
    return %arg0, %arg1, %c0_i32 : i32, i32, i32
  }
  func.func @transform_1(%arg0: i32, %arg1: i32) -> (i32, i32, i32) {
    %c0_i32 = arith.constant 0 : i32
    %c0_i32_0 = arith.constant 0 : i32
    %c0_i32_1 = arith.constant 0 : i32
    return %arg0, %c0_i32, %c0_i32_0 : i32, i32, i32
  }
  func.func @transform_2(%arg0: i32, %arg1: i32) -> (i32, i32, i32) {
    %c0_i32 = arith.constant 0 : i32
    %c0_i32_0 = arith.constant 0 : i32
    %c0_i32_1 = arith.constant 0 : i32
    return %arg0, %c0_i32, %c0_i32_0 : i32, i32, i32
  }
  func.func @transform_3(%arg0: i32, %arg1: i32) -> (i32, i32) {
    %c0_i32 = arith.constant 0 : i32
    %c0_i32_0 = arith.constant 0 : i32
    return %arg1, %c0_i32 : i32, i32
  }
  func.func @transform_4(%arg0: i32, %arg1: i32) -> (i32, i32, i32) {
    %c0_i32 = arith.constant 0 : i32
    %c0_i32_0 = arith.constant 0 : i32
    return %arg0, %arg1, %c0_i32 : i32, i32, i32
  }
  func.func @transform_5(%arg0: i32, %arg1: i32) -> (i32, i32, i32, i32) {
    %c0_i32 = arith.constant 0 : i32
    %c0_i32_0 = arith.constant 0 : i32
    %c0_i32_1 = arith.constant 0 : i32
    return %arg0, %c0_i32, %arg1, %c0_i32_0 : i32, i32, i32, i32
  }
}

module attributes {stable_mosaic.version = 11 : i64} {
  func.func @_fused_linear_kernel(%arg0: i32, %arg1: i32, %arg2: i32, %arg3: memref<16x32xf32, #tpu.memory_space<vmem>>, %arg4: memref<2x32x32xbf16, #tpu.memory_space<vmem>>, %arg5: memref<2x32xf32, #tpu.memory_space<vmem>>, %arg6: memref<16x32xf32, #tpu.memory_space<vmem>>, %arg7: memref<16x32xf32, #tpu.memory_space<vmem>>, %arg8: memref<2x16x32xf32, #tpu.memory_space<vmem>>) attributes {dimension_semantics = [#tpu.dimension_semantics<parallel>, #tpu.dimension_semantics<parallel>, #tpu.dimension_semantics<arbitrary>], iteration_bounds = array<i64: 1, 1, 1>, scalar_prefetch = 0 : i64, scratch_operands = 1 : i64, tpu.core_type = #tpu.core_type<tc>, window_params = [{transform_indices = @transform_0, window_bounds = array<i64: 16, 32>}, {transform_indices = @transform_1, window_bounds = array<i64: 2, 32, 32>}, {transform_indices = @transform_2, window_bounds = array<i64: 2, 32>}, {transform_indices = @transform_3, window_bounds = array<i64: 16, 32>}, {transform_indices = @transform_4, window_bounds = array<i64: 16, 32>}]} {
    %c0_i32 = arith.constant 0 : i32
    %0 = arith.cmpi eq, %arg2, %c0_i32 : i32
    %1 = arith.extui %0 : i1 to i32
    %c0_i32_0 = arith.constant 0 : i32
    %2 = arith.cmpi ne, %1, %c0_i32_0 : i32
    scf.if %2 {
      %cst_22 = arith.constant 0.000000e+00 : f32
      %26 = vector.broadcast %cst_22 : f32 to vector<2x16x32xf32>
      %c0_23 = arith.constant 0 : index
      %c0_24 = arith.constant 0 : index
      %c0_25 = arith.constant 0 : index
      %27 = vector.load %arg8[%c0_23, %c0_24, %c0_25] : memref<2x16x32xf32, #tpu.memory_space<vmem>>, vector<2x16x32xf32>
      tpu.vector_store %arg8[%c0_23, %c0_24, %c0_25], %26 {strides = array<i32>} : memref<2x16x32xf32, #tpu.memory_space<vmem>>, vector<2x16x32xf32>,
    } else {
    }
    %c0 = arith.constant 0 : index
    %c0_1 = arith.constant 0 : index
    %3 = vector.load %arg3[%c0, %c0_1] : memref<16x32xf32, #tpu.memory_space<vmem>>, vector<16x32xf32>
    %4 = arith.truncf %3 : vector<16x32xf32> to vector<16x32xbf16>
    %c0_2 = arith.constant 0 : index
    %c0_3 = arith.constant 0 : index
    %c0_4 = arith.constant 0 : index
    %5 = vector.load %arg8[%c0_2, %c0_3, %c0_4] : memref<2x16x32xf32, #tpu.memory_space<vmem>>, vector<1x16x32xf32>
    %6 = vector.shape_cast %5 : vector<1x16x32xf32> to vector<16x32xf32>
    %c0_5 = arith.constant 0 : index
    %c0_6 = arith.constant 0 : index
    %c0_7 = arith.constant 0 : index
    %7 = vector.load %arg4[%c0_5, %c0_6, %c0_7] : memref<2x32x32xbf16, #tpu.memory_space<vmem>>, vector<1x32x32xbf16>
    %8 = vector.shape_cast %7 : vector<1x32x32xbf16> to vector<32x32xbf16>
    %cst = arith.constant dense<0.000000e+00> : vector<16x32xf32>
    %9 = tpu.matmul %4, %8, %cst {dimension_numbers = #tpu.dot_dimension_numbers<[1], [0], [0], [1], [0, 0, 1, 1], [], []>} : vector<16x32xbf16>, vector<32x32xbf16>, vector<16x32xf32> -> vector<16x32xf32>
    %10 = arith.addf %6, %9 : vector<16x32xf32>
    %c0_8 = arith.constant 0 : index
    %c0_9 = arith.constant 0 : index
    %c0_10 = arith.constant 0 : index
    %11 = vector.load %arg8[%c0_8, %c0_9, %c0_10] : memref<2x16x32xf32, #tpu.memory_space<vmem>>, vector<1x16x32xf32>
    %12 = vector.shape_cast %11 : vector<1x16x32xf32> to vector<16x32xf32>
    %13 = vector.shape_cast %10 : vector<16x32xf32> to vector<1x16x32xf32>
    tpu.vector_store %arg8[%c0_8, %c0_9, %c0_10], %13 {strides = array<i32>} : memref<2x16x32xf32, #tpu.memory_space<vmem>>, vector<1x16x32xf32>,
    %c1 = arith.constant 1 : index
    %c0_11 = arith.constant 0 : index
    %c0_12 = arith.constant 0 : index
    %14 = vector.load %arg8[%c1, %c0_11, %c0_12] : memref<2x16x32xf32, #tpu.memory_space<vmem>>, vector<1x16x32xf32>
    %15 = vector.shape_cast %14 : vector<1x16x32xf32> to vector<16x32xf32>
    %c1_13 = arith.constant 1 : index
    %c0_14 = arith.constant 0 : index
    %c0_15 = arith.constant 0 : index
    %16 = vector.load %arg4[%c1_13, %c0_14, %c0_15] : memref<2x32x32xbf16, #tpu.memory_space<vmem>>, vector<1x32x32xbf16>
    %17 = vector.shape_cast %16 : vector<1x32x32xbf16> to vector<32x32xbf16>
    %cst_16 = arith.constant dense<0.000000e+00> : vector<16x32xf32>
    %18 = tpu.matmul %4, %17, %cst_16 {dimension_numbers = #tpu.dot_dimension_numbers<[1], [0], [0], [1], [0, 0, 1, 1], [], []>} : vector<16x32xbf16>, vector<32x32xbf16>, vector<16x32xf32> -> vector<16x32xf32>
    %19 = arith.addf %15, %18 : vector<16x32xf32>
    %c1_17 = arith.constant 1 : index
    %c0_18 = arith.constant 0 : index
    %c0_19 = arith.constant 0 : index
    %20 = vector.load %arg8[%c1_17, %c0_18, %c0_19] : memref<2x16x32xf32, #tpu.memory_space<vmem>>, vector<1x16x32xf32>
    %21 = vector.shape_cast %20 : vector<1x16x32xf32> to vector<16x32xf32>
    %22 = vector.shape_cast %19 : vector<16x32xf32> to vector<1x16x32xf32>
    tpu.vector_store %arg8[%c1_17, %c0_18, %c0_19], %22 {strides = array<i32>} : memref<2x16x32xf32, #tpu.memory_space<vmem>>, vector<1x16x32xf32>,
    %c0_i32_20 = arith.constant 0 : i32
    %23 = arith.cmpi eq, %arg2, %c0_i32_20 : i32
    %24 = arith.extui %23 : i1 to i32
    %c0_i32_21 = arith.constant 0 : i32
    %25 = arith.cmpi ne, %24, %c0_i32_21 : i32
    scf.if %25 {
      %c0_22 = arith.constant 0 : index
      %c0_23 = arith.constant 0 : index
      %26 = vector.load %arg5[%c0_22, %c0_23] : memref<2x32xf32, #tpu.memory_space<vmem>>, vector<2x32xf32>
      %c0_24 = arith.constant 0 : index
      %c0_25 = arith.constant 0 : index
      %c0_26 = arith.constant 0 : index
      %27 = vector.load %arg8[%c0_24, %c0_25, %c0_26] : memref<2x16x32xf32, #tpu.memory_space<vmem>>, vector<1x16x32xf32>
      %28 = vector.shape_cast %27 : vector<1x16x32xf32> to vector<16x32xf32>
      %29 = vector.extract_strided_slice %26 {offsets = [0, 0], sizes = [1, 32], strides = [1, 1]} : vector<2x32xf32> to vector<1x32xf32>
      %30 = vector.broadcast %29 : vector<1x32xf32> to vector<16x32xf32>
      %31 = arith.addf %28, %30 : vector<16x32xf32>
      %c0_27 = arith.constant 0 : index
      %c0_28 = arith.constant 0 : index
      %32 = vector.load %arg6[%c0_27, %c0_28] : memref<16x32xf32, #tpu.memory_space<vmem>>, vector<16x32xf32>
      tpu.vector_store %arg6[%c0_27, %c0_28], %31 {strides = array<i32>} : memref<16x32xf32, #tpu.memory_space<vmem>>, vector<16x32xf32>,
      %c1_29 = arith.constant 1 : index
      %c0_30 = arith.constant 0 : index
      %c0_31 = arith.constant 0 : index
      %33 = vector.load %arg8[%c1_29, %c0_30, %c0_31] : memref<2x16x32xf32, #tpu.memory_space<vmem>>, vector<1x16x32xf32>
      %34 = vector.shape_cast %33 : vector<1x16x32xf32> to vector<16x32xf32>
      %35 = vector.extract_strided_slice %26 {offsets = [1, 0], sizes = [1, 32], strides = [1, 1]} : vector<2x32xf32> to vector<1x32xf32>
      %36 = vector.broadcast %35 : vector<1x32xf32> to vector<16x32xf32>
      %37 = arith.addf %34, %36 : vector<16x32xf32>
      %c0_32 = arith.constant 0 : index
      %c0_33 = arith.constant 0 : index
      %38 = vector.load %arg7[%c0_32, %c0_33] : memref<16x32xf32, #tpu.memory_space<vmem>>, vector<16x32xf32>
      tpu.vector_store %arg7[%c0_32, %c0_33], %37 {strides = array<i32>} : memref<16x32xf32, #tpu.memory_space<vmem>>, vector<16x32xf32>,
    } else {
    }
    return
  }
  func.func @transform_0(%arg0: i32, %arg1: i32, %arg2: i32) -> (i32, i32) {
    %c0_i32 = arith.constant 0 : i32
    return %arg0, %arg2 : i32, i32
  }
  func.func @transform_1(%arg0: i32, %arg1: i32, %arg2: i32) -> (i32, i32, i32) {
    %c0_i32 = arith.constant 0 : i32
    %c0_i32_0 = arith.constant 0 : i32
    return %c0_i32, %arg2, %arg1 : i32, i32, i32
  }
  func.func @transform_2(%arg0: i32, %arg1: i32, %arg2: i32) -> (i32, i32) {
    %c0_i32 = arith.constant 0 : i32
    %c0_i32_0 = arith.constant 0 : i32
    return %c0_i32, %arg1 : i32, i32
  }
  func.func @transform_3(%arg0: i32, %arg1: i32, %arg2: i32) -> (i32, i32) {
    %c0_i32 = arith.constant 0 : i32
    return %arg0, %arg1 : i32, i32
  }
  func.func @transform_4(%arg0: i32, %arg1: i32, %arg2: i32) -> (i32, i32) {
    %c0_i32 = arith.constant 0 : i32
    return %arg0, %arg1 : i32, i32
  }
}

module attributes {stable_mosaic.version = 11 : i64} {
  func.func @_fused_linear_kernel(%arg0: i32, %arg1: i32, %arg2: i32, %arg3: memref<16x32xf32, #tpu.memory_space<vmem>>, %arg4: memref<1x32x64xbf16, #tpu.memory_space<vmem>>, %arg5: memref<1x64xf32, #tpu.memory_space<vmem>>, %arg6: memref<16x64xf32, #tpu.memory_space<vmem>>, %arg7: memref<1x16x64xf32, #tpu.memory_space<vmem>>) attributes {dimension_semantics = [#tpu.dimension_semantics<parallel>, #tpu.dimension_semantics<parallel>, #tpu.dimension_semantics<arbitrary>], iteration_bounds = array<i64: 1, 1, 1>, scalar_prefetch = 0 : i64, scratch_operands = 1 : i64, tpu.core_type = #tpu.core_type<tc>, window_params = [{transform_indices = @transform_0, window_bounds = array<i64: 16, 32>}, {transform_indices = @transform_1, window_bounds = array<i64: 1, 32, 64>}, {transform_indices = @transform_2, window_bounds = array<i64: 1, 64>}, {transform_indices = @transform_3, window_bounds = array<i64: 16, 64>}]} {
    %c0_i32 = arith.constant 0 : i32
    %0 = arith.cmpi eq, %arg2, %c0_i32 : i32
    %1 = arith.extui %0 : i1 to i32
    %c0_i32_0 = arith.constant 0 : i32
    %2 = arith.cmpi ne, %1, %c0_i32_0 : i32
    scf.if %2 {
      %cst_13 = arith.constant 0.000000e+00 : f32
      %17 = vector.broadcast %cst_13 : f32 to vector<1x16x64xf32>
      %c0_14 = arith.constant 0 : index
      %c0_15 = arith.constant 0 : index
      %c0_16 = arith.constant 0 : index
      %18 = vector.load %arg7[%c0_14, %c0_15, %c0_16] : memref<1x16x64xf32, #tpu.memory_space<vmem>>, vector<1x16x64xf32>
      tpu.vector_store %arg7[%c0_14, %c0_15, %c0_16], %17 {strides = array<i32>} : memref<1x16x64xf32, #tpu.memory_space<vmem>>, vector<1x16x64xf32>,
    } else {
    }
    %c0 = arith.constant 0 : index
    %c0_1 = arith.constant 0 : index
    %3 = vector.load %arg3[%c0, %c0_1] : memref<16x32xf32, #tpu.memory_space<vmem>>, vector<16x32xf32>
    %4 = arith.truncf %3 : vector<16x32xf32> to vector<16x32xbf16>
    %c0_2 = arith.constant 0 : index
    %c0_3 = arith.constant 0 : index
    %c0_4 = arith.constant 0 : index
    %5 = vector.load %arg7[%c0_2, %c0_3, %c0_4] : memref<1x16x64xf32, #tpu.memory_space<vmem>>, vector<1x16x64xf32>
    %6 = vector.shape_cast %5 : vector<1x16x64xf32> to vector<16x64xf32>
    %c0_5 = arith.constant 0 : index
    %c0_6 = arith.constant 0 : index
    %c0_7 = arith.constant 0 : index
    %7 = vector.load %arg4[%c0_5, %c0_6, %c0_7] : memref<1x32x64xbf16, #tpu.memory_space<vmem>>, vector<1x32x64xbf16>
    %8 = vector.shape_cast %7 : vector<1x32x64xbf16> to vector<32x64xbf16>
    %cst = arith.constant dense<0.000000e+00> : vector<16x64xf32>
    %9 = tpu.matmul %4, %8, %cst {dimension_numbers = #tpu.dot_dimension_numbers<[1], [0], [0], [1], [0, 0, 1, 1], [], []>} : vector<16x32xbf16>, vector<32x64xbf16>, vector<16x64xf32> -> vector<16x64xf32>
    %10 = arith.addf %6, %9 : vector<16x64xf32>
    %c0_8 = arith.constant 0 : index
    %c0_9 = arith.constant 0 : index
    %c0_10 = arith.constant 0 : index
    %11 = vector.load %arg7[%c0_8, %c0_9, %c0_10] : memref<1x16x64xf32, #tpu.memory_space<vmem>>, vector<1x16x64xf32>
    %12 = vector.shape_cast %11 : vector<1x16x64xf32> to vector<16x64xf32>
    %13 = vector.shape_cast %10 : vector<16x64xf32> to vector<1x16x64xf32>
    tpu.vector_store %arg7[%c0_8, %c0_9, %c0_10], %13 {strides = array<i32>} : memref<1x16x64xf32, #tpu.memory_space<vmem>>, vector<1x16x64xf32>,
    %c0_i32_11 = arith.constant 0 : i32
    %14 = arith.cmpi eq, %arg2, %c0_i32_11 : i32
    %15 = arith.extui %14 : i1 to i32
    %c0_i32_12 = arith.constant 0 : i32
    %16 = arith.cmpi ne, %15, %c0_i32_12 : i32
    scf.if %16 {
      %c0_13 = arith.constant 0 : index
      %c0_14 = arith.constant 0 : index
      %17 = vector.load %arg5[%c0_13, %c0_14] : memref<1x64xf32, #tpu.memory_space<vmem>>, vector<1x64xf32>
      %c0_15 = arith.constant 0 : index
      %c0_16 = arith.constant 0 : index
      %c0_17 = arith.constant 0 : index
      %18 = vector.load %arg7[%c0_15, %c0_16, %c0_17] : memref<1x16x64xf32, #tpu.memory_space<vmem>>, vector<1x16x64xf32>
      %19 = vector.shape_cast %18 : vector<1x16x64xf32> to vector<16x64xf32>
      %20 = vector.broadcast %17 : vector<1x64xf32> to vector<16x64xf32>
      %21 = arith.addf %19, %20 : vector<16x64xf32>
      %cst_18 = arith.constant 0.000000e+00 : f32
      %22 = vector.broadcast %cst_18 : f32 to vector<16x64xf32>
      %23 = arith.maximumf %21, %22 : vector<16x64xf32>
      %c0_19 = arith.constant 0 : index
      %c0_20 = arith.constant 0 : index
      %24 = vector.load %arg6[%c0_19, %c0_20] : memref<16x64xf32, #tpu.memory_space<vmem>>, vector<16x64xf32>
      tpu.vector_store %arg6[%c0_19, %c0_20], %23 {strides = array<i32>} : memref<16x64xf32, #tpu.memory_space<vmem>>, vector<16x64xf32>,
    } else {
    }
    return
  }
  func.func @transform_0(%arg0: i32, %arg1: i32, %arg2: i32) -> (i32, i32) {
    %c0_i32 = arith.constant 0 : i32
    return %arg0, %arg2 : i32, i32
  }
  func.func @transform_1(%arg0: i32, %arg1: i32, %arg2: i32) -> (i32, i32, i32) {
    %c0_i32 = arith.constant 0 : i32
    %c0_i32_0 = arith.constant 0 : i32
    return %c0_i32, %arg2, %arg1 : i32, i32, i32
  }
  func.func @transform_2(%arg0: i32, %arg1: i32, %arg2: i32) -> (i32, i32) {
    %c0_i32 = arith.constant 0 : i32
    %c0_i32_0 = arith.constant 0 : i32
    return %c0_i32, %arg1 : i32, i32
  }
  func.func @transform_3(%arg0: i32, %arg1: i32, %arg2: i32) -> (i32, i32) {
    %c0_i32 = arith.constant 0 : i32
    return %arg0, %arg1 : i32, i32
  }
}

module attributes {stable_mosaic.version = 11 : i64} {
  func.func @_mha_attn_kernel(%arg0: i32, %arg1: i32, %arg2: memref<1x8x32xf32, #tpu.memory_space<vmem>>, %arg3: memref<1x8x32xf32, #tpu.memory_space<vmem>>, %arg4: memref<1x8x32xf32, #tpu.memory_space<vmem>>, %arg5: memref<1x1x8xf32, #tpu.memory_space<vmem>>, %arg6: memref<1x8x32xf32, #tpu.memory_space<vmem>>, %arg7: memref<1x4x8x8xf32, #tpu.memory_space<vmem>>, %arg8: memref<8x32xf32, #tpu.memory_space<vmem>>) attributes {dimension_semantics = [#tpu.dimension_semantics<parallel>, #tpu.dimension_semantics<parallel>], iteration_bounds = array<i64: 2, 1>, scalar_prefetch = 0 : i64, scratch_operands = 1 : i64, tpu.core_type = #tpu.core_type<tc>, window_params = [{transform_indices = @transform_0, window_bounds = array<i64: 1, 8, 32>}, {transform_indices = @transform_1, window_bounds = array<i64: 1, 8, 32>}, {transform_indices = @transform_2, window_bounds = array<i64: 1, 8, 32>}, {transform_indices = @transform_3, window_bounds = array<i64: 1, 1, 8>}, {transform_indices = @transform_4, window_bounds = array<i64: 1, 8, 32>}, {transform_indices = @transform_5, window_bounds = array<i64: 1, 4, 8, 8>}]} {
    %c0 = arith.constant 0 : index
    %c0_0 = arith.constant 0 : index
    %c0_1 = arith.constant 0 : index
    %0 = vector.load %arg5[%c0, %c0_0, %c0_1] : memref<1x1x8xf32, #tpu.memory_space<vmem>>, vector<1x1x8xf32>
    %1 = vector.shape_cast %0 : vector<1x1x8xf32> to vector<1x8xf32>
    %cst = arith.constant -1.000000e+09 : f32
    %2 = vector.broadcast %cst : f32 to vector<1x8xf32>
    %3 = arith.mulf %1, %2 : vector<1x8xf32>
    %c0_2 = arith.constant 0 : index
    %c0_3 = arith.constant 0 : index
    %c0_4 = arith.constant 0 : index
    %4 = vector.load %arg2[%c0_2, %c0_3, %c0_4] : memref<1x8x32xf32, #tpu.memory_space<vmem>>, vector<1x8x32xf32>
    %5 = vector.shape_cast %4 : vector<1x8x32xf32> to vector<8x32xf32>
    %cst_5 = arith.constant 0.353553385 : f32
    %6 = vector.broadcast %cst_5 : f32 to vector<8x32xf32>
    %7 = arith.mulf %5, %6 : vector<8x32xf32>
    %c0_6 = arith.constant 0 : index
    %c0_7 = arith.constant 0 : index
    %c0_8 = arith.constant 0 : index
    %8 = vector.load %arg3[%c0_6, %c0_7, %c0_8] : memref<1x8x32xf32, #tpu.memory_space<vmem>>, vector<1x8x32xf32>
    %9 = vector.shape_cast %8 : vector<1x8x32xf32> to vector<8x32xf32>
    %c0_9 = arith.constant 0 : index
    %c0_10 = arith.constant 0 : index
    %c0_11 = arith.constant 0 : index
    %10 = vector.load %arg4[%c0_9, %c0_10, %c0_11] : memref<1x8x32xf32, #tpu.memory_space<vmem>>, vector<1x8x32xf32>
    %11 = vector.shape_cast %10 : vector<1x8x32xf32> to vector<8x32xf32>
    %12 = vector.extract_strided_slice %7 {offsets = [0, 0], sizes = [8, 8], strides = [1, 1]} : vector<8x32xf32> to vector<8x8xf32>
    %13 = vector.extract_strided_slice %9 {offsets = [0, 0], sizes = [8, 8], strides = [1, 1]} : vector<8x32xf32> to vector<8x8xf32>
    %14 = vector.extract_strided_slice %11 {offsets = [0, 0], sizes = [8, 8], strides = [1, 1]} : vector<8x32xf32> to vector<8x8xf32>
    %cst_12 = arith.constant dense<0.000000e+00> : vector<8x8xf32>
    %15 = tpu.matmul %12, %13, %cst_12 {dimension_numbers = #tpu.dot_dimension_numbers<[1], [1], [0], [0], [0, 0, 1, 0], [], []>} : vector<8x8xf32>, vector<8x8xf32>, vector<8x8xf32> -> vector<8x8xf32>
    %16 = vector.broadcast %3 : vector<1x8xf32> to vector<8x8xf32>
    %17 = arith.addf %15, %16 : vector<8x8xf32>
    %cst_13 = arith.constant dense<0xFF800000> : vector<8xf32>
    %18 = vector.multi_reduction <maximumf>, %17, %cst_13 [1] : vector<8x8xf32> to vector<8xf32>
    %19 = vector.shape_cast %18 : vector<8xf32> to vector<8x1xf32>
    %20 = vector.broadcast %19 : vector<8x1xf32> to vector<8x8xf32>
    %21 = arith.subf %17, %20 : vector<8x8xf32>
    %22 = math.exp %21 : vector<8x8xf32>
    %cst_14 = arith.constant dense<0.000000e+00> : vector<8xf32>
    %23 = vector.multi_reduction <add>, %22, %cst_14 [1] : vector<8x8xf32> to vector<8xf32>
    %24 = vector.shape_cast %23 : vector<8xf32> to vector<8x1xf32>
    %25 = tpu.reciprocal %24 : vector<8x1xf32> -> vector<8x1xf32>
    %26 = vector.broadcast %25 : vector<8x1xf32> to vector<8x8xf32>
    %27 = arith.mulf %22, %26 : vector<8x8xf32>
    %cst_15 = arith.constant dense<0.000000e+00> : vector<8x8xf32>
    %28 = tpu.matmul %27, %14, %cst_15 {dimension_numbers = #tpu.dot_dimension_numbers<[1], [0], [0], [1], [0, 0, 1, 1], [], []>} : vector<8x8xf32>, vector<8x8xf32>, vector<8x8xf32> -> vector<8x8xf32>
    %c0_16 = arith.constant 0 : index
    %c0_17 = arith.constant 0 : index
    %29 = vector.load %arg8[%c0_16, %c0_17] : memref<8x32xf32, #tpu.memory_space<vmem>>, vector<8x8xf32>
    tpu.vector_store %arg8[%c0_16, %c0_17], %28 {strides = array<i32>} : memref<8x32xf32, #tpu.memory_space<vmem>>, vector<8x8xf32>,
    %c0_18 = arith.constant 0 : index
    %c0_19 = arith.constant 0 : index
    %c0_20 = arith.constant 0 : index
    %c0_21 = arith.constant 0 : index
    %30 = vector.load %arg7[%c0_18, %c0_19, %c0_20, %c0_21] : memref<1x4x8x8xf32, #tpu.memory_space<vmem>>, vector<1x1x8x8xf32>
    %31 = vector.shape_cast %30 : vector<1x1x8x8xf32> to vector<8x8xf32>
    %32 = vector.shape_cast %27 : vector<8x8xf32> to vector<1x1x8x8xf32>
    tpu.vector_store %arg7[%c0_18, %c0_19, %c0_20, %c0_21], %32 {strides = array<i32>} : memref<1x4x8x8xf32, #tpu.memory_space<vmem>>, vector<1x1x8x8xf32>,
    %33 = vector.extract_strided_slice %7 {offsets = [0, 8], sizes = [8, 8], strides = [1, 1]} : vector<8x32xf32> to vector<8x8xf32>
    %34 = vector.extract_strided_slice %9 {offsets = [0, 8], sizes = [8, 8], strides = [1, 1]} : vector<8x32xf32> to vector<8x8xf32>
    %35 = vector.extract_strided_slice %11 {offsets = [0, 8], sizes = [8, 8], strides = [1, 1]} : vector<8x32xf32> to vector<8x8xf32>
    %cst_22 = arith.constant dense<0.000000e+00> : vector<8x8xf32>
    %36 = tpu.matmul %33, %34, %cst_22 {dimension_numbers = #tpu.dot_dimension_numbers<[1], [1], [0], [0], [0, 0, 1, 0], [], []>} : vector<8x8xf32>, vector<8x8xf32>, vector<8x8xf32> -> vector<8x8xf32>
    %37 = vector.broadcast %3 : vector<1x8xf32> to vector<8x8xf32>
    %38 = arith.addf %36, %37 : vector<8x8xf32>
    %cst_23 = arith.constant dense<0xFF800000> : vector<8xf32>
    %39 = vector.multi_reduction <maximumf>, %38, %cst_23 [1] : vector<8x8xf32> to vector<8xf32>
    %40 = vector.shape_cast %39 : vector<8xf32> to vector<8x1xf32>
    %41 = vector.broadcast %40 : vector<8x1xf32> to vector<8x8xf32>
    %42 = arith.subf %38, %41 : vector<8x8xf32>
    %43 = math.exp %42 : vector<8x8xf32>
    %cst_24 = arith.constant dense<0.000000e+00> : vector<8xf32>
    %44 = vector.multi_reduction <add>, %43, %cst_24 [1] : vector<8x8xf32> to vector<8xf32>
    %45 = vector.shape_cast %44 : vector<8xf32> to vector<8x1xf32>
    %46 = tpu.reciprocal %45 : vector<8x1xf32> -> vector<8x1xf32>
    %47 = vector.broadcast %46 : vector<8x1xf32> to vector<8x8xf32>
    %48 = arith.mulf %43, %47 : vector<8x8xf32>
    %cst_25 = arith.constant dense<0.000000e+00> : vector<8x8xf32>
    %49 = tpu.matmul %48, %35, %cst_25 {dimension_numbers = #tpu.dot_dimension_numbers<[1], [0], [0], [1], [0, 0, 1, 1], [], []>} : vector<8x8xf32>, vector<8x8xf32>, vector<8x8xf32> -> vector<8x8xf32>
    %c0_26 = arith.constant 0 : index
    %c8 = arith.constant 8 : index
    %50 = vector.load %arg8[%c0_26, %c8] : memref<8x32xf32, #tpu.memory_space<vmem>>, vector<8x8xf32>
    tpu.vector_store %arg8[%c0_26, %c8], %49 {strides = array<i32>} : memref<8x32xf32, #tpu.memory_space<vmem>>, vector<8x8xf32>,
    %c0_27 = arith.constant 0 : index
    %c1 = arith.constant 1 : index
    %c0_28 = arith.constant 0 : index
    %c0_29 = arith.constant 0 : index
    %51 = vector.load %arg7[%c0_27, %c1, %c0_28, %c0_29] : memref<1x4x8x8xf32, #tpu.memory_space<vmem>>, vector<1x1x8x8xf32>
    %52 = vector.shape_cast %51 : vector<1x1x8x8xf32> to vector<8x8xf32>
    %53 = vector.shape_cast %48 : vector<8x8xf32> to vector<1x1x8x8xf32>
    tpu.vector_store %arg7[%c0_27, %c1, %c0_28, %c0_29], %53 {strides = array<i32>} : memref<1x4x8x8xf32, #tpu.memory_space<vmem>>, vector<1x1x8x8xf32>,
    %54 = vector.extract_strided_slice %7 {offsets = [0, 16], sizes = [8, 8], strides = [1, 1]} : vector<8x32xf32> to vector<8x8xf32>
    %55 = vector.extract_strided_slice %9 {offsets = [0, 16], sizes = [8, 8], strides = [1, 1]} : vector<8x32xf32> to vector<8x8xf32>
    %56 = vector.extract_strided_slice %11 {offsets = [0, 16], sizes = [8, 8], strides = [1, 1]} : vector<8x32xf32> to vector<8x8xf32>
    %cst_30 = arith.constant dense<0.000000e+00> : vector<8x8xf32>
    %57 = tpu.matmul %54, %55, %cst_30 {dimension_numbers = #tpu.dot_dimension_numbers<[1], [1], [0], [0], [0, 0, 1, 0], [], []>} : vector<8x8xf32>, vector<8x8xf32>, vector<8x8xf32> -> vector<8x8xf32>
    %58 = vector.broadcast %3 : vector<1x8xf32> to vector<8x8xf32>
    %59 = arith.addf %57, %58 : vector<8x8xf32>
    %cst_31 = arith.constant dense<0xFF800000> : vector<8xf32>
    %60 = vector.multi_reduction <maximumf>, %59, %cst_31 [1] : vector<8x8xf32> to vector<8xf32>
    %61 = vector.shape_cast %60 : vector<8xf32> to vector<8x1xf32>
    %62 = vector.broadcast %61 : vector<8x1xf32> to vector<8x8xf32>
    %63 = arith.subf %59, %62 : vector<8x8xf32>
    %64 = math.exp %63 : vector<8x8xf32>
    %cst_32 = arith.constant dense<0.000000e+00> : vector<8xf32>
    %65 = vector.multi_reduction <add>, %64, %cst_32 [1] : vector<8x8xf32> to vector<8xf32>
    %66 = vector.shape_cast %65 : vector<8xf32> to vector<8x1xf32>
    %67 = tpu.reciprocal %66 : vector<8x1xf32> -> vector<8x1xf32>
    %68 = vector.broadcast %67 : vector<8x1xf32> to vector<8x8xf32>
    %69 = arith.mulf %64, %68 : vector<8x8xf32>
    %cst_33 = arith.constant dense<0.000000e+00> : vector<8x8xf32>
    %70 = tpu.matmul %69, %56, %cst_33 {dimension_numbers = #tpu.dot_dimension_numbers<[1], [0], [0], [1], [0, 0, 1, 1], [], []>} : vector<8x8xf32>, vector<8x8xf32>, vector<8x8xf32> -> vector<8x8xf32>
    %c0_34 = arith.constant 0 : index
    %c16 = arith.constant 16 : index
    %71 = vector.load %arg8[%c0_34, %c16] : memref<8x32xf32, #tpu.memory_space<vmem>>, vector<8x8xf32>
    tpu.vector_store %arg8[%c0_34, %c16], %70 {strides = array<i32>} : memref<8x32xf32, #tpu.memory_space<vmem>>, vector<8x8xf32>,
    %c0_35 = arith.constant 0 : index
    %c2 = arith.constant 2 : index
    %c0_36 = arith.constant 0 : index
    %c0_37 = arith.constant 0 : index
    %72 = vector.load %arg7[%c0_35, %c2, %c0_36, %c0_37] : memref<1x4x8x8xf32, #tpu.memory_space<vmem>>, vector<1x1x8x8xf32>
    %73 = vector.shape_cast %72 : vector<1x1x8x8xf32> to vector<8x8xf32>
    %74 = vector.shape_cast %69 : vector<8x8xf32> to vector<1x1x8x8xf32>
    tpu.vector_store %arg7[%c0_35, %c2, %c0_36, %c0_37], %74 {strides = array<i32>} : memref<1x4x8x8xf32, #tpu.memory_space<vmem>>, vector<1x1x8x8xf32>,
    %75 = vector.extract_strided_slice %7 {offsets = [0, 24], sizes = [8, 8], strides = [1, 1]} : vector<8x32xf32> to vector<8x8xf32>
    %76 = vector.extract_strided_slice %9 {offsets = [0, 24], sizes = [8, 8], strides = [1, 1]} : vector<8x32xf32> to vector<8x8xf32>
    %77 = vector.extract_strided_slice %11 {offsets = [0, 24], sizes = [8, 8], strides = [1, 1]} : vector<8x32xf32> to vector<8x8xf32>
    %cst_38 = arith.constant dense<0.000000e+00> : vector<8x8xf32>
    %78 = tpu.matmul %75, %76, %cst_38 {dimension_numbers = #tpu.dot_dimension_numbers<[1], [1], [0], [0], [0, 0, 1, 0], [], []>} : vector<8x8xf32>, vector<8x8xf32>, vector<8x8xf32> -> vector<8x8xf32>
    %79 = vector.broadcast %3 : vector<1x8xf32> to vector<8x8xf32>
    %80 = arith.addf %78, %79 : vector<8x8xf32>
    %cst_39 = arith.constant dense<0xFF800000> : vector<8xf32>
    %81 = vector.multi_reduction <maximumf>, %80, %cst_39 [1] : vector<8x8xf32> to vector<8xf32>
    %82 = vector.shape_cast %81 : vector<8xf32> to vector<8x1xf32>
    %83 = vector.broadcast %82 : vector<8x1xf32> to vector<8x8xf32>
    %84 = arith.subf %80, %83 : vector<8x8xf32>
    %85 = math.exp %84 : vector<8x8xf32>
    %cst_40 = arith.constant dense<0.000000e+00> : vector<8xf32>
    %86 = vector.multi_reduction <add>, %85, %cst_40 [1] : vector<8x8xf32> to vector<8xf32>
    %87 = vector.shape_cast %86 : vector<8xf32> to vector<8x1xf32>
    %88 = tpu.reciprocal %87 : vector<8x1xf32> -> vector<8x1xf32>
    %89 = vector.broadcast %88 : vector<8x1xf32> to vector<8x8xf32>
    %90 = arith.mulf %85, %89 : vector<8x8xf32>
    %cst_41 = arith.constant dense<0.000000e+00> : vector<8x8xf32>
    %91 = tpu.matmul %90, %77, %cst_41 {dimension_numbers = #tpu.dot_dimension_numbers<[1], [0], [0], [1], [0, 0, 1, 1], [], []>} : vector<8x8xf32>, vector<8x8xf32>, vector<8x8xf32> -> vector<8x8xf32>
    %c0_42 = arith.constant 0 : index
    %c24 = arith.constant 24 : index
    %92 = vector.load %arg8[%c0_42, %c24] : memref<8x32xf32, #tpu.memory_space<vmem>>, vector<8x8xf32>
    tpu.vector_store %arg8[%c0_42, %c24], %91 {strides = array<i32>} : memref<8x32xf32, #tpu.memory_space<vmem>>, vector<8x8xf32>,
    %c0_43 = arith.constant 0 : index
    %c3 = arith.constant 3 : index
    %c0_44 = arith.constant 0 : index
    %c0_45 = arith.constant 0 : index
    %93 = vector.load %arg7[%c0_43, %c3, %c0_44, %c0_45] : memref<1x4x8x8xf32, #tpu.memory_space<vmem>>, vector<1x1x8x8xf32>
    %94 = vector.shape_cast %93 : vector<1x1x8x8xf32> to vector<8x8xf32>
    %95 = vector.shape_cast %90 : vector<8x8xf32> to vector<1x1x8x8xf32>
    tpu.vector_store %arg7[%c0_43, %c3, %c0_44, %c0_45], %95 {strides = array<i32>} : memref<1x4x8x8xf32, #tpu.memory_space<vmem>>, vector<1x1x8x8xf32>,
    %c0_46 = arith.constant 0 : index
    %c0_47 = arith.constant 0 : index
    %96 = vector.load %arg8[%c0_46, %c0_47] : memref<8x32xf32, #tpu.memory_space<vmem>>, vector<8x32xf32>
    %c0_48 = arith.constant 0 : index
    %c0_49 = arith.constant 0 : index
    %c0_50 = arith.constant 0 : index
    %97 = vector.load %arg6[%c0_48, %c0_49, %c0_50] : memref<1x8x32xf32, #tpu.memory_space<vmem>>, vector<1x8x32xf32>
    %98 = vector.shape_cast %97 : vector<1x8x32xf32> to vector<8x32xf32>
    %99 = vector.shape_cast %96 : vector<8x32xf32> to vector<1x8x32xf32>
    tpu.vector_store %arg6[%c0_48, %c0_49, %c0_50], %99 {strides = array<i32>} : memref<1x8x32xf32, #tpu.memory_space<vmem>>, vector<1x8x32xf32>,
    return
  }
  func.func @transform_0(%arg0: i32, %arg1: i32) -> (i32, i32, i32) {
    %c0_i32 = arith.constant 0 : i32
    %c0_i32_0 = arith.constant 0 : i32
    return %arg0, %arg1, %c0_i32 : i32, i32, i32
  }
  func.func @transform_1(%arg0: i32, %arg1: i32) -> (i32, i32, i32) {
    %c0_i32 = arith.constant 0 : i32
    %c0_i32_0 = arith.constant 0 : i32
    %c0_i32_1 = arith.constant 0 : i32
    return %arg0, %c0_i32, %c0_i32_0 : i32, i32, i32
  }
  func.func @transform_2(%arg0: i32, %arg1: i32) -> (i32, i32, i32) {
    %c0_i32 = arith.constant 0 : i32
    %c0_i32_0 = arith.constant 0 : i32
    %c0_i32_1 = arith.constant 0 : i32
    return %arg0, %c0_i32, %c0_i32_0 : i32, i32, i32
  }
  func.func @transform_3(%arg0: i32, %arg1: i32) -> (i32, i32, i32) {
    %c0_i32 = arith.constant 0 : i32
    %c0_i32_0 = arith.constant 0 : i32
    %c0_i32_1 = arith.constant 0 : i32
    return %arg0, %c0_i32, %c0_i32_0 : i32, i32, i32
  }
  func.func @transform_4(%arg0: i32, %arg1: i32) -> (i32, i32, i32) {
    %c0_i32 = arith.constant 0 : i32
    %c0_i32_0 = arith.constant 0 : i32
    return %arg0, %arg1, %c0_i32 : i32, i32, i32
  }
  func.func @transform_5(%arg0: i32, %arg1: i32) -> (i32, i32, i32, i32) {
    %c0_i32 = arith.constant 0 : i32
    %c0_i32_0 = arith.constant 0 : i32
    %c0_i32_1 = arith.constant 0 : i32
    return %arg0, %c0_i32, %arg1, %c0_i32_0 : i32, i32, i32, i32
  }
}

module attributes {stable_mosaic.version = 11 : i64} {
  func.func @_linear_res_ln_kernel(%arg0: i32, %arg1: i32, %arg2: memref<16x64xf32, #tpu.memory_space<vmem>>, %arg3: memref<64x32xbf16, #tpu.memory_space<vmem>>, %arg4: memref<1x32xf32, #tpu.memory_space<vmem>>, %arg5: memref<16x32xf32, #tpu.memory_space<vmem>>, %arg6: memref<1x32xf32, #tpu.memory_space<vmem>>, %arg7: memref<1x32xf32, #tpu.memory_space<vmem>>, %arg8: memref<16x32xf32, #tpu.memory_space<vmem>>, %arg9: memref<16x32xf32, #tpu.memory_space<vmem>>) attributes {dimension_semantics = [#tpu.dimension_semantics<parallel>, #tpu.dimension_semantics<arbitrary>], iteration_bounds = array<i64: 1, 1>, scalar_prefetch = 0 : i64, scratch_operands = 1 : i64, tpu.core_type = #tpu.core_type<tc>, window_params = [{transform_indices = @transform_0, window_bounds = array<i64: 16, 64>}, {transform_indices = @transform_1, window_bounds = array<i64: 64, 32>}, {pipeline_mode = #tpu.pipeline_mode<synchronous>, transform_indices = @transform_2, window_bounds = array<i64: 1, 32>}, {transform_indices = @transform_3, window_bounds = array<i64: 16, 32>}, {pipeline_mode = #tpu.pipeline_mode<synchronous>, transform_indices = @transform_4, window_bounds = array<i64: 1, 32>}, {pipeline_mode = #tpu.pipeline_mode<synchronous>, transform_indices = @transform_5, window_bounds = array<i64: 1, 32>}, {transform_indices = @transform_6, window_bounds = array<i64: 16, 32>}]} {
    %c0_i32 = arith.constant 0 : i32
    %0 = arith.cmpi eq, %arg1, %c0_i32 : i32
    %1 = arith.extui %0 : i1 to i32
    %c0_i32_0 = arith.constant 0 : i32
    %2 = arith.cmpi ne, %1, %c0_i32_0 : i32
    scf.if %2 {
      %cst_10 = arith.constant 0.000000e+00 : f32
      %13 = vector.broadcast %cst_10 : f32 to vector<16x32xf32>
      %c0_11 = arith.constant 0 : index
      %c0_12 = arith.constant 0 : index
      %14 = vector.load %arg9[%c0_11, %c0_12] : memref<16x32xf32, #tpu.memory_space<vmem>>, vector<16x32xf32>
      tpu.vector_store %arg9[%c0_11, %c0_12], %13 {strides = array<i32>} : memref<16x32xf32, #tpu.memory_space<vmem>>, vector<16x32xf32>,
    } else {
    }
    %c0 = arith.constant 0 : index
    %c0_1 = arith.constant 0 : index
    %3 = vector.load %arg9[%c0, %c0_1] : memref<16x32xf32, #tpu.memory_space<vmem>>, vector<16x32xf32>
    %c0_2 = arith.constant 0 : index
    %c0_3 = arith.constant 0 : index
    %4 = vector.load %arg2[%c0_2, %c0_3] : memref<16x64xf32, #tpu.memory_space<vmem>>, vector<16x64xf32>
    %5 = arith.truncf %4 : vector<16x64xf32> to vector<16x64xbf16>
    %c0_4 = arith.constant 0 : index
    %c0_5 = arith.constant 0 : index
    %6 = vector.load %arg3[%c0_4, %c0_5] : memref<64x32xbf16, #tpu.memory_space<vmem>>, vector<64x32xbf16>
    %cst = arith.constant dense<0.000000e+00> : vector<16x32xf32>
    %7 = tpu.matmul %5, %6, %cst {dimension_numbers = #tpu.dot_dimension_numbers<[1], [0], [0], [1], [0, 0, 1, 1], [], []>} : vector<16x64xbf16>, vector<64x32xbf16>, vector<16x32xf32> -> vector<16x32xf32>
    %8 = arith.addf %3, %7 : vector<16x32xf32>
    %c0_6 = arith.constant 0 : index
    %c0_7 = arith.constant 0 : index
    %9 = vector.load %arg9[%c0_6, %c0_7] : memref<16x32xf32, #tpu.memory_space<vmem>>, vector<16x32xf32>
    tpu.vector_store %arg9[%c0_6, %c0_7], %8 {strides = array<i32>} : memref<16x32xf32, #tpu.memory_space<vmem>>, vector<16x32xf32>,
    %c0_i32_8 = arith.constant 0 : i32
    %10 = arith.cmpi eq, %arg1, %c0_i32_8 : i32
    %11 = arith.extui %10 : i1 to i32
    %c0_i32_9 = arith.constant 0 : i32
    %12 = arith.cmpi ne, %11, %c0_i32_9 : i32
    scf.if %12 {
      %c0_10 = arith.constant 0 : index
      %c0_11 = arith.constant 0 : index
      %13 = vector.load %arg9[%c0_10, %c0_11] : memref<16x32xf32, #tpu.memory_space<vmem>>, vector<16x32xf32>
      %c0_12 = arith.constant 0 : index
      %c0_13 = arith.constant 0 : index
      %14 = vector.load %arg4[%c0_12, %c0_13] : memref<1x32xf32, #tpu.memory_space<vmem>>, vector<1x32xf32>
      %15 = vector.broadcast %14 : vector<1x32xf32> to vector<16x32xf32>
      %16 = arith.addf %13, %15 : vector<16x32xf32>
      %c0_14 = arith.constant 0 : index
      %c0_15 = arith.constant 0 : index
      %17 = vector.load %arg5[%c0_14, %c0_15] : memref<16x32xf32, #tpu.memory_space<vmem>>, vector<16x32xf32>
      %18 = arith.addf %16, %17 : vector<16x32xf32>
      %cst_16 = arith.constant dense<0.000000e+00> : vector<16xf32>
      %19 = vector.multi_reduction <add>, %18, %cst_16 [1] : vector<16x32xf32> to vector<16xf32>
      %20 = vector.shape_cast %19 : vector<16xf32> to vector<16x1xf32>
      %cst_17 = arith.constant 3.200000e+01 : f32
      %21 = vector.broadcast %cst_17 : f32 to vector<16x1xf32>
      %22 = arith.divf %20, %21 : vector<16x1xf32>
      %23 = vector.broadcast %22 : vector<16x1xf32> to vector<16x32xf32>
      %24 = arith.subf %18, %23 : vector<16x32xf32>
      %25 = arith.mulf %24, %24 : vector<16x32xf32>
      %cst_18 = arith.constant dense<0.000000e+00> : vector<16xf32>
      %26 = vector.multi_reduction <add>, %25, %cst_18 [1] : vector<16x32xf32> to vector<16xf32>
      %27 = vector.shape_cast %26 : vector<16xf32> to vector<16x1xf32>
      %cst_19 = arith.constant 3.200000e+01 : f32
      %28 = vector.broadcast %cst_19 : f32 to vector<16x1xf32>
      %29 = arith.divf %27, %28 : vector<16x1xf32>
      %cst_20 = arith.constant 9.99999997E-7 : f32
      %30 = vector.broadcast %cst_20 : f32 to vector<16x1xf32>
      %31 = arith.addf %29, %30 : vector<16x1xf32>
      %32 = math.rsqrt %31 : vector<16x1xf32>
      %33 = vector.broadcast %32 : vector<16x1xf32> to vector<16x32xf32>
      %34 = arith.mulf %24, %33 : vector<16x32xf32>
      %c0_21 = arith.constant 0 : index
      %c0_22 = arith.constant 0 : index
      %35 = vector.load %arg6[%c0_21, %c0_22] : memref<1x32xf32, #tpu.memory_space<vmem>>, vector<1x32xf32>
      %36 = vector.broadcast %35 : vector<1x32xf32> to vector<16x32xf32>
      %37 = arith.mulf %34, %36 : vector<16x32xf32>
      %c0_23 = arith.constant 0 : index
      %c0_24 = arith.constant 0 : index
      %38 = vector.load %arg7[%c0_23, %c0_24] : memref<1x32xf32, #tpu.memory_space<vmem>>, vector<1x32xf32>
      %39 = vector.broadcast %38 : vector<1x32xf32> to vector<16x32xf32>
      %40 = arith.addf %37, %39 : vector<16x32xf32>
      %c0_25 = arith.constant 0 : index
      %c0_26 = arith.constant 0 : index
      %41 = vector.load %arg8[%c0_25, %c0_26] : memref<16x32xf32, #tpu.memory_space<vmem>>, vector<16x32xf32>
      tpu.vector_store %arg8[%c0_25, %c0_26], %40 {strides = array<i32>} : memref<16x32xf32, #tpu.memory_space<vmem>>, vector<16x32xf32>,
    } else {
    }
    return
  }
  func.func @transform_0(%arg0: i32, %arg1: i32) -> (i32, i32) {
    %c0_i32 = arith.constant 0 : i32
    return %arg0, %arg1 : i32, i32
  }
  func.func @transform_1(%arg0: i32, %arg1: i32) -> (i32, i32) {
    %c0_i32 = arith.constant 0 : i32
    %c0_i32_0 = arith.constant 0 : i32
    return %arg1, %c0_i32 : i32, i32
  }
  func.func @transform_2(%arg0: i32, %arg1: i32) -> (i32, i32) {
    %c0_i32 = arith.constant 0 : i32
    %c0_i32_0 = arith.constant 0 : i32
    %c0_i32_1 = arith.constant 0 : i32
    return %c0_i32, %c0_i32_0 : i32, i32
  }
  func.func @transform_3(%arg0: i32, %arg1: i32) -> (i32, i32) {
    %c0_i32 = arith.constant 0 : i32
    %c0_i32_0 = arith.constant 0 : i32
    return %arg0, %c0_i32 : i32, i32
  }
  func.func @transform_4(%arg0: i32, %arg1: i32) -> (i32, i32) {
    %c0_i32 = arith.constant 0 : i32
    %c0_i32_0 = arith.constant 0 : i32
    %c0_i32_1 = arith.constant 0 : i32
    return %c0_i32, %c0_i32_0 : i32, i32
  }
  func.func @transform_5(%arg0: i32, %arg1: i32) -> (i32, i32) {
    %c0_i32 = arith.constant 0 : i32
    %c0_i32_0 = arith.constant 0 : i32
    %c0_i32_1 = arith.constant 0 : i32
    return %c0_i32, %c0_i32_0 : i32, i32
  }
  func.func @transform_6(%arg0: i32, %arg1: i32) -> (i32, i32) {
    %c0_i32 = arith.constant 0 : i32
    %c0_i32_0 = arith.constant 0 : i32
    return %arg0, %c0_i32 : i32, i32
  }
}

</mosaic_0001>

<bundles_post_ra>
// kernel: decoder_layer.11
= control target key start
LH: loop header
LB: loop body
LE: loop exit
PB: predicated region body
PF: predicated region fallthrough
CT: control target
= control target key end

     0   :  { %vm28_vm0 = vcmask 261120   ;;  %v195_v0 = vmov 0.0   ;;  %vm196_vm1 = vmmov 0   ;;  %s276_s1 = inlined_call_operand.vmem [shape: bf16[32,32], index: 1, kind: input, shape index: {}]   ;;  %s277_s0 = inlined_call_operand.vmem [shape: f32[16,32], index: 0, kind: input, shape index: {}]   ;;  %s278_s2 = inlined_call_operand.vmem [shape: f32[1,32], index: 2, kind: input, shape index: {}]   ;;  %s279_s3 = inlined_call_operand.vmem [shape: f32[16,32], index: 3, kind: input, shape index: {}]   ;;  %s280_s4 = inlined_call_operand.vmem [shape: f32[1,32], index: 4, kind: input, shape index: {}]   ;;  %s281_s5 = inlined_call_operand.vmem [shape: f32[1,32], index: 5, kind: input, shape index: {}]   ;;  %s282_s6 = inlined_call_operand.vmem [shape: f32[16,32], index: 6, kind: output, shape index: {}]  }
   0x1   :  { %179 = vmatprep.subr.bf16.mxu0 %v195_v0  ;;  %v189_v1 = vld [vmem:[%s276_s1] sm:$0xff]   ;;  %183 = vmatprep.mubr.msk.bf16.mxu0 %vm196_vm1, %v195_v0  ;;  %29 = vst.msk [vmem:[#allocation2] sm:$0xff] %vm28_vm0, %v195_v0  ;;  %30 = vst.msk [vmem:[#allocation2 + $0x8] sm:$0xff] %vm28_vm0, %v195_v0  ;;  %v190_v2 = vld [vmem:[%s276_s1 + $0x8] sm:$0xff]  }
   0x2   :  { %180 = vmatpush3.bf16.msra.mxu0 %v189_v1  ;;  %v33_v3 = vld [vmem:[%s277_s0] sm:$0xff]  ;;  %v34_v4 = vld [vmem:[%s277_s0 + $0x8] sm:$0xff] }
   0x3   :  { %181 = vmatprep.subr.bf16.mxu0 %v195_v0  ;;  %v35_v5 = vpack.c.bf16 %v34_v4, %v33_v3  ;;  %v173_v14 = vld [vmem:[%s278_s2] ss:$0 sm:$0xff]  ;;  %v116_v19 = vld [vmem:[%s279_s3 + $0x8] sm:$0xff] }
   0x4   :  { %v115_v16 = vld [vmem:[%s279_s3] sm:$0xff] }
   0x5   :  { %v174_v42 = vld [vmem:[%s280_s4] ss:$0 sm:$0xff] }
   0x6   :  { %182 = vmatpush3.bf16.msra.mxu0 %v190_v2  ;;  %v175_v44 = vld [vmem:[%s281_s5] ss:$0 sm:$0xff] }
   0x8   :  { %v31_v6 = vld [vmem:[#allocation2] sm:$0xff]  ;;  %v32_v8 = vld [vmem:[#allocation2 + $0x8] sm:$0xff] }
   0x9   :  { %184 = vmatmul.mubr.msk.bf16.vlgmr.msra.gmra.mrb[0].mxu0 %vm28_vm0, %v35_v5 }
  0xdc   :  { %v90_v7 = vpop.f32.mrb[0].mxu0 }
  0xdd   :  { %v97_v9 = vadd.f32 %v90_v7, %v31_v6  ;;  %v185_v10 = vpop.f32.mrb[1].mxu0 }
  0xde   :  { %v93_v11 = vpop.f32.mrb[2].mxu0 }
  0xdf   :  { %99 = vst.msk [vmem:[#allocation2] sm:$0xff] %vm28_vm0, %v97_v9  ;;  %v98_v12 = vadd.f32 %v93_v11, %v32_v8  ;;  %v186_v13 = vpop.f32.mrb[3].mxu0 }
  0xe1   :  { %100 = vst.msk [vmem:[#allocation2 + $0x8] sm:$0xff] %vm28_vm0, %v98_v12 }
  0xe6   :  { %v104_v15 = vld [vmem:[#allocation2] sm:$0xff] }
  0xe7   :  { %v113_v17 = vadd.f32 %v173_v14, %v104_v15 }
  0xe8   :  { %v105_v18 = vld [vmem:[#allocation2 + $0x8] sm:$0xff] }
  0xe9   :  { %v117_v20 = vadd.f32 %v115_v16, %v113_v17  ;;  %v114_v21 = vadd.f32 %v173_v14, %v105_v18 }
  0xeb   :  { %v119_v22 = vsel %vm28_vm0, %v117_v20, 0.0  ;;  %v118_v23 = vadd.f32 %v116_v19, %v114_v21 }
  0xec   :  { %120 = vadd.xlane.f32.xlu0 %v119_v22 }
  0xed   :  { %v122_v24 = vsel %vm28_vm0, %v118_v23, 0.0 }
  0xf0   :  { %123 = vadd.xlane.f32.xlu0 %v122_v24 }
 0x179   :  { %v121_v25 = vpop.xlane.xlu0 %120 }
 0x17a   :  { %v126_v26 = vmul.f32 0.03125, %v121_v25 }
 0x17c   :  { %v128_v27 = vsub.f32 %v117_v20, %v126_v26 }
 0x17d   :  { %v124_v28 = vpop.xlane.xlu0 %123 }
 0x17e   :  { %v127_v29 = vmul.f32 0.03125, %v124_v28  ;;  %v130_v30 = vmul.f32 %v128_v27, %v128_v27 }
 0x180   :  { %v129_v31 = vsub.f32 %v118_v23, %v127_v29  ;;  %v132_v32 = vsel %vm28_vm0, %v130_v30, 0.0 }
 0x181   :  { %133 = vadd.xlane.f32.xlu1 %v132_v32 }
 0x182   :  { %v131_v33 = vmul.f32 %v129_v31, %v129_v31 }
 0x184   :  { %v135_v34 = vsel %vm28_vm0, %v131_v33, 0.0 }
 0x185   :  { %136 = vadd.xlane.f32.xlu1 %v135_v34 }
 0x20e   :  { %v134_v35 = vpop.xlane.xlu1 %133 }
 0x20f   :  { %v138_v36 = vmul.f32 0.03125, %v134_v35 }
 0x211   :  { %v140_v37 = vadd.f32 1e-06, %v138_v36 }
 0x212   :  { %v137_v38 = vpop.xlane.xlu1 %136 }
 0x213   :  { %191 = vrsqrt.f32 %v140_v37  ;;  %v139_v39 = vmul.f32 0.03125, %v137_v38 }
 0x215   :  { %v141_v40 = vadd.f32 1e-06, %v139_v39 }
 0x217   :  { %193 = vrsqrt.f32 %v141_v40 }
 0x21d   :  { %v192_v41 = vpop.eup %191 }
 0x21e   :  { %v144_v43 = vmul.f32 %v192_v41, %v128_v27 }
 0x220   :  { %v153_v45 = vmul.f32 %v174_v42, %v144_v43 }
 0x221   :  { %v194_v46 = vpop.eup %193 }
 0x222   :  { %v162_v47 = vadd.f32 %v175_v44, %v153_v45  ;;  %v145_v48 = vmul.f32 %v194_v46, %v129_v31 }
 0x224   :  { %164 = vst.msk [vmem:[%s282_s6] sm:$0xff] %vm28_vm0, %v162_v47  ;;  %v154_v49 = vmul.f32 %v174_v42, %v145_v48 }
 0x226   :  { %v163_v50 = vadd.f32 %v175_v44, %v154_v49 }
 0x228   :  { %165 = vst.msk [vmem:[%s282_s6 + $0x8] sm:$0xff] %vm28_vm0, %v163_v50 }

// kernel: decoder_layer.12
= control target key start
LH: loop header
LB: loop body
LE: loop exit
PB: predicated region body
PF: predicated region fallthrough
CT: control target
= control target key end

     0   :  { %vm19_vm0 = vcmask 261120   ;;  %v131_v0 = vmov 0.0   ;;  %vm132_vm1 = vmmov 0   ;;  %s181_s1 = inlined_call_operand.vmem [shape: bf16[1,32,32], index: 1, kind: input, shape index: {}]   ;;  %s182_s0 = inlined_call_operand.vmem [shape: f32[16,32], index: 0, kind: input, shape index: {}]   ;;  %s183_s2 = inlined_call_operand.vmem [shape: f32[1,32], index: 2, kind: input, shape index: {}]   ;;  %s184_s3 = inlined_call_operand.vmem [shape: f32[16,32], index: 3, kind: output, shape index: {}]  }
   0x1   :  { %119 = vmatprep.subr.bf16.mxu0 %v131_v0  ;;  %v129_v1 = vld [vmem:[%s181_s1] sm:$0xff]   ;;  %123 = vmatprep.mubr.msk.bf16.mxu0 %vm132_vm1, %v131_v0  ;;  %20 = vst.msk [vmem:[#allocation2] sm:$0xff] %vm19_vm0, %v131_v0  ;;  %21 = vst.msk [vmem:[#allocation2 + $0x8] sm:$0xff] %vm19_vm0, %v131_v0  ;;  %v130_v2 = vld [vmem:[%s181_s1 + $0x8] sm:$0xff]  }
   0x2   :  { %120 = vmatpush3.bf16.msra.mxu0 %v129_v1  ;;  %v22_v3 = vld [vmem:[%s182_s0] sm:$0xff]  ;;  %v23_v4 = vld [vmem:[%s182_s0 + $0x8] sm:$0xff] }
   0x3   :  { %121 = vmatprep.subr.bf16.mxu0 %v131_v0  ;;  %v24_v5 = vpack.c.bf16 %v23_v4, %v22_v3  ;;  %v115_v14 = vld [vmem:[%s183_s2] ss:$0 sm:$0xff] }
   0x6   :  { %122 = vmatpush3.bf16.msra.mxu0 %v130_v2 }
   0x8   :  { %v25_v6 = vld [vmem:[#allocation2] sm:$0xff]  ;;  %v26_v8 = vld [vmem:[#allocation2 + $0x8] sm:$0xff] }
   0x9   :  { %124 = vmatmul.mubr.msk.bf16.vlgmr.msra.gmra.mrb[0].mxu0 %vm19_vm0, %v24_v5 }
  0xdc   :  { %v81_v7 = vpop.f32.mrb[0].mxu0 }
  0xdd   :  { %v88_v9 = vadd.f32 %v81_v7, %v25_v6  ;;  %v125_v10 = vpop.f32.mrb[1].mxu0 }
  0xde   :  { %v84_v11 = vpop.f32.mrb[2].mxu0 }
  0xdf   :  { %90 = vst.msk [vmem:[#allocation2] sm:$0xff] %vm19_vm0, %v88_v9  ;;  %v89_v12 = vadd.f32 %v84_v11, %v26_v8  ;;  %v126_v13 = vpop.f32.mrb[3].mxu0 }
  0xe1   :  { %91 = vst.msk [vmem:[#allocation2 + $0x8] sm:$0xff] %vm19_vm0, %v89_v12 }
  0xe6   :  { %v96_v15 = vld [vmem:[#allocation2] sm:$0xff] }
  0xe7   :  { %v104_v16 = vadd.f32 %v115_v14, %v96_v15 }
  0xe8   :  { %v97_v17 = vld [vmem:[#allocation2 + $0x8] sm:$0xff] }
  0xe9   :  { %106 = vst.msk [vmem:[%s184_s3] sm:$0xff] %vm19_vm0, %v104_v16  ;;  %v105_v18 = vadd.f32 %v115_v14, %v97_v17 }
  0xeb   :  { %107 = vst.msk [vmem:[%s184_s3 + $0x8] sm:$0xff] %vm19_vm0, %v105_v18 }

// kernel: decoder_layer.9
= control target key start
LH: loop header
LB: loop body
LE: loop exit
PB: predicated region body
PF: predicated region fallthrough
CT: control target
= control target key end

     0   :  { %vm22_vm0 = vcmask 261120   ;;  %v333_v0 = vmov 0.0   ;;  %vm334_vm1 = vmmov 0   ;;  %v235_v10 = vlaneseq  ;;  %s434_s1 = inlined_call_operand.vmem [shape: bf16[3,32,32], index: 1, kind: input, shape index: {}]   ;;  %s435_s0 = inlined_call_operand.vmem [shape: f32[16,32], index: 0, kind: input, shape index: {}]   ;;  %s436_s2 = inlined_call_operand.vmem [shape: f32[3,32], index: 2, kind: input, shape index: {}]   ;;  %s437_s3 = inlined_call_operand.vmem [shape: f32[16,32], index: 3, kind: output, shape index: {0}]   ;;  %s438_s4 = inlined_call_operand.vmem [shape: f32[16,32], index: 4, kind: output, shape index: {1}]   ;;  %s439_s5 = inlined_call_operand.vmem [shape: f32[16,32], index: 5, kind: output, shape index: {2}]  }
   0x1   :  { %301 = vmatprep.subr.bf16.mxu0 %v333_v0  ;;  %v327_v1 = vld [vmem:[%s434_s1] sm:$0xff]   ;;  %309 = vmatprep.subr.bf16.mxu1 %v333_v0  ;;  %23 = vst.msk [vmem:[#allocation2] sm:$0xff] %vm22_vm0, %v333_v0  ;;  %24 = vst.msk [vmem:[#allocation2 + $0x8] sm:$0xff] %vm22_vm0, %v333_v0  ;;  %v328_v2 = vld [vmem:[%s434_s1 + $0x8] sm:$0xff]  }
   0x2   :  { %25 = vst.msk [vmem:[#allocation2 + $0x10] sm:$0xff] %vm22_vm0, %v333_v0  ;;  %26 = vst.msk [vmem:[#allocation2 + $0x18] sm:$0xff] %vm22_vm0, %v333_v0  ;;  %305 = vmatprep.mubr.msk.bf16.mxu0 %vm334_vm1, %v333_v0  ;;  %313 = vmatprep.mubr.msk.bf16.mxu1 %vm334_vm1, %v333_v0  ;;  %v329_v3 = vld [vmem:[%s434_s1 + $0x10] sm:$0xff]   ;;  %v29_v4 = vld [vmem:[%s435_s0] sm:$0xff]  ;;  %v236_v12 = vshrl.u32 %v235_v10, 7 }
   0x3   :  { %27 = vst.msk [vmem:[#allocation2 + $0x20] sm:$0xff] %vm22_vm0, %v333_v0  ;;  %28 = vst.msk [vmem:[#allocation2 + $0x28] sm:$0xff] %vm22_vm0, %v333_v0  ;;  %302 = vmatpush3.bf16.msra.mxu0 %v327_v1  ;;  %v30_v5 = vld [vmem:[%s435_s0 + $0x8] sm:$0xff]  ;;  %310 = vmatpush3.bf16.msra.mxu1 %v329_v3  ;;  %v331_v7 = vld [vmem:[%s434_s1 + $0x18] sm:$0xff]  }
   0x4   :  { %303 = vmatprep.subr.bf16.mxu0 %v333_v0  ;;  %v31_v6 = vpack.c.bf16 %v30_v5, %v29_v4  ;;  %311 = vmatprep.subr.bf16.mxu1 %v333_v0  ;;  %v330_v8 = vld [vmem:[%s434_s1 + $0x20] sm:$0xff]   ;;  %v332_v9 = vld [vmem:[%s434_s1 + $0x28] sm:$0xff]   ;;  %v237_v21 = vsub.s32 0, %v236_v12  ;;  %v247_v28 = vsub.s32 1, %v236_v12  ;;  %v257_v41 = vsub.s32 2, %v236_v12 }
   0x5   :  { %v232_v26 = vld [vmem:[%s436_s2] sm:$0x7] }
   0x6   :  { %v238_v32 = vrot.slane %v232_v26, %v237_v21  ;;  %v248_v35 = vrot.slane %v232_v26, %v247_v28  ;;  %v258_v50 = vrot.slane %v232_v26, %v257_v41 }
   0x7   :  { %304 = vmatpush3.bf16.msra.mxu0 %v328_v2  ;;  %312 = vmatpush3.bf16.msra.mxu1 %v331_v7 }
   0x8   :  { %317 = vmatprep.subr.bf16.mxu0 %v333_v0  ;;  %v32_v11 = vld [vmem:[#allocation2] sm:$0xff]  ;;  %v33_v14 = vld [vmem:[#allocation2 + $0x8] sm:$0xff] }
   0x9   :  { %v100_v15 = vld [vmem:[#allocation2 + $0x10] sm:$0xff]  ;;  %v101_v20 = vld [vmem:[#allocation2 + $0x18] sm:$0xff] }
   0xa   :  { %306 = vmatmul.mubr.msk.bf16.vlgmr.msra.gmra.mrb[0].mxu0 %vm22_vm0, %v31_v6  ;;  %314 = vmatmul.mubr.msk.bf16.vlgmr.msra.gmra.mrb[0].mxu1 %vm22_vm0, %v31_v6  ;;  %v165_v31 = vld [vmem:[#allocation2 + $0x20] sm:$0xff]  ;;  %v166_v34 = vld [vmem:[#allocation2 + $0x28] sm:$0xff] }
   0xb   :  { %318 = vmatpush3.bf16.msra.mxu0 %v330_v8  ;;  %321 = vmatprep.mubr.msk.bf16.mxu0 %vm334_vm1, %v333_v0 }
   0xc   :  { %319 = vmatprep.subr.bf16.mxu0 %v333_v0 }
   0xf   :  { %320 = vmatpush3.bf16.msra.mxu0 %v332_v9 }
  0x12   :  { %322 = vmatmul.mubr.msk.bf16.vlgmr.msra.gmra.mrb[4].mxu0 %vm22_vm0, %v31_v6 }
  0xdd   :  { %v88_v13 = vpop.f32.mrb[0].mxu0  ;;  %v153_v19 = vpop.f32.mrb[0].mxu1 }
  0xde   :  { %v95_v16 = vadd.f32 %v88_v13, %v32_v11  ;;  %v307_v17 = vpop.f32.mrb[1].mxu0  ;;  %v160_v24 = vadd.f32 %v153_v19, %v100_v15  ;;  %v315_v25 = vpop.f32.mrb[1].mxu1 }
  0xdf   :  { %v91_v18 = vpop.f32.mrb[2].mxu0  ;;  %v156_v27 = vpop.f32.mrb[2].mxu1 }
  0xe0   :  { %97 = vst.msk [vmem:[#allocation2] sm:$0xff] %vm22_vm0, %v95_v16  ;;  %v96_v22 = vadd.f32 %v91_v18, %v33_v14  ;;  %v308_v23 = vpop.f32.mrb[3].mxu0  ;;  %162 = vst.msk [vmem:[#allocation2 + $0x10] sm:$0xff] %vm22_vm0, %v160_v24  ;;  %v161_v29 = vadd.f32 %v156_v27, %v101_v20  ;;  %v316_v30 = vpop.f32.mrb[3].mxu1 }
  0xe2   :  { %98 = vst.msk [vmem:[#allocation2 + $0x8] sm:$0xff] %vm22_vm0, %v96_v22  ;;  %163 = vst.msk [vmem:[#allocation2 + $0x18] sm:$0xff] %vm22_vm0, %v161_v29 }
  0xe5   :  { %v218_v33 = vpop.f32.mrb[4].mxu0 }
  0xe6   :  { %v225_v36 = vadd.f32 %v218_v33, %v165_v31  ;;  %v323_v37 = vpop.f32.mrb[5].mxu0 }
  0xe7   :  { %v233_v38 = vld [vmem:[#allocation2] sm:$0xff]  ;;  %v221_v39 = vpop.f32.mrb[6].mxu0  ;;  %v243_v45 = vld [vmem:[#allocation2 + $0x10] sm:$0xff] }
  0xe8   :  { %v239_v40 = vadd.f32 %v238_v32, %v233_v38  ;;  %227 = vst.msk [vmem:[#allocation2 + $0x20] sm:$0xff] %vm22_vm0, %v225_v36  ;;  %v226_v42 = vadd.f32 %v221_v39, %v166_v34  ;;  %v324_v43 = vpop.f32.mrb[7].mxu0  ;;  %v249_v47 = vadd.f32 %v248_v35, %v243_v45 }
  0xe9   :  { %v234_v44 = vld [vmem:[#allocation2 + $0x8] sm:$0xff]  ;;  %v244_v48 = vld [vmem:[#allocation2 + $0x18] sm:$0xff] }
  0xea   :  { %241 = vst.msk [vmem:[%s437_s3] sm:$0xff] %vm22_vm0, %v239_v40  ;;  %v240_v46 = vadd.f32 %v238_v32, %v234_v44  ;;  %228 = vst.msk [vmem:[#allocation2 + $0x28] sm:$0xff] %vm22_vm0, %v226_v42  ;;  %v250_v49 = vadd.f32 %v248_v35, %v244_v48 }
  0xeb   :  { %251 = vst.msk [vmem:[%s438_s4] sm:$0xff] %vm22_vm0, %v249_v47 }
  0xec   :  { %242 = vst.msk [vmem:[%s437_s3 + $0x8] sm:$0xff] %vm22_vm0, %v240_v46  ;;  %252 = vst.msk [vmem:[%s438_s4 + $0x8] sm:$0xff] %vm22_vm0, %v250_v49 }
  0xef   :  { %v253_v51 = vld [vmem:[#allocation2 + $0x20] sm:$0xff] }
  0xf0   :  { %v259_v52 = vadd.f32 %v258_v50, %v253_v51 }
  0xf1   :  { %v254_v53 = vld [vmem:[#allocation2 + $0x28] sm:$0xff] }
  0xf2   :  { %261 = vst.msk [vmem:[%s439_s5] sm:$0xff] %vm22_vm0, %v259_v52  ;;  %v260_v54 = vadd.f32 %v258_v50, %v254_v53 }
  0xf4   :  { %262 = vst.msk [vmem:[%s439_s5 + $0x8] sm:$0xff] %vm22_vm0, %v260_v54 }

// kernel: decoder_layer.10
= control target key start
LH: loop header
LB: loop body
LE: loop exit
PB: predicated region body
PF: predicated region fallthrough
CT: control target
= control target key end

     0   :  { %11 = vsyncpa [#allocation4], 0  ;;  %s1681_s0 = inlined_call_operand.vmem [shape: f32[2,8,32], index: 0, kind: input, shape index: {}]   ;;  %s1682_s1 = inlined_call_operand.vmem [shape: f32[2,8,32], index: 1, kind: input, shape index: {}]   ;;  %s1683_s2 = inlined_call_operand.vmem [shape: f32[2,8,32], index: 2, kind: input, shape index: {}]   ;;  %s1684_s3 = inlined_call_operand.vmem [shape: f32[8,8], index: 3, kind: input, shape index: {}]   ;;  %s1685_s4 = inlined_call_operand.vmem [shape: f32[2,8,32], index: 4, kind: output, shape index: {0}]   ;;  %s1686_s5 = inlined_call_operand.hbm [shape: f32[2,4,8,8], index: 5, kind: output, shape index: {1}]  }
   0x1   :  { %13 = vsyncpa [#allocation4 + $0x1], 0  ;;  %s1465_s18 = smov 0   ;;  %s1467_s19 = smov 0  }
   0x2   :  { %s1469_s20 = smov 0   ;;  %s1471_s21 = smov 0  }
   0x3   :  { %s1473_s22 = smov 0   ;;  %s1475_s23 = smov 0  }
   0x4 LB: > { %s1177_s24 = sadd.s32 4294967295, %s1423_s23   ;;  %s1178_s25 = sadd.s32 4294967294, %s1423_s23   ;;  %s1423_s23 = sphi %s1475_s23, %s19_s23   ;;  %s1419_s22 = sphi %s1473_s22, %s1693_s22   ;;  %s1415_s21 = sphi %s1471_s21, %s1692_s21   ;;  %s1411_s20 = sphi %s1469_s20, %s1691_s20   ;;  %s1407_s19 = sphi %s1467_s19, %s1690_s19   ;;  %s1403_s18 = sphi %s1465_s18, %s1689_s18  }
   0x5   : > { %s31_s26 = sadd.s32 1, %s1419_s22  ;;  %s174_s27 = sadd.s32 1, %s1411_s20 }
   0x6   : > { %p33_p0 = scmp.ge.s32.totalorder %s31_s26, 2  ;;  %p184_p1 = scmp.ne.s32.totalorder %s1411_s20, %s1407_s19 }
   0x7   : > { %p185_p2 = scmp.eq.s32.totalorder %s1177_s24, 1  ;;  %p190_p3 = scmp.ne.s32.totalorder %s1407_s19, %s1403_s18 }
   0x8   : > { %s1695_s26 = smov (%p33_p0, %s31_s26), 0  ;;  %p191_p5 = scmp.eq.s32.totalorder %s1178_s25, 1 }
   0x9   : > { %p1505_p4 = por %p185_p2, %p184_p1  ;;  %s169_s29 = ssub.s32 %s1419_s22, %s1695_s26 }
   0xa   : > { %p1182_p6 = scmp.ge.s32.totalorder %s1423_s23, 1  ;;  %p172_p7 = scmp.eq.s32.totalorder %s169_s29, 0 }
   0xb   : > { %p1512_p8 = por %p191_p5, %p190_p3  ;;  %p240_p9 = scmp.lt.s32.totalorder %s1423_s23, 3 }
   0xc   : > { %s1518_s6 = scalar_select %p172_p7, %s1411_s20, %s174_s27  }
   0xd   : > { %p241_p10 = pnand %p1182_p6, %p240_p9 }
   0xe   : > { %p289_p11 = scmp.lt.s32.totalorder (!%p241_p10), %s1415_s21, 1  ;;  %v1425_v0 = vmov (!%p241_p10), 0.0   ;;  %vm1426_vm0 = vmmov (!%p241_p10), 0   ;;  %vm321_vm1 = vcmask (!%p241_p10), 64512   ;;  %v315_v4 = vld [vmem:[%s1684_s3] sm:$0xff] (!%p241_p10)  ;;  %s1427_s17 = smov (!%p241_p10), 120  }
   0xf   : > { %244 = sbr.rel (%p241_p10) target bundleno = 1479 (0x5c7), region = 36  ;;  %1225 = vmatprep.subr.mxu0 (!%p241_p10), %v1425_v0  ;;  %1227 = vmatprep.mubr.msk.f32.mxu0 (!%p241_p10), %vm1426_vm0, %v1425_v0  ;;  %v1546_v5 = vmul.f32 (!%p241_p10), -1e+09, %v315_v4  ;;  %s1428_s24 = smov (!%p241_p10), 112  }
  0x10   : > { %1230 = vmatprep.subr.mxu1 (!%p241_p10), %v1425_v0  ;;  %1232 = vmatprep.mubr.msk.f32.mxu1 (!%p241_p10), %vm1426_vm0, %v1425_v0  ;;  %s1429_s25 = smov (!%p241_p10), 104   ;;  %s286_s9 = sand.u32 (!%p241_p10), 1, %s1407_s19  }
  0x11   : > { %s1183_s10 = sshll.u32 (!%p241_p10), %s286_s9, 5  ;;  %s1430_s12 = smov (!%p241_p10), 8  }
  0x12   : > { %s1431_s13 = smov (!%p241_p10), 16  }
  0x16   : > { %s290_s7 = scalar_select %p289_p11, %s1415_s21, 1 }
  0x18   : > { %s1528_s8 = sshll.u32 %s290_s7, 3 }
  0x19   : > { %s299_s11 = scalar_lea.vmem %s1682_s1, %s1528_s8  ;;  %s295_s14 = scalar_lea.vmem %s1681_s0, %s1528_s8 }
  0x1a   : > { %v319_v1 = vld [vmem:[%s299_s11] sm:$0xff]  ;;  %s303_s7 = scalar_lea.vmem %s1683_s2, %s1528_s8  ;;  %s1569_s11 = scalar_lea.vmem [#allocation3], %s1183_s10 }
  0x1b   : > { %1226 = vmatpush3.xpose.msk.msra.mxu0 %vm321_vm1, %v319_v1  ;;  %v317_v2 = vld [vmem:[%s295_s14] sm:$0xff]  ;;  %486 = vrot.lane.b32.xlu1 %v319_v1, %s1427_s17  ;;  %s1208_s14 = sshll.u32 %s1415_s21, 9  ;;  %s1032_s15 = sshll.u32 %s1569_s11, 4  ;;  %s1626_s15 = int_to_ptr.vmem [resolvable:$true] %s1032_s15 }
  0x1c   : > { %v318_v3 = vmul.f32 0.35355338, %v317_v2  ;;  %1240 = vmatprep.subr.mxu0 %v1425_v0  ;;  %v1560_v15 = vld [vmem:[%s303_s7] sm:$0xff]  ;;  %s1345_s27 = scalar_lea.vmem %s1626_s15, 512  ;;  %s1432_s21 = smov [#allocation3]  }
  0x1d   : > { %1231 = vmatpush3.msra.mxu1 %v1560_v15  ;;  %p1346_p12 = scmp.ne.s32.totalorder %s1626_s15, %s1345_s27  ;;  %s1349_s29 = sshll.u32 %s1432_s21, 4  ;;  %s1350_s29 = int_to_ptr.vmem [resolvable:$false] %s1349_s29 }
  0x1e   : > { %1228 = vmatmul.mubr.msk.f32.vlgmr.msra.gmra.mrb[0].mxu0 %vm321_vm1, %v318_v3  ;;  %1235 = vmatprep.subr.mxu1 %v1425_v0  ;;  %s1351_s7 = scalar_lea.vmem %s1350_s29, 1024  ;;  %p1352_p1 = scmp.lt.s32.totalorder %s1626_s15, %s1350_s29 }
  0x1f   : > { %1242 = vmatprep.mubr.msk.f32.mxu0 %vm1426_vm0, %v1425_v0  ;;  %484 = vrot.lane.b32.xlu1 %v318_v3, %s1427_s17  ;;  %p1347_p13 = pnand %p1346_p12, %p1505_p4  ;;  %p1353_p2 = scmp.lt.s32.totalorder %s1351_s7, %s1345_s27 }
  0x21   : > { %p1348_p0 = pneg %p1347_p13  ;;  %p1354_p3 = por %p1353_p2, %p1352_p1 }
  0x23   : > { %658 = vrot.lane.b32.xlu1 %v318_v3, %s1428_s24  ;;  %p1355_p5 = pnand %p1354_p3, %p1348_p0 }
  0x27   : > { %833 = vrot.lane.b32.xlu1 %v319_v1, %s1429_s25 }
  0x2b   : > { %831 = vrot.lane.b32.xlu1 %v318_v3, %s1429_s25 }
  0x8d   : > { %v487_v16 = vpop.permute.xlu1 %486 }
  0x91   : > { %v485_v18 = vpop.permute.xlu1 %484 }
  0x95   : > { %v659_v20 = vpop.permute.xlu1 %658 }
  0x99   : > { %v834_v23 = vpop.permute.xlu1 %833 }
  0x9d   : > { %v832_v24 = vpop.permute.xlu1 %831 }
  0xf1   : > { %v394_v6 = vpop.f32.mrb[0].mxu0 }
  0xf2   : > { %v395_v7 = vadd.f32 %v394_v6, %v1546_v5  ;;  %v1229_v8 = vpop.f32.mrb[1].mxu0 }
  0xf4   : > { %v398_v9 = vsel %vm321_vm1, %v395_v7, -inf }
  0xf5   : > { %399 = vmax.xlane.f32.xlu0 %v398_v9 }
 0x182   : > { %v400_v10 = vpop.xlane.xlu0 %399 }
 0x183   : > { %v401_v11 = vsub.f32 %v395_v7, %v400_v10 }
 0x185   : > { %v402_v12 = vmul.f32 1.442695, %v401_v11 }
 0x187   : > { %1329 = vpow2.f32 %v402_v12 }
 0x191   : > { %v1330_v13 = vpop.eup %1329 }
 0x192   : > { %v404_v14 = vsel %vm321_vm1, %v1330_v13, 0.0 }
 0x193   : > { %405 = vadd.xlane.f32.xlu0 %v404_v14 }
 0x1a9   : > { %660 = vrot.lane.b32.xlu0 %v319_v1, %s1428_s24 }
 0x220   : > { %v406_v17 = vpop.xlane.xlu0 %405 }
 0x221   : > { %1331 = vrcp.f32 %v406_v17 }
 0x224   : > { %v661_v22 = vpop.permute.xlu0 %660 }
 0x22b   : > { %v1332_v19 = vpop.eup %1331 }
 0x22c   : > { %v408_v21 = vmul.f32 %v1332_v19, %v1330_v13 }
 0x22e   : > { %1233 = vmatmul.mubr.msk.f32.vlgmr.msra.gmra.mrb[0].mxu1 %vm321_vm1, %v408_v21  ;;  %483 = vst.msk [vmem:[%s1569_s11] sm:$0xff] %vm321_vm1, %v408_v21 }
 0x22f   : > { %1236 = vmatpush3.xpose.msk.msra.mxu1 %vm321_vm1, %v487_v16  ;;  %1237 = vmatprep.mubr.msk.f32.mxu1 %vm1426_vm0, %v1425_v0 }
 0x230   : > { %1245 = vmatprep.subr.mxu1 %v1425_v0 }
 0x232   : > { %1238 = vmatmul.mubr.msk.f32.vlgmr.msra.gmra.mrb[2].mxu1 %vm321_vm1, %v485_v18 }
 0x233   : > { %1246 = vmatpush3.xpose.msk.msra.mxu1 %vm321_vm1, %v661_v22  ;;  %1247 = vmatprep.mubr.msk.f32.mxu1 %vm1426_vm0, %v1425_v0 }
 0x234   : > { %1255 = vmatprep.subr.mxu1 %v1425_v0 }
 0x236   : > { %1248 = vmatmul.mubr.msk.f32.vlgmr.msra.gmra.mrb[4].mxu1 %vm321_vm1, %v659_v20 }
 0x237   : > { %1256 = vmatpush3.xpose.msk.msra.mxu1 %vm321_vm1, %v834_v23  ;;  %1257 = vmatprep.mubr.msk.f32.mxu1 %vm1426_vm0, %v1425_v0 }
 0x23a   : > { %1258 = vmatmul.mubr.msk.f32.vlgmr.msra.gmra.mrb[6].mxu1 %vm321_vm1, %v832_v24 }
 0x301   : > { %v478_v25 = vpop.f32.mrb[0].mxu1 }
 0x302   : > { %482 = vst.msk [vmem:[#allocation2] sm:$0xff] %vm321_vm1, %v478_v25  ;;  %v1234_v26 = vpop.f32.mrb[1].mxu1 }
 0x305   : > { %v558_v27 = vpop.f32.mrb[2].mxu1 }
 0x306   : > { %v559_v28 = vadd.f32 %v558_v27, %v1546_v5  ;;  %v1239_v29 = vpop.f32.mrb[3].mxu1 }
 0x308   : > { %v562_v30 = vsel %vm321_vm1, %v559_v28, -inf }
 0x309   : > { %563 = vmax.xlane.f32.xlu1 %v562_v30  ;;  %v732_v31 = vpop.f32.mrb[4].mxu1 }
 0x30a   : > { %v733_v32 = vadd.f32 %v732_v31, %v1546_v5  ;;  %v1249_v33 = vpop.f32.mrb[5].mxu1 }
 0x30c   : > { %v736_v34 = vsel %vm321_vm1, %v733_v32, -inf }
 0x30d   : > { %737 = vmax.xlane.f32.xlu0 %v736_v34  ;;  %v905_v35 = vpop.f32.mrb[6].mxu1 }
 0x30e   : > { %v906_v36 = vadd.f32 %v905_v35, %v1546_v5  ;;  %v1259_v37 = vpop.f32.mrb[7].mxu1 }
 0x310   : > { %v909_v38 = vsel %vm321_vm1, %v906_v36, -inf }
 0x311   : > { %910 = vmax.xlane.f32.xlu1 %v909_v38 }
 0x396   : > { %v564_v39 = vpop.xlane.xlu1 %563 }
 0x397   : > { %v565_v40 = vsub.f32 %v559_v28, %v564_v39 }
 0x399   : > { %v566_v41 = vmul.f32 1.442695, %v565_v40 }
 0x39a   : > { %v738_v42 = vpop.xlane.xlu0 %737 }
 0x39b   : > { %1333 = vpow2.f32 %v566_v41  ;;  %v739_v43 = vsub.f32 %v733_v32, %v738_v42 }
 0x39d   : > { %v740_v44 = vmul.f32 1.442695, %v739_v43 }
 0x39e   : > { %v911_v49 = vpop.xlane.xlu1 %910 }
 0x39f   : > { %1335 = vpow2.f32 %v740_v44  ;;  %v912_v50 = vsub.f32 %v906_v36, %v911_v49 }
 0x3a1   : > { %v913_v51 = vmul.f32 1.442695, %v912_v50 }
 0x3a3   : > { %1337 = vpow2.f32 %v913_v51 }
 0x3a5   : > { %v1334_v45 = vpop.eup %1333 }
 0x3a6   : > { %v568_v46 = vsel %vm321_vm1, %v1334_v45, 0.0 }
 0x3a7   : > { %569 = vadd.xlane.f32.xlu1 %v568_v46 }
 0x3a9   : > { %v1336_v47 = vpop.eup %1335 }
 0x3aa   : > { %v742_v48 = vsel %vm321_vm1, %v1336_v47, 0.0 }
 0x3ab   : > { %743 = vadd.xlane.f32.xlu0 %v742_v48 }
 0x3ad   : > { %v1338_v52 = vpop.eup %1337 }
 0x3ae   : > { %v915_v53 = vsel %vm321_vm1, %v1338_v52, 0.0 }
 0x3b8   : > { %747 = vrot.lane.b32.xlu1 %v1560_v15, %s1428_s24  ;;  %s1624_s24 = scalar_lea.hbm %s1686_s5, %s1208_s14 }
 0x3c1   : > { %574 = vrot.lane.b32.xlu0 %v1560_v15, %s1427_s17 }
 0x3dc   : > { %916 = vadd.xlane.f32.xlu1 %v915_v53 }
 0x3ed   : > { %920 = vrot.lane.b32.xlu1 %v1560_v15, %s1429_s25  ;;  %s1630_s25 = scalar_lea.sflag [#allocation4], %s286_s9 }
 0x434   : > { %v570_v54 = vpop.xlane.xlu1 %569 }
 0x435   : > { %1339 = vrcp.f32 %v570_v54 }
 0x438   : > { %v744_v55 = vpop.xlane.xlu0 %743  ;;  %v748_v59 = vpop.permute.xlu1 %747 }
 0x439   : > { %1341 = vrcp.f32 %v744_v55 }
 0x43c   : > { %v575_v56 = vpop.permute.xlu0 %574 }
 0x43d   : > { %1241 = vmatpush3.msra.mxu0 %v575_v56 }
 0x43e   : > { %1250 = vmatprep.subr.mxu0 %v1425_v0 }
 0x43f   : > { %v1340_v57 = vpop.eup %1339 }
 0x440   : > { %v572_v58 = vmul.f32 %v1340_v57, %v1334_v45 }
 0x442   : > { %1194 = vst.msk [vmem:[%s1569_s11 + $0x8] sm:$0xff] %vm321_vm1, %v572_v58  ;;  %1243 = vmatmul.mubr.msk.f32.vlgmr.msra.gmra.mrb[2].mxu0 %vm321_vm1, %v572_v58 }
 0x443   : > { %v1342_v60 = vpop.eup %1341  ;;  %1251 = vmatpush3.msra.mxu0 %v748_v59  ;;  %1252 = vmatprep.mubr.msk.f32.mxu0 %vm1426_vm0, %v1425_v0 }
 0x444   : > { %v746_v61 = vmul.f32 %v1342_v60, %v1336_v47  ;;  %1260 = vmatprep.subr.mxu0 %v1425_v0 }
 0x446   : > { %1198 = vst.msk [vmem:[%s1569_s11 + $0x10] sm:$0xff] %vm321_vm1, %v746_v61  ;;  %1253 = vmatmul.mubr.msk.f32.vlgmr.msra.gmra.mrb[4].mxu0 %vm321_vm1, %v746_v61 }
 0x447   : > { %1262 = vmatprep.mubr.msk.f32.mxu0 %vm1426_vm0, %v1425_v0 }
 0x469   : > { %v917_v62 = vpop.xlane.xlu1 %916 }
 0x46a   : > { %1343 = vrcp.f32 %v917_v62 }
 0x46d   : > { %v921_v63 = vpop.permute.xlu1 %920 }
 0x46e   : > { %1261 = vmatpush3.msra.mxu0 %v921_v63 }
 0x474   : > { %v1344_v1 = vpop.eup %1343 }
 0x475   : > { %v919_v2 = vmul.f32 %v1344_v1, %v1338_v52 }
 0x477   : > { %1202 = vst.msk [vmem:[%s1569_s11 + $0x18] sm:$0xff] %vm321_vm1, %v919_v2  ;;  %1263 = vmatmul.mubr.msk.f32.vlgmr.msra.gmra.mrb[6].mxu0 %vm321_vm1, %v919_v2 }
 0x515   : > { %v646_v3 = vpop.f32.mrb[2].mxu0 }
 0x516   : > { %651 = vrot.lane.b32.xlu0 %v646_v3, %s1430_s12  ;;  %v1244_v4 = vpop.f32.mrb[3].mxu0 }
 0x519   : > { %v819_v0 = vpop.f32.mrb[4].mxu0 }
 0x51a   : > { %824 = vrot.lane.b32.xlu1 %v819_v0, %s1431_s13  ;;  %v1254_v5 = vpop.f32.mrb[5].mxu0 }
 0x51b   : > { %1358 = shalt.err (!%p1355_p5)
}
 0x51c   : > { %s1359_s9 = scalar_lea.hbm %s1624_s24, 512  ;;  %s1363_s13 = scalar_lea.hbm %s1686_s5, 1024 }
 0x51d   : > { %p1360_p6 = scmp.ne.s32.totalorder %s1624_s24, %s1359_s9  ;;  %p1364_p10 = scmp.lt.u32.totalorder %s1624_s24, %s1686_s5 }
 0x51e   : > { %p1365_p11 = scmp.lt.u32.totalorder %s1363_s13, %s1359_s9  ;;  %p1367_p13 = scmp.lt.u32.totalorder %s1359_s9, %s1624_s24 }
 0x51f   : > { %p1361_p7 = pnand %p1360_p6, %p1505_p4 }
 0x520   : > { %p1366_p12 = por %p1365_p11, %p1364_p10 }
 0x521   : > { %p1362_p9 = pneg %p1361_p7 }
 0x522   : > { %p1368_p0 = por %p1367_p13, %p1366_p12 }
 0x524   : > { %p1369_p1 = pnand %p1368_p0, %p1362_p9 }
 0x526   : > { %1372 = shalt.err (!%p1369_p1)
}
 0x527   : > { %s1433_s17 = smov 128   ;;  %s1434_s27 = smov 24   ;;  %vm654_vm2 = vcmask 130112   ;;  %vm827_vm3 = vcmask 195712   ;;  %vm1000_vm4 = vcmask 261312   ;;  %vm1005_vm5 = vcmask 261120  }
 0x528   : > { %1265 = dma.vmem_to_hbm [thread:$0]  (%p1505_p4), %s1626_s15, 512, %s1624_s24, %s1630_s25, %s1433_s17, %s1433_s17, %s1430_s12  }
 0x529   : > { %s314_s29 = scalar_lea.vmem %s1685_s4, %s1528_s8 }
 0x54a   : > { %v992_v6 = vpop.f32.mrb[6].mxu0 }
 0x54b   : > { %997 = vrot.lane.b32.xlu0 %v992_v6, %s1434_s27  ;;  %v1264_v7 = vpop.f32.mrb[7].mxu0 }
 0x588   : > { %v652_v8 = vpop.permute.xlu0 %651 }
 0x589   : > { %655 = vst.msk [vmem:[#allocation2] sm:$0xff] %vm654_vm2, %v652_v8 }
 0x58c   : > { %v825_v9 = vpop.permute.xlu1 %824 }
 0x58d   : > { %828 = vst.msk [vmem:[#allocation2] sm:$0xff] %vm827_vm3, %v825_v9 }
 0x5bd   : > { %v998_v10 = vpop.permute.xlu0 %997 }
 0x5be   : > { %1001 = vst.msk [vmem:[#allocation2] sm:$0xff] %vm1000_vm4, %v998_v10 }
 0x5c5   : > { %v1004_v11 = vld [vmem:[#allocation2] sm:$0xff] }
 0x5c6   : > { %1006 = vst.msk [vmem:[%s314_s29] sm:$0xff] %vm1005_vm5, %v1004_v11 }
 0x5c7 PF: > { %p1271_p4 = scmp.ge.s32.totalorder %s1423_s23, 2  ;;  %s1057_s12 = sand.u32 1, %s1403_s18  }
 0x5c8   : > { %s1058_s15 = scalar_lea.sflag [#allocation4], %s1057_s12 }
 0x5c9   : > { %p1268_p2 = pnand %p1271_p4, %p1512_p8 }
 0x5cb   : > { %1398 = dma.done.wait (!%p1268_p2), %s1058_s15, 512  }
 0x5cc   : > { %1400 = vsyncadd (!%p1268_p2), %s1058_s15, 4294966784  ;;  %s19_s23 = sadd.s32 1, %s1423_s23   ;;  %s1689_s18 = smov %s1407_s19 }
 0x5cd   : > { %p16_p3 = scmp.ge.s32.totalorder %s19_s23, 4   ;;  %s1690_s19 = smov %s1411_s20 }
 0x5ce   : > { %s1691_s20 = smov %s1518_s6  ;;  %s1692_s21 = smov %s1419_s22 }
 0x5cf   : > { %s1693_s22 = smov %s1695_s26  ;;  %18 = sbr.rel (!%p16_p3) target bundleno = 4 (0x4), region = 95 }
 0x5d6   :  { %1063 = vsyncpa [#allocation4], 1 }
 0x5d7   :  { %1065 = vsyncpa [#allocation4 + $0x1], 1 }

// kernel: decoder_layer.16
= control target key start
LH: loop header
LB: loop body
LE: loop exit
PB: predicated region body
PF: predicated region fallthrough
CT: control target
= control target key end

     0   :  { %vm19_vm0 = vcmask 523264   ;;  %v134_v0 = vmov 0.0   ;;  %vm135_vm1 = vmmov 0   ;;  %vm43_vm2 = vcmask 261120   ;;  %s183_s1 = inlined_call_operand.vmem [shape: bf16[1,32,64], index: 1, kind: input, shape index: {}]   ;;  %s184_s0 = inlined_call_operand.vmem [shape: f32[16,32], index: 0, kind: input, shape index: {}]   ;;  %s185_s2 = inlined_call_operand.vmem [shape: f32[1,64], index: 2, kind: input, shape index: {}]   ;;  %s186_s3 = inlined_call_operand.vmem [shape: f32[16,64], index: 3, kind: output, shape index: {}]  }
   0x1   :  { %122 = vmatprep.subr.bf16.mxu0 %v134_v0  ;;  %v132_v1 = vld [vmem:[%s183_s1] sm:$0xff]   ;;  %126 = vmatprep.mubr.msk.bf16.mxu0 %vm135_vm1, %v134_v0  ;;  %20 = vst.msk [vmem:[#allocation2] sm:$0xff] %vm19_vm0, %v134_v0  ;;  %21 = vst.msk [vmem:[#allocation2 + $0x8] sm:$0xff] %vm19_vm0, %v134_v0  ;;  %v133_v2 = vld [vmem:[%s183_s1 + $0x8] sm:$0xff]  }
   0x2   :  { %123 = vmatpush3.bf16.msra.mxu0 %v132_v1  ;;  %v22_v3 = vld [vmem:[%s184_s0] sm:$0xff]  ;;  %v23_v4 = vld [vmem:[%s184_s0 + $0x8] sm:$0xff] }
   0x3   :  { %124 = vmatprep.subr.bf16.mxu0 %v134_v0  ;;  %v24_v5 = vpack.c.bf16 %v23_v4, %v22_v3  ;;  %v118_v14 = vld [vmem:[%s185_s2] ss:$0 sm:$0xff] }
   0x6   :  { %125 = vmatpush3.bf16.msra.mxu0 %v133_v2 }
   0x8   :  { %v25_v6 = vld [vmem:[#allocation2] sm:$0xff]  ;;  %v26_v8 = vld [vmem:[#allocation2 + $0x8] sm:$0xff] }
   0x9   :  { %127 = vmatmul.mubr.msk.bf16.vlgmr.msra.gmra.mrb[0].mxu0 %vm43_vm2, %v24_v5 }
  0xdc   :  { %v81_v7 = vpop.f32.mrb[0].mxu0 }
  0xdd   :  { %v88_v9 = vadd.f32 %v81_v7, %v25_v6  ;;  %v128_v10 = vpop.f32.mrb[1].mxu0 }
  0xde   :  { %v84_v11 = vpop.f32.mrb[2].mxu0 }
  0xdf   :  { %91 = vst.msk [vmem:[#allocation2] sm:$0xff] %vm19_vm0, %v88_v9  ;;  %v89_v12 = vadd.f32 %v84_v11, %v26_v8  ;;  %v129_v13 = vpop.f32.mrb[3].mxu0 }
  0xe1   :  { %92 = vst.msk [vmem:[#allocation2 + $0x8] sm:$0xff] %vm19_vm0, %v89_v12 }
  0xe6   :  { %v97_v15 = vld [vmem:[#allocation2] sm:$0xff] }
  0xe7   :  { %v105_v16 = vadd.f32 %v118_v14, %v97_v15 }
  0xe8   :  { %v98_v17 = vld [vmem:[#allocation2 + $0x8] sm:$0xff] }
  0xe9   :  { %v107_v18 = vmax.f32 %v105_v16, 0.0  ;;  %v106_v19 = vadd.f32 %v118_v14, %v98_v17 }
  0xeb   :  { %109 = vst.msk [vmem:[%s186_s3] sm:$0xff] %vm19_vm0, %v107_v18  ;;  %v108_v20 = vmax.f32 %v106_v19, 0.0 }
  0xed   :  { %110 = vst.msk [vmem:[%s186_s3 + $0x8] sm:$0xff] %vm19_vm0, %v108_v20 }

// kernel: decoder_layer.13
= control target key start
LH: loop header
LB: loop body
LE: loop exit
PB: predicated region body
PF: predicated region fallthrough
CT: control target
= control target key end

     0   :  { %vm21_vm0 = vcmask 261120   ;;  %v231_v0 = vmov 0.0   ;;  %vm232_vm1 = vmmov 0   ;;  %v167_v8 = vlaneseq  ;;  %s305_s1 = inlined_call_operand.vmem [shape: bf16[2,32,32], index: 1, kind: input, shape index: {}]   ;;  %s306_s0 = inlined_call_operand.vmem [shape: f32[16,32], index: 0, kind: input, shape index: {}]   ;;  %s307_s2 = inlined_call_operand.vmem [shape: f32[2,32], index: 2, kind: input, shape index: {}]   ;;  %s308_s3 = inlined_call_operand.vmem [shape: f32[16,32], index: 3, kind: output, shape index: {0}]   ;;  %s309_s4 = inlined_call_operand.vmem [shape: f32[16,32], index: 4, kind: output, shape index: {1}]  }
   0x1   :  { %209 = vmatprep.subr.bf16.mxu0 %v231_v0  ;;  %217 = vmatprep.subr.bf16.mxu1 %v231_v0  ;;  %v227_v1 = vld [vmem:[%s305_s1] sm:$0xff]   ;;  %22 = vst.msk [vmem:[#allocation2] sm:$0xff] %vm21_vm0, %v231_v0  ;;  %23 = vst.msk [vmem:[#allocation2 + $0x8] sm:$0xff] %vm21_vm0, %v231_v0  ;;  %v228_v2 = vld [vmem:[%s305_s1 + $0x10] sm:$0xff]  }
   0x2   :  { %24 = vst.msk [vmem:[#allocation2 + $0x10] sm:$0xff] %vm21_vm0, %v231_v0  ;;  %25 = vst.msk [vmem:[#allocation2 + $0x18] sm:$0xff] %vm21_vm0, %v231_v0  ;;  %213 = vmatprep.mubr.msk.bf16.mxu0 %vm232_vm1, %v231_v0  ;;  %221 = vmatprep.mubr.msk.bf16.mxu1 %vm232_vm1, %v231_v0  ;;  %v229_v3 = vld [vmem:[%s305_s1 + $0x8] sm:$0xff]   ;;  %v230_v4 = vld [vmem:[%s305_s1 + $0x18] sm:$0xff]   ;;  %v168_v10 = vshrl.u32 %v167_v8, 7 }
   0x3   :  { %210 = vmatpush3.bf16.msra.mxu0 %v227_v1  ;;  %218 = vmatpush3.bf16.msra.mxu1 %v228_v2  ;;  %v26_v5 = vld [vmem:[%s306_s0] sm:$0xff]  ;;  %v27_v6 = vld [vmem:[%s306_s0 + $0x8] sm:$0xff] }
   0x4   :  { %211 = vmatprep.subr.bf16.mxu0 %v231_v0  ;;  %219 = vmatprep.subr.bf16.mxu1 %v231_v0  ;;  %v28_v7 = vpack.c.bf16 %v27_v6, %v26_v5  ;;  %v169_v21 = vsub.s32 0, %v168_v10  ;;  %v164_v25 = vld [vmem:[%s307_s2] sm:$0x3]  ;;  %v179_v26 = vsub.s32 1, %v168_v10 }
   0x6   :  { %v170_v29 = vrot.slane %v164_v25, %v169_v21  ;;  %v180_v30 = vrot.slane %v164_v25, %v179_v26 }
   0x7   :  { %212 = vmatpush3.bf16.msra.mxu0 %v229_v3  ;;  %220 = vmatpush3.bf16.msra.mxu1 %v230_v4 }
   0x8   :  { %v29_v9 = vld [vmem:[#allocation2] sm:$0xff]  ;;  %v30_v13 = vld [vmem:[#allocation2 + $0x8] sm:$0xff] }
   0x9   :  { %v97_v11 = vld [vmem:[#allocation2 + $0x10] sm:$0xff]  ;;  %v98_v17 = vld [vmem:[#allocation2 + $0x18] sm:$0xff] }
   0xa   :  { %214 = vmatmul.mubr.msk.bf16.vlgmr.msra.gmra.mrb[0].mxu0 %vm21_vm0, %v28_v7  ;;  %222 = vmatmul.mubr.msk.bf16.vlgmr.msra.gmra.mrb[0].mxu1 %vm21_vm0, %v28_v7 }
  0xdd   :  { %v85_v12 = vpop.f32.mrb[0].mxu0  ;;  %v150_v15 = vpop.f32.mrb[0].mxu1 }
  0xde   :  { %v92_v14 = vadd.f32 %v85_v12, %v29_v9  ;;  %v215_v16 = vpop.f32.mrb[1].mxu0  ;;  %v157_v18 = vadd.f32 %v150_v15, %v97_v11  ;;  %v223_v19 = vpop.f32.mrb[1].mxu1 }
  0xdf   :  { %v88_v20 = vpop.f32.mrb[2].mxu0  ;;  %v153_v23 = vpop.f32.mrb[2].mxu1 }
  0xe0   :  { %94 = vst.msk [vmem:[#allocation2] sm:$0xff] %vm21_vm0, %v92_v14  ;;  %v93_v22 = vadd.f32 %v88_v20, %v30_v13  ;;  %v216_v24 = vpop.f32.mrb[3].mxu0  ;;  %159 = vst.msk [vmem:[#allocation2 + $0x10] sm:$0xff] %vm21_vm0, %v157_v18  ;;  %v158_v27 = vadd.f32 %v153_v23, %v98_v17  ;;  %v224_v28 = vpop.f32.mrb[3].mxu1 }
  0xe2   :  { %95 = vst.msk [vmem:[#allocation2 + $0x8] sm:$0xff] %vm21_vm0, %v93_v22  ;;  %160 = vst.msk [vmem:[#allocation2 + $0x18] sm:$0xff] %vm21_vm0, %v158_v27 }
  0xe7   :  { %v165_v31 = vld [vmem:[#allocation2] sm:$0xff]  ;;  %v175_v33 = vld [vmem:[#allocation2 + $0x10] sm:$0xff] }
  0xe8   :  { %v171_v32 = vadd.f32 %v170_v29, %v165_v31  ;;  %v181_v34 = vadd.f32 %v180_v30, %v175_v33 }
  0xe9   :  { %v166_v35 = vld [vmem:[#allocation2 + $0x8] sm:$0xff]  ;;  %v176_v37 = vld [vmem:[#allocation2 + $0x18] sm:$0xff] }
  0xea   :  { %173 = vst.msk [vmem:[%s308_s3] sm:$0xff] %vm21_vm0, %v171_v32  ;;  %v172_v36 = vadd.f32 %v170_v29, %v166_v35  ;;  %183 = vst.msk [vmem:[%s309_s4] sm:$0xff] %vm21_vm0, %v181_v34  ;;  %v182_v38 = vadd.f32 %v180_v30, %v176_v37 }
  0xec   :  { %174 = vst.msk [vmem:[%s308_s3 + $0x8] sm:$0xff] %vm21_vm0, %v172_v36  ;;  %184 = vst.msk [vmem:[%s309_s4 + $0x8] sm:$0xff] %vm21_vm0, %v182_v38 }

// kernel: decoder_layer.14
= control target key start
LH: loop header
LB: loop body
LE: loop exit
PB: predicated region body
PF: predicated region fallthrough
CT: control target
= control target key end

     0   :  { %11 = vsyncpa [#allocation4], 0  ;;  %s1677_s0 = inlined_call_operand.vmem [shape: f32[2,8,32], index: 0, kind: input, shape index: {}]   ;;  %s1678_s1 = inlined_call_operand.vmem [shape: f32[2,8,32], index: 1, kind: input, shape index: {}]   ;;  %s1679_s2 = inlined_call_operand.vmem [shape: f32[2,8,32], index: 2, kind: input, shape index: {}]   ;;  %s1680_s3 = inlined_call_operand.vmem [shape: f32[2,1,8], index: 3, kind: input, shape index: {}]   ;;  %s1681_s4 = inlined_call_operand.vmem [shape: f32[2,8,32], index: 4, kind: output, shape index: {0}]   ;;  %s1682_s5 = inlined_call_operand.hbm [shape: f32[2,4,8,8], index: 5, kind: output, shape index: {1}]  }
   0x1   :  { %13 = vsyncpa [#allocation4 + $0x1], 0  ;;  %s1461_s18 = smov 0   ;;  %s1463_s19 = smov 0  }
   0x2   :  { %s1465_s20 = smov 0   ;;  %s1467_s21 = smov 0  }
   0x3   :  { %s1469_s22 = smov 0   ;;  %s1471_s23 = smov 0  }
   0x4 LB: > { %s1174_s24 = sadd.s32 4294967295, %s1419_s23   ;;  %s1175_s25 = sadd.s32 4294967294, %s1419_s23   ;;  %s1419_s23 = sphi %s1471_s23, %s19_s23   ;;  %s1415_s22 = sphi %s1469_s22, %s1689_s22   ;;  %s1411_s21 = sphi %s1467_s21, %s1688_s21   ;;  %s1407_s20 = sphi %s1465_s20, %s1687_s20   ;;  %s1403_s19 = sphi %s1463_s19, %s1686_s19   ;;  %s1399_s18 = sphi %s1461_s18, %s1685_s18  }
   0x5   : > { %s31_s26 = sadd.s32 1, %s1415_s22  ;;  %s174_s27 = sadd.s32 1, %s1407_s20 }
   0x6   : > { %p33_p0 = scmp.ge.s32.totalorder %s31_s26, 2  ;;  %p184_p1 = scmp.ne.s32.totalorder %s1407_s20, %s1403_s19 }
   0x7   : > { %p185_p2 = scmp.eq.s32.totalorder %s1174_s24, 1  ;;  %p190_p3 = scmp.ne.s32.totalorder %s1403_s19, %s1399_s18 }
   0x8   : > { %s1691_s26 = smov (%p33_p0, %s31_s26), 0  ;;  %p191_p5 = scmp.eq.s32.totalorder %s1175_s25, 1 }
   0x9   : > { %p1501_p4 = por %p185_p2, %p184_p1  ;;  %s169_s29 = ssub.s32 %s1415_s22, %s1691_s26 }
   0xa   : > { %p1178_p6 = scmp.ge.s32.totalorder %s1419_s23, 1  ;;  %p172_p7 = scmp.eq.s32.totalorder %s169_s29, 0 }
   0xb   : > { %p1508_p8 = por %p191_p5, %p190_p3  ;;  %p239_p9 = scmp.lt.s32.totalorder %s1419_s23, 3 }
   0xc   : > { %s1514_s6 = scalar_select %p172_p7, %s1407_s20, %s174_s27  }
   0xd   : > { %p240_p10 = pnand %p1178_p6, %p239_p9 }
   0xe   : > { %p287_p11 = scmp.lt.s32.totalorder (!%p240_p10), %s1411_s21, 1  ;;  %v1421_v0 = vmov (!%p240_p10), 0.0   ;;  %vm1422_vm0 = vmmov (!%p240_p10), 0   ;;  %vm324_vm1 = vcmask (!%p240_p10), 64512   ;;  %v319_v4 = vlaneseq (!%p240_p10)  ;;  %s1423_s24 = smov (!%p240_p10), 120  }
   0xf   : > { %243 = sbr.rel (%p240_p10) target bundleno = 1479 (0x5c7), region = 36  ;;  %1221 = vmatprep.subr.mxu0 (!%p240_p10), %v1421_v0  ;;  %1223 = vmatprep.mubr.msk.f32.mxu0 (!%p240_p10), %vm1422_vm0, %v1421_v0  ;;  %s1424_s25 = smov (!%p240_p10), 112  }
  0x10   : > { %1226 = vmatprep.subr.mxu1 (!%p240_p10), %v1421_v0  ;;  %1228 = vmatprep.mubr.msk.f32.mxu1 (!%p240_p10), %vm1422_vm0, %v1421_v0  ;;  %v320_v5 = vshrl.u32 (!%p240_p10), %v319_v4, 7  ;;  %s1425_s27 = smov (!%p240_p10), 104   ;;  %s284_s10 = sand.u32 (!%p240_p10), 1, %s1403_s19  }
  0x11   : > { %s1426_s13 = smov (!%p240_p10), 8   ;;  %s1204_s15 = sshll.u32 (!%p240_p10), %s1411_s21, 9 }
  0x12   : > { %v321_v8 = vsub.s32 (!%p240_p10), 0, %v320_v5 }
  0x16   : > { %s288_s7 = scalar_select %p287_p11, %s1411_s21, 1 }
  0x17   : > { %s1428_s21 = smov [#allocation3]  }
  0x18   : > { %s1524_s8 = sshll.u32 %s288_s7, 3  ;;  %s304_s17 = scalar_lea.vmem %s1680_s3, %s288_s7 }
  0x19   : > { %s297_s11 = scalar_lea.vmem %s1678_s1, %s1524_s8  ;;  %s293_s14 = scalar_lea.vmem %s1677_s0, %s1524_s8  ;;  %v312_v6 = vld [vmem:[%s304_s17] sm:$0x1] }
  0x1a   : > { %v316_v1 = vld [vmem:[%s297_s11] sm:$0xff]  ;;  %v313_v7 = vmul.f32 -1e+09, %v312_v6  ;;  %s301_s9 = scalar_lea.vmem %s1679_s2, %s1524_s8  ;;  %s1179_s11 = sshll.u32 %s284_s10, 5 }
  0x1b   : > { %1222 = vmatpush3.xpose.msk.msra.mxu0 %vm324_vm1, %v316_v1  ;;  %v314_v2 = vld [vmem:[%s293_s14] sm:$0xff]  ;;  %489 = vrot.lane.b32.xlu1 %v316_v1, %s1423_s24  ;;  %s1565_s12 = scalar_lea.vmem [#allocation3], %s1179_s11  ;;  %s1427_s14 = smov 16  }
  0x1c   : > { %v315_v3 = vmul.f32 0.35355338, %v314_v2  ;;  %1236 = vmatprep.subr.mxu0 %v1421_v0  ;;  %v1542_v9 = vrot.slane %v313_v7, %v321_v8  ;;  %v1556_v19 = vld [vmem:[%s301_s9] sm:$0xff]  ;;  %s1035_s16 = sshll.u32 %s1565_s12, 4  ;;  %s1345_s7 = sshll.u32 %s1428_s21, 4  ;;  %s1622_s16 = int_to_ptr.vmem [resolvable:$true] %s1035_s16  ;;  %s1346_s7 = int_to_ptr.vmem [resolvable:$false] %s1345_s7 }
  0x1d   : > { %1227 = vmatpush3.msra.mxu1 %v1556_v19  ;;  %s1341_s29 = scalar_lea.vmem %s1622_s16, 512  ;;  %s1347_s9 = scalar_lea.vmem %s1346_s7, 1024 }
  0x1e   : > { %1224 = vmatmul.mubr.msk.f32.vlgmr.msra.gmra.mrb[0].mxu0 %vm324_vm1, %v315_v3  ;;  %1231 = vmatprep.subr.mxu1 %v1421_v0  ;;  %p1342_p12 = scmp.ne.s32.totalorder %s1622_s16, %s1341_s29  ;;  %p1348_p1 = scmp.lt.s32.totalorder %s1622_s16, %s1346_s7 }
  0x1f   : > { %1238 = vmatprep.mubr.msk.f32.mxu0 %vm1422_vm0, %v1421_v0  ;;  %487 = vrot.lane.b32.xlu1 %v315_v3, %s1423_s24  ;;  %p1349_p2 = scmp.lt.s32.totalorder %s1347_s9, %s1341_s29 }
  0x20   : > { %p1343_p13 = pnand %p1342_p12, %p1501_p4 }
  0x21   : > { %p1350_p3 = por %p1349_p2, %p1348_p1 }
  0x22   : > { %p1344_p0 = pneg %p1343_p13 }
  0x23   : > { %661 = vrot.lane.b32.xlu1 %v315_v3, %s1424_s25 }
  0x24   : > { %p1351_p5 = pnand %p1350_p3, %p1344_p0 }
  0x27   : > { %836 = vrot.lane.b32.xlu1 %v316_v1, %s1425_s27 }
  0x2b   : > { %834 = vrot.lane.b32.xlu1 %v315_v3, %s1425_s27 }
  0x8d   : > { %v490_v20 = vpop.permute.xlu1 %489 }
  0x91   : > { %v488_v22 = vpop.permute.xlu1 %487 }
  0x95   : > { %v662_v24 = vpop.permute.xlu1 %661 }
  0x99   : > { %v837_v27 = vpop.permute.xlu1 %836 }
  0x9d   : > { %v835_v28 = vpop.permute.xlu1 %834 }
  0xf1   : > { %v397_v10 = vpop.f32.mrb[0].mxu0 }
  0xf2   : > { %v398_v11 = vadd.f32 %v397_v10, %v1542_v9  ;;  %v1225_v12 = vpop.f32.mrb[1].mxu0 }
  0xf4   : > { %v401_v13 = vsel %vm324_vm1, %v398_v11, -inf }
  0xf5   : > { %402 = vmax.xlane.f32.xlu0 %v401_v13 }
 0x182   : > { %v403_v14 = vpop.xlane.xlu0 %402 }
 0x183   : > { %v404_v15 = vsub.f32 %v398_v11, %v403_v14 }
 0x185   : > { %v405_v16 = vmul.f32 1.442695, %v404_v15 }
 0x187   : > { %1325 = vpow2.f32 %v405_v16 }
 0x191   : > { %v1326_v17 = vpop.eup %1325 }
 0x192   : > { %v407_v18 = vsel %vm324_vm1, %v1326_v17, 0.0 }
 0x193   : > { %408 = vadd.xlane.f32.xlu0 %v407_v18 }
 0x1a9   : > { %663 = vrot.lane.b32.xlu0 %v316_v1, %s1424_s25 }
 0x220   : > { %v409_v21 = vpop.xlane.xlu0 %408 }
 0x221   : > { %1327 = vrcp.f32 %v409_v21 }
 0x224   : > { %v664_v26 = vpop.permute.xlu0 %663 }
 0x22b   : > { %v1328_v23 = vpop.eup %1327 }
 0x22c   : > { %v411_v25 = vmul.f32 %v1328_v23, %v1326_v17 }
 0x22e   : > { %1229 = vmatmul.mubr.msk.f32.vlgmr.msra.gmra.mrb[0].mxu1 %vm324_vm1, %v411_v25  ;;  %486 = vst.msk [vmem:[%s1565_s12] sm:$0xff] %vm324_vm1, %v411_v25 }
 0x22f   : > { %1232 = vmatpush3.xpose.msk.msra.mxu1 %vm324_vm1, %v490_v20  ;;  %1233 = vmatprep.mubr.msk.f32.mxu1 %vm1422_vm0, %v1421_v0 }
 0x230   : > { %1241 = vmatprep.subr.mxu1 %v1421_v0 }
 0x232   : > { %1234 = vmatmul.mubr.msk.f32.vlgmr.msra.gmra.mrb[2].mxu1 %vm324_vm1, %v488_v22 }
 0x233   : > { %1242 = vmatpush3.xpose.msk.msra.mxu1 %vm324_vm1, %v664_v26  ;;  %1243 = vmatprep.mubr.msk.f32.mxu1 %vm1422_vm0, %v1421_v0 }
 0x234   : > { %1251 = vmatprep.subr.mxu1 %v1421_v0 }
 0x236   : > { %1244 = vmatmul.mubr.msk.f32.vlgmr.msra.gmra.mrb[4].mxu1 %vm324_vm1, %v662_v24 }
 0x237   : > { %1252 = vmatpush3.xpose.msk.msra.mxu1 %vm324_vm1, %v837_v27  ;;  %1253 = vmatprep.mubr.msk.f32.mxu1 %vm1422_vm0, %v1421_v0 }
 0x23a   : > { %1254 = vmatmul.mubr.msk.f32.vlgmr.msra.gmra.mrb[6].mxu1 %vm324_vm1, %v835_v28 }
 0x301   : > { %v481_v29 = vpop.f32.mrb[0].mxu1 }
 0x302   : > { %485 = vst.msk [vmem:[#allocation2] sm:$0xff] %vm324_vm1, %v481_v29  ;;  %v1230_v30 = vpop.f32.mrb[1].mxu1 }
 0x305   : > { %v561_v31 = vpop.f32.mrb[2].mxu1 }
 0x306   : > { %v562_v32 = vadd.f32 %v561_v31, %v1542_v9  ;;  %v1235_v33 = vpop.f32.mrb[3].mxu1 }
 0x308   : > { %v565_v34 = vsel %vm324_vm1, %v562_v32, -inf }
 0x309   : > { %566 = vmax.xlane.f32.xlu1 %v565_v34  ;;  %v735_v35 = vpop.f32.mrb[4].mxu1 }
 0x30a   : > { %v736_v36 = vadd.f32 %v735_v35, %v1542_v9  ;;  %v1245_v37 = vpop.f32.mrb[5].mxu1 }
 0x30c   : > { %v739_v38 = vsel %vm324_vm1, %v736_v36, -inf }
 0x30d   : > { %740 = vmax.xlane.f32.xlu0 %v739_v38  ;;  %v908_v39 = vpop.f32.mrb[6].mxu1 }
 0x30e   : > { %v909_v40 = vadd.f32 %v908_v39, %v1542_v9  ;;  %v1255_v41 = vpop.f32.mrb[7].mxu1 }
 0x310   : > { %v912_v42 = vsel %vm324_vm1, %v909_v40, -inf }
 0x311   : > { %913 = vmax.xlane.f32.xlu1 %v912_v42 }
 0x396   : > { %v567_v43 = vpop.xlane.xlu1 %566 }
 0x397   : > { %v568_v44 = vsub.f32 %v562_v32, %v567_v43 }
 0x399   : > { %v569_v45 = vmul.f32 1.442695, %v568_v44 }
 0x39a   : > { %v741_v46 = vpop.xlane.xlu0 %740 }
 0x39b   : > { %1329 = vpow2.f32 %v569_v45  ;;  %v742_v47 = vsub.f32 %v736_v36, %v741_v46 }
 0x39d   : > { %v743_v48 = vmul.f32 1.442695, %v742_v47 }
 0x39e   : > { %v914_v53 = vpop.xlane.xlu1 %913 }
 0x39f   : > { %1331 = vpow2.f32 %v743_v48  ;;  %v915_v54 = vsub.f32 %v909_v40, %v914_v53 }
 0x3a1   : > { %v916_v55 = vmul.f32 1.442695, %v915_v54 }
 0x3a3   : > { %1333 = vpow2.f32 %v916_v55 }
 0x3a5   : > { %v1330_v49 = vpop.eup %1329 }
 0x3a6   : > { %v571_v50 = vsel %vm324_vm1, %v1330_v49, 0.0 }
 0x3a7   : > { %572 = vadd.xlane.f32.xlu1 %v571_v50 }
 0x3a9   : > { %v1332_v51 = vpop.eup %1331 }
 0x3aa   : > { %v745_v52 = vsel %vm324_vm1, %v1332_v51, 0.0 }
 0x3ab   : > { %746 = vadd.xlane.f32.xlu0 %v745_v52 }
 0x3ad   : > { %v1334_v56 = vpop.eup %1333 }
 0x3ae   : > { %v918_v57 = vsel %vm324_vm1, %v1334_v56, 0.0 }
 0x3b8   : > { %750 = vrot.lane.b32.xlu1 %v1556_v19, %s1424_s25  ;;  %s1620_s25 = scalar_lea.hbm %s1682_s5, %s1204_s15 }
 0x3c1   : > { %577 = vrot.lane.b32.xlu0 %v1556_v19, %s1423_s24 }
 0x3dc   : > { %919 = vadd.xlane.f32.xlu1 %v918_v57 }
 0x3ed   : > { %923 = vrot.lane.b32.xlu1 %v1556_v19, %s1425_s27  ;;  %s1626_s27 = scalar_lea.sflag [#allocation4], %s284_s10 }
 0x434   : > { %v573_v58 = vpop.xlane.xlu1 %572 }
 0x435   : > { %1335 = vrcp.f32 %v573_v58 }
 0x438   : > { %v747_v59 = vpop.xlane.xlu0 %746  ;;  %v751_v63 = vpop.permute.xlu1 %750 }
 0x439   : > { %1337 = vrcp.f32 %v747_v59 }
 0x43c   : > { %v578_v60 = vpop.permute.xlu0 %577 }
 0x43d   : > { %1237 = vmatpush3.msra.mxu0 %v578_v60 }
 0x43e   : > { %1246 = vmatprep.subr.mxu0 %v1421_v0 }
 0x43f   : > { %v1336_v61 = vpop.eup %1335 }
 0x440   : > { %v575_v62 = vmul.f32 %v1336_v61, %v1330_v49 }
 0x442   : > { %1190 = vst.msk [vmem:[%s1565_s12 + $0x8] sm:$0xff] %vm324_vm1, %v575_v62  ;;  %1239 = vmatmul.mubr.msk.f32.vlgmr.msra.gmra.mrb[2].mxu0 %vm324_vm1, %v575_v62 }
 0x443   : > { %v1338_v1 = vpop.eup %1337  ;;  %1247 = vmatpush3.msra.mxu0 %v751_v63  ;;  %1248 = vmatprep.mubr.msk.f32.mxu0 %vm1422_vm0, %v1421_v0 }
 0x444   : > { %v749_v2 = vmul.f32 %v1338_v1, %v1332_v51  ;;  %1256 = vmatprep.subr.mxu0 %v1421_v0 }
 0x446   : > { %1194 = vst.msk [vmem:[%s1565_s12 + $0x10] sm:$0xff] %vm324_vm1, %v749_v2  ;;  %1249 = vmatmul.mubr.msk.f32.vlgmr.msra.gmra.mrb[4].mxu0 %vm324_vm1, %v749_v2 }
 0x447   : > { %1258 = vmatprep.mubr.msk.f32.mxu0 %vm1422_vm0, %v1421_v0 }
 0x469   : > { %v920_v3 = vpop.xlane.xlu1 %919 }
 0x46a   : > { %1339 = vrcp.f32 %v920_v3 }
 0x46d   : > { %v924_v4 = vpop.permute.xlu1 %923 }
 0x46e   : > { %1257 = vmatpush3.msra.mxu0 %v924_v4 }
 0x474   : > { %v1340_v5 = vpop.eup %1339 }
 0x475   : > { %v922_v6 = vmul.f32 %v1340_v5, %v1334_v56 }
 0x477   : > { %1198 = vst.msk [vmem:[%s1565_s12 + $0x18] sm:$0xff] %vm324_vm1, %v922_v6  ;;  %1259 = vmatmul.mubr.msk.f32.vlgmr.msra.gmra.mrb[6].mxu0 %vm324_vm1, %v922_v6 }
 0x515   : > { %v649_v7 = vpop.f32.mrb[2].mxu0 }
 0x516   : > { %654 = vrot.lane.b32.xlu0 %v649_v7, %s1426_s13  ;;  %v1240_v8 = vpop.f32.mrb[3].mxu0 }
 0x519   : > { %v822_v0 = vpop.f32.mrb[4].mxu0 }
 0x51a   : > { %827 = vrot.lane.b32.xlu1 %v822_v0, %s1427_s14  ;;  %v1250_v9 = vpop.f32.mrb[5].mxu0 }
 0x51b   : > { %1354 = shalt.err (!%p1351_p5)
}
 0x51c   : > { %s1355_s10 = scalar_lea.hbm %s1620_s25, 512  ;;  %s1359_s14 = scalar_lea.hbm %s1682_s5, 1024 }
 0x51d   : > { %p1356_p6 = scmp.ne.s32.totalorder %s1620_s25, %s1355_s10  ;;  %p1360_p10 = scmp.lt.u32.totalorder %s1620_s25, %s1682_s5 }
 0x51e   : > { %p1361_p11 = scmp.lt.u32.totalorder %s1359_s14, %s1355_s10  ;;  %p1363_p13 = scmp.lt.u32.totalorder %s1355_s10, %s1620_s25 }
 0x51f   : > { %p1357_p7 = pnand %p1356_p6, %p1501_p4 }
 0x520   : > { %p1362_p12 = por %p1361_p11, %p1360_p10 }
 0x521   : > { %p1358_p9 = pneg %p1357_p7 }
 0x522   : > { %p1364_p0 = por %p1363_p13, %p1362_p12 }
 0x524   : > { %p1365_p1 = pnand %p1364_p0, %p1358_p9 }
 0x526   : > { %1368 = shalt.err (!%p1365_p1)
}
 0x527   : > { %s1429_s24 = smov 128   ;;  %s1430_s29 = smov 24   ;;  %vm657_vm2 = vcmask 130112   ;;  %vm830_vm3 = vcmask 195712   ;;  %vm1003_vm4 = vcmask 261312   ;;  %vm1008_vm5 = vcmask 261120  }
 0x528   : > { %1261 = dma.vmem_to_hbm [thread:$0]  (%p1501_p4), %s1622_s16, 512, %s1620_s25, %s1626_s27, %s1429_s24, %s1429_s24, %s1426_s13  }
 0x529   : > { %s311_s7 = scalar_lea.vmem %s1681_s4, %s1524_s8 }
 0x54a   : > { %v995_v10 = vpop.f32.mrb[6].mxu0 }
 0x54b   : > { %1000 = vrot.lane.b32.xlu0 %v995_v10, %s1430_s29  ;;  %v1260_v11 = vpop.f32.mrb[7].mxu0 }
 0x588   : > { %v655_v12 = vpop.permute.xlu0 %654 }
 0x589   : > { %658 = vst.msk [vmem:[#allocation2] sm:$0xff] %vm657_vm2, %v655_v12 }
 0x58c   : > { %v828_v13 = vpop.permute.xlu1 %827 }
 0x58d   : > { %831 = vst.msk [vmem:[#allocation2] sm:$0xff] %vm830_vm3, %v828_v13 }
 0x5bd   : > { %v1001_v14 = vpop.permute.xlu0 %1000 }
 0x5be   : > { %1004 = vst.msk [vmem:[#allocation2] sm:$0xff] %vm1003_vm4, %v1001_v14 }
 0x5c5   : > { %v1007_v15 = vld [vmem:[#allocation2] sm:$0xff] }
 0x5c6   : > { %1009 = vst.msk [vmem:[%s311_s7] sm:$0xff] %vm1008_vm5, %v1007_v15 }
 0x5c7 PF: > { %p1267_p4 = scmp.ge.s32.totalorder %s1419_s23, 2  ;;  %s1060_s13 = sand.u32 1, %s1399_s18  }
 0x5c8   : > { %s1061_s16 = scalar_lea.sflag [#allocation4], %s1060_s13 }
 0x5c9   : > { %p1264_p2 = pnand %p1267_p4, %p1508_p8 }
 0x5cb   : > { %1394 = dma.done.wait (!%p1264_p2), %s1061_s16, 512  }
 0x5cc   : > { %1396 = vsyncadd (!%p1264_p2), %s1061_s16, 4294966784  ;;  %s19_s23 = sadd.s32 1, %s1419_s23   ;;  %s1685_s18 = smov %s1403_s19 }
 0x5cd   : > { %p16_p3 = scmp.ge.s32.totalorder %s19_s23, 4   ;;  %s1686_s19 = smov %s1407_s20 }
 0x5ce   : > { %s1687_s20 = smov %s1514_s6  ;;  %s1688_s21 = smov %s1415_s22 }
 0x5cf   : > { %s1689_s22 = smov %s1691_s26  ;;  %18 = sbr.rel (!%p16_p3) target bundleno = 4 (0x4), region = 95 }
 0x5d6   :  { %1066 = vsyncpa [#allocation4], 1 }
 0x5d7   :  { %1068 = vsyncpa [#allocation4 + $0x1], 1 }

// kernel: decoder_layer.17
= control target key start
LH: loop header
LB: loop body
LE: loop exit
PB: predicated region body
PF: predicated region fallthrough
CT: control target
= control target key end

     0   :  { %v262_v1 = vmov 0.0   ;;  %vm263_vm0 = vmmov 0   ;;  %vm29_vm1 = vcmask 261120   ;;  %s357_s0 = inlined_call_operand.vmem [shape: f32[16,64], index: 0, kind: input, shape index: {}]   ;;  %s358_s1 = inlined_call_operand.vmem [shape: bf16[64,32], index: 1, kind: input, shape index: {}]   ;;  %s359_s2 = inlined_call_operand.vmem [shape: f32[1,32], index: 2, kind: input, shape index: {}]   ;;  %s360_s3 = inlined_call_operand.vmem [shape: f32[16,32], index: 3, kind: input, shape index: {}]   ;;  %s361_s4 = inlined_call_operand.vmem [shape: f32[1,32], index: 4, kind: input, shape index: {}]   ;;  %s362_s5 = inlined_call_operand.vmem [shape: f32[1,32], index: 5, kind: input, shape index: {}]   ;;  %s363_s6 = inlined_call_operand.hbm [shape: f32[16,32], index: 6, kind: output, shape index: {}]  }
   0x1   :  { %v230_v0 = vld [vmem:[%s358_s1] sm:$0xff]   ;;  %213 = vmatprep.subr.bf16.mxu0 %v262_v1  ;;  %v231_v2 = vld [vmem:[%s358_s1 + $0x8] sm:$0xff]   ;;  %221 = vmatprep.mubr.msk.bf16.mxu0 %vm263_vm0, %v262_v1  ;;  %30 = vst.msk [vmem:[#allocation2] sm:$0xff] %vm29_vm1, %v262_v1  ;;  %31 = vst.msk [vmem:[#allocation2 + $0x8] sm:$0xff] %vm29_vm1, %v262_v1 }
   0x2   :  { %214 = vmatpush3.bf16.msra.mxu0 %v230_v0 }
   0x3   :  { %215 = vmatprep.subr.bf16.mxu0 %v262_v1 }
   0x4   :  { %11 = vsyncpa [#allocation4], 0  ;;  %v232_v3 = vld [vmem:[%s358_s1 + $0x10] sm:$0xff]   ;;  %v233_v4 = vld [vmem:[%s358_s1 + $0x18] sm:$0xff]   ;;  %vm69_vm2 = vcmask 523264   ;;  %s264_s15 = smov [#allocation3]  }
   0x5   :  { %v34_v5 = vld [vmem:[%s357_s0] sm:$0xff]  ;;  %v35_v6 = vld [vmem:[%s357_s0 + $0x8] sm:$0xff]  ;;  %s189_s16 = sshll.u32 %s264_s15, 4  ;;  %s190_s16 = int_to_ptr.vmem [resolvable:$true] %s189_s16 }
   0x6   :  { %216 = vmatpush3.bf16.msra.mxu0 %v231_v2  ;;  %v36_v7 = vpack.c.bf16 %v35_v6, %v34_v5  ;;  %v205_v16 = vld [vmem:[%s359_s2] ss:$0 sm:$0xff]  ;;  %v134_v21 = vld [vmem:[%s360_s3 + $0x8] sm:$0xff]  ;;  %s238_s17 = scalar_lea.vmem %s190_s16, 256  ;;  %p243_p1 = scmp.lt.s32.totalorder %s190_s16, %s190_s16 }
   0x7   :  { %217 = vmatprep.subr.bf16.mxu0 %v262_v1  ;;  %v133_v18 = vld [vmem:[%s360_s3] sm:$0xff]  ;;  %p239_p0 = scmp.ne.s32.totalorder %s190_s16, %s238_s17  ;;  %p244_p2 = scmp.lt.s32.totalorder %s238_s17, %s238_s17 }
   0x8   :  { %v32_v8 = vld [vmem:[#allocation2] sm:$0xff]  ;;  %v33_v10 = vld [vmem:[#allocation2 + $0x8] sm:$0xff] }
   0x9   :  { %v206_v44 = vld [vmem:[%s361_s4] ss:$0 sm:$0xff]  ;;  %p245_p3 = por %p244_p2, %p243_p1 }
   0xa   :  { %218 = vmatpush3.bf16.msra.mxu0 %v232_v3  ;;  %v207_v46 = vld [vmem:[%s362_s5] ss:$0 sm:$0xff] }
   0xb   :  { %219 = vmatprep.subr.bf16.mxu0 %v262_v1  ;;  %p246_p4 = pnand %p245_p3, %p239_p0 }
   0xe   :  { %220 = vmatpush3.bf16.msra.mxu0 %v233_v4 }
  0x11   :  { %222 = vmatmul.mubr.msk.bf16.vlgmr.msra.gmra.mrb[0].mxu0 %vm69_vm2, %v36_v7 }
  0xe4   :  { %v107_v9 = vpop.f32.mrb[0].mxu0 }
  0xe5   :  { %v114_v11 = vadd.f32 %v107_v9, %v32_v8  ;;  %v223_v12 = vpop.f32.mrb[1].mxu0 }
  0xe6   :  { %v110_v13 = vpop.f32.mrb[2].mxu0 }
  0xe7   :  { %117 = vst.msk [vmem:[#allocation2] sm:$0xff] %vm29_vm1, %v114_v11  ;;  %v115_v14 = vadd.f32 %v110_v13, %v33_v10  ;;  %v224_v15 = vpop.f32.mrb[3].mxu0 }
  0xe9   :  { %118 = vst.msk [vmem:[#allocation2 + $0x8] sm:$0xff] %vm29_vm1, %v115_v14 }
  0xee   :  { %v122_v17 = vld [vmem:[#allocation2] sm:$0xff] }
  0xef   :  { %v131_v19 = vadd.f32 %v205_v16, %v122_v17 }
  0xf0   :  { %v123_v20 = vld [vmem:[#allocation2 + $0x8] sm:$0xff] }
  0xf1   :  { %v135_v22 = vadd.f32 %v133_v18, %v131_v19  ;;  %v132_v23 = vadd.f32 %v205_v16, %v123_v20 }
  0xf3   :  { %v137_v24 = vsel %vm29_vm1, %v135_v22, 0.0  ;;  %v136_v25 = vadd.f32 %v134_v21, %v132_v23 }
  0xf4   :  { %138 = vadd.xlane.f32.xlu0 %v137_v24 }
  0xf5   :  { %v140_v26 = vsel %vm29_vm1, %v136_v25, 0.0 }
  0xf8   :  { %141 = vadd.xlane.f32.xlu0 %v140_v26 }
 0x181   :  { %v139_v27 = vpop.xlane.xlu0 %138 }
 0x182   :  { %v144_v28 = vmul.f32 0.03125, %v139_v27 }
 0x184   :  { %v146_v29 = vsub.f32 %v135_v22, %v144_v28 }
 0x185   :  { %v142_v30 = vpop.xlane.xlu0 %141 }
 0x186   :  { %v145_v31 = vmul.f32 0.03125, %v142_v30  ;;  %v148_v32 = vmul.f32 %v146_v29, %v146_v29 }
 0x188   :  { %v147_v33 = vsub.f32 %v136_v25, %v145_v31  ;;  %v150_v34 = vsel %vm29_vm1, %v148_v32, 0.0 }
 0x189   :  { %151 = vadd.xlane.f32.xlu1 %v150_v34 }
 0x18a   :  { %v149_v35 = vmul.f32 %v147_v33, %v147_v33 }
 0x18c   :  { %v153_v36 = vsel %vm29_vm1, %v149_v35, 0.0 }
 0x18d   :  { %154 = vadd.xlane.f32.xlu1 %v153_v36 }
 0x216   :  { %v152_v37 = vpop.xlane.xlu1 %151 }
 0x217   :  { %v156_v38 = vmul.f32 0.03125, %v152_v37 }
 0x219   :  { %v158_v39 = vadd.f32 1e-06, %v156_v38 }
 0x21a   :  { %v155_v40 = vpop.xlane.xlu1 %154 }
 0x21b   :  { %234 = vrsqrt.f32 %v158_v39  ;;  %v157_v41 = vmul.f32 0.03125, %v155_v40 }
 0x21d   :  { %v159_v42 = vadd.f32 1e-06, %v157_v41 }
 0x21f   :  { %236 = vrsqrt.f32 %v159_v42 }
 0x225   :  { %v235_v43 = vpop.eup %234 }
 0x226   :  { %v162_v45 = vmul.f32 %v235_v43, %v146_v29 }
 0x228   :  { %v171_v47 = vmul.f32 %v206_v44, %v162_v45 }
 0x229   :  { %v237_v48 = vpop.eup %236 }
 0x22a   :  { %v163_v49 = vmul.f32 %v237_v48, %v147_v33  ;;  %v180_v50 = vadd.f32 %v207_v46, %v171_v47 }
 0x22c   :  { %v172_v51 = vmul.f32 %v206_v44, %v163_v49  ;;  %182 = vst.msk [vmem:[#allocation3] sm:$0xff] %vm29_vm1, %v180_v50 }
 0x22e   :  { %v181_v52 = vadd.f32 %v207_v46, %v172_v51 }
 0x230   :  { %183 = vst.msk [vmem:[#allocation3 + $0x8] sm:$0xff] %vm29_vm1, %v181_v52 }
 0x231   :  { %249 = shalt.err (!%p246_p4)
}
 0x232   :  { %s250_s18 = scalar_lea.hbm %s363_s6, 256 }
 0x233   :  { %p251_p5 = scmp.ne.s32.totalorder %s363_s6, %s250_s18  ;;  %p254_p6 = scmp.lt.u32.totalorder %s250_s18, %s363_s6 }
 0x235   :  { %p256_p7 = pnand %p254_p6, %p251_p5 }
 0x237   :  { %259 = shalt.err (!%p256_p7)
}
 0x238   :  { %s265_s23 = smov 128   ;;  %s266_s24 = smov 8  }
 0x239   :  { %195 = dma.vmem_to_hbm [thread:$0]  %s190_s16, 256, %s363_s6, [#allocation4], %s265_s23, %s265_s23, %s266_s24  }
 0x23a   :  { %260 = dma.done.wait [#allocation4], 256  }
 0x23b   :  { %261 = vsyncadd [#allocation4], 4294967040 }
 0x23c   :  { %199 = vsyncpa [#allocation4], 1 }

</bundles_post_ra>
